<compile_context>
chip_gen: v7x
topology: tpu7x:2x2x1
jax: 0.10.0
libtpu: 0.0.40
codegen_flags: <defaults>
</compile_context>

<pallas_src>
import math
import functools

import jax
import jax.numpy as jnp
from jax.experimental import pallas as pl
from jax.experimental.pallas import tpu as pltpu

LN_EPS = 1e-5  # PyTorch nn.LayerNorm default eps


# ----------------------------- helpers -------------------------------------

def _layernorm(x, w, b):
    mu = jnp.mean(x, axis=-1, keepdims=True)
    var = jnp.mean((x - mu) ** 2, axis=-1, keepdims=True)
    return (x - mu) * jax.lax.rsqrt(var + LN_EPS) * w + b


def positional_embedding(seq_length, embedding_dim):
    pos = jnp.arange(seq_length, dtype=jnp.float32)[:, None]
    div_term = jnp.exp(
        jnp.arange(0, embedding_dim, 2, dtype=jnp.float32)
        * -(math.log(10000.0) / embedding_dim))
    ang = pos * div_term                                   # (S, E/2)
    pe = jnp.stack([jnp.sin(ang), jnp.cos(ang)], axis=-1)  # even=sin, odd=cos
    return pe.reshape(seq_length, embedding_dim)           # (S, E)


# ----------------------------- fused kernel --------------------------------

def fused_pose_transformer_kernel(
        nhead, num_layers, B, S,
        x_ref, pe_ref,
        wq_ref, bq_ref, wk_ref, bk_ref, wv_ref, bv_ref,
        wo_ref, bo_ref, ln1w_ref, ln1b_ref,
        w1_ref, b1_ref, w2_ref, b2_ref, ln2w_ref, ln2b_ref,
        wf1_ref, bf1_ref, wf2_ref, bf2_ref,
        o_ref):
    """All batch elements at once: pos-add + L encoder layers (post-norm) + fc head.

    Activations are a merged, lane-dense (B*S, E) slab; only the attention score /
    context matmuls are done per batch via static sublane-aligned row slices.
    """
    BS, E = x_ref.shape

    # Positional-embedding add folded into the fused kernel (free VPU filler).
    x = x_ref[...] + pe_ref[...]                             # (B*S, E)

    # TODO(synk): switch to lax.fori_loop + dynamic slab indexing if num_layers grows
    # beyond a handful (static unroll grows code size / vreg pressure linearly in L).
    for l in range(num_layers):                              # static unroll (L == 2)
        # ---------------- self-attention block ----------------
        # Per-head Q/K/V matmuls on the merged rows; weights are statically indexed
        # (E, Dh) slabs (1/sqrt(Dh) already folded into wq/bq on the host).
        q_h, k_h, v_h = [], [], []
        for h in range(nhead):                               # static unroll over heads
            idx = l * nhead + h
            q_h.append(jnp.dot(x, wq_ref[idx],
                               preferred_element_type=jnp.float32) + bq_ref[idx])
            k_h.append(jnp.dot(x, wk_ref[idx],
                               preferred_element_type=jnp.float32) + bk_ref[idx])
            v_h.append(jnp.dot(x, wv_ref[idx],
                               preferred_element_type=jnp.float32) + bv_ref[idx])

        # All (batch, head) score tiles stacked along sublanes -> ONE batched softmax.
        tiles = []
        for b in range(B):
            lo, hi = b * S, (b + 1) * S                      # sublane-aligned (S == 8)
            for h in range(nhead):
                tiles.append(jnp.einsum('qd,kd->qk', q_h[h][lo:hi], k_h[h][lo:hi],
                                        preferred_element_type=jnp.float32))
        s_all = jnp.concatenate(tiles, axis=0) if len(tiles) > 1 else tiles[0]
        s_all = s_all - jnp.max(s_all, axis=-1, keepdims=True)     # (B*H*S, S)
        p_all = jnp.exp(s_all)
        p_all = p_all * pl.reciprocal(jnp.sum(p_all, axis=-1, keepdims=True),
                                      approx=True)

        # Per-head context + per-head W_o accumulation (no lane concat of contexts).
        attn = jnp.zeros_like(x)
        for h in range(nhead):
            parts = []
            for b in range(B):
                lo = b * S
                t = (b * nhead + h) * S                      # sublane slice of p_all
                parts.append(jnp.dot(p_all[t:t + S], v_h[h][lo:lo + S],
                                     preferred_element_type=jnp.float32))
            ctx_h = jnp.concatenate(parts, axis=0) if B > 1 else parts[0]  # (B*S, Dh)
            attn = attn + jnp.dot(ctx_h, wo_ref[l * nhead + h],
                                  preferred_element_type=jnp.float32)
        attn = attn + bo_ref[l]

        x = _layernorm(x + attn, ln1w_ref[l], ln1b_ref[l])   # dropout = identity

        # ---------------- feed-forward block ----------------
        h1 = jnp.dot(x, w1_ref[l],
                     preferred_element_type=jnp.float32) + b1_ref[l]
        h1 = jnp.maximum(h1, 0.0)                            # ReLU (PyTorch default)
        ff = jnp.dot(h1, w2_ref[l],
                     preferred_element_type=jnp.float32) + b2_ref[l]
        x = _layernorm(x + ff, ln2w_ref[l], ln2b_ref[l])     # dropout = identity

    # ------------- pose head: Linear -> LeakyReLU(0.1) -> Linear(6) -------------
    hh = jnp.dot(x, wf1_ref[...],
                 preferred_element_type=jnp.float32) + bf1_ref[...]
    hh = jnp.where(hh >= 0, hh, 0.1 * hh)
    o_ref[...] = jnp.dot(hh, wf2_ref[...],
                         preferred_element_type=jnp.float32) + bf2_ref[...]


# ----------------------------- parameter prep ------------------------------

def init_params(key, E, F, L):
    def uni(k, shape, fan_in):
        bound = 1.0 / math.sqrt(fan_in)
        return jax.random.uniform(k, shape, jnp.float32, -bound, bound)

    keys = iter(jax.random.split(key, 8 * L + 4))            # 8 keyed tensors / layer + 4 head
    layers = []
    for _ in range(L):
        layers.append(dict(
            wqkv_t=uni(next(keys), (E, 3 * E), E),            # in_proj_weight^T
            bqkv=uni(next(keys), (1, 3 * E), E),
            wo_t=uni(next(keys), (E, E), E),                  # out_proj.weight^T
            bo=uni(next(keys), (1, E), E),
            ln1_w=jnp.ones((1, E), jnp.float32),
            ln1_b=jnp.zeros((1, E), jnp.float32),
            w1_t=uni(next(keys), (E, F), E),
            b1=uni(next(keys), (1, F), E),
            w2_t=uni(next(keys), (F, E), F),
            b2=uni(next(keys), (1, E), F),
            ln2_w=jnp.ones((1, E), jnp.float32),
            ln2_b=jnp.zeros((1, E), jnp.float32),
        ))
    head = dict(
        wf1_t=uni(next(keys), (E, E), E),
        bf1=uni(next(keys), (1, E), E),
        wf2_t=uni(next(keys), (E, 6), E),
        bf2=uni(next(keys), (1, 6), E),
    )
    stacked = {k: jnp.stack([lp[k] for lp in layers]) for k in layers[0]}
    return dict(stacked=stacked, layers=layers, head=head)


def prepare_kernel_weights(params, nhead):
    """Host-side, one-time weight transform for the fused kernel:
       - split QKV / W_o into per-head (L*H, ...) slabs (static first-axis indexing in-kernel)
       - fold 1/sqrt(Dh) into the Q projection weight and bias."""
    st, hp = params['stacked'], params['head']
    L, E, _ = st['wqkv_t'].shape
    Dh = E // nhead
    scale = 1.0 / math.sqrt(Dh)

    def split_heads(w_cols, b_cols, fold_scale):
        # (L, E, E) -> (L*H, E, Dh) ; (L, 1, E) -> (L*H, 1, Dh)
        w = w_cols.reshape(L, E, nhead, Dh).transpose(0, 2, 1, 3).reshape(L * nhead, E, Dh)
        b = b_cols.reshape(L, 1, nhead, Dh).transpose(0, 2, 1, 3).reshape(L * nhead, 1, Dh)
        if fold_scale:
            w = w * scale
            b = b * scale
        return w, b

    wqkv, bqkv = st['wqkv_t'], st['bqkv']
    wq, bq = split_heads(wqkv[:, :, :E], bqkv[:, :, :E], True)
    wk, bk = split_heads(wqkv[:, :, E:2 * E], bqkv[:, :, E:2 * E], False)
    wv, bv = split_heads(wqkv[:, :, 2 * E:], bqkv[:, :, 2 * E:], False)
    wo = st['wo_t'].reshape(L * nhead, Dh, E)                 # row h*Dh+d of W_o^T -> head h

    return (wq, bq, wk, bk, wv, bv, wo, st['bo'],
            st['ln1_w'], st['ln1_b'],
            st['w1_t'], st['b1'], st['w2_t'], st['b2'],
            st['ln2_w'], st['ln2_b'],
            hp['wf1_t'], hp['bf1'], hp['wf2_t'], hp['bf2'])


# ----------------------------- model glue ----------------------------------

def pose_transformer_forward(x, kernel_weights, nhead):
    B, S, E = x.shape
    (wq, bq, wk, bk, wv, bv, wo, bo, ln1w, ln1b,
     w1, b1, w2, b2, ln2w, ln2b, wf1, bf1, wf2, bf2) = kernel_weights
    L = ln1w.shape[0]
    F = w1.shape[-1]
    Dh = E // nhead

    pe = positional_embedding(S, E)                           # (S, E)
    pe_tiled = jnp.tile(pe, (B, 1))                           # (B*S, E), tiny constant
    x2d = x.reshape(B * S, E)                                 # lane-dense merged rows

    # Advisory cost hint for XLA's scheduler around the custom call.
    flops_layer = (2 * B * S * E * (3 * E)                    # Q/K/V projections
                   + 4 * B * nhead * S * S * Dh               # scores + context
                   + 2 * B * S * E * E                        # output projection
                   + 4 * B * S * E * F)                       # FFN
    flops = L * flops_layer + 2 * B * S * E * (E + 6)
    transcendentals = L * B * nhead * S * S + 4 * L * B * S   # softmax exp + LN rsqrt
    bytes_accessed = 4 * (x2d.size + pe_tiled.size
                          + sum(int(w.size) for w in kernel_weights) + B * S * 6)
    cost = pl.CostEstimate(flops=int(flops),
                           transcendentals=int(transcendentals),
                           bytes_accessed=int(bytes_accessed))

    # Single program, no grid: everything is VMEM-resident; per-batch sharding across
    # TCs is not worth it at this problem size (see perf review).
    out2d = pl.pallas_call(
        functools.partial(fused_pose_transformer_kernel, nhead, L, B, S),
        out_shape=jax.ShapeDtypeStruct((B * S, 6), jnp.float32),
        cost_estimate=cost,
    )(x2d, pe_tiled, *kernel_weights)
    return out2d.reshape(B, S, 6)


def reference_forward(x, params, nhead):
    """Pure-JAX reference mirroring nn.TransformerEncoder (post-norm) + fc head."""
    B, S, E = x.shape
    Dh = E // nhead
    x = x + positional_embedding(S, E)[None]
    for lp in params['layers']:
        qkv = x @ lp['wqkv_t'] + lp['bqkv']
        acc = jnp.zeros_like(x)
        for h in range(nhead):
            qh = qkv[..., h * Dh:(h + 1) * Dh] / math.sqrt(Dh)
            kh = qkv[..., E + h * Dh:E + (h + 1) * Dh]
            vh = qkv[..., 2 * E + h * Dh:2 * E + (h + 1) * Dh]
            p = jax.nn.softmax(jnp.einsum('bqd,bkd->bqk', qh, kh), axis=-1)
            ctx = jnp.einsum('bqk,bkd->bqd', p, vh)
            acc = acc + ctx @ lp['wo_t'][h * Dh:(h + 1) * Dh, :]
        x = _layernorm(x + acc + lp['bo'], lp['ln1_w'], lp['ln1_b'])
        ff = jax.nn.relu(x @ lp['w1_t'] + lp['b1']) @ lp['w2_t'] + lp['b2']
        x = _layernorm(x + ff, lp['ln2_w'], lp['ln2_b'])
    hp = params['head']
    hh = x @ hp['wf1_t'] + hp['bf1']
    hh = jnp.where(hh >= 0, hh, 0.1 * hh)
    return hh @ hp['wf2_t'] + hp['bf2']


if __name__ == "__main__":
    # opt: embedding_dim=32, nhead=4, dim_feedforward=64, num_layers=2
    B, S, E, NHEAD, F, L = 2, 8, 32, 4, 64, 2
    key = jax.random.PRNGKey(0)
    kx, kp = jax.random.split(key)
    x = jax.random.normal(kx, (B, S, E), jnp.float32)
    params = init_params(kp, E, F, L)
    kernel_weights = prepare_kernel_weights(params, NHEAD)    # host-side, done once

    out = pose_transformer_forward(x, kernel_weights, NHEAD)
    out = jax.block_until_ready(out)

    ref = reference_forward(x, params, NHEAD)
    assert out.shape == (B, S, 6)
    max_err = float(jnp.max(jnp.abs(out - ref)))
    assert jnp.allclose(out, ref, atol=2e-2, rtol=2e-2), max_err

    print("KERNEL_OK")
</pallas_src>

<mosaic_0001>
module attributes {stable_mosaic.version = 11 : i64} {
  func.func @fused_pose_transformer_kernel(%arg0: memref<16x32xf32, #tpu.memory_space<vmem>>, %arg1: memref<16x32xf32, #tpu.memory_space<vmem>>, %arg2: memref<8x32x8xf32, #tpu.memory_space<vmem>>, %arg3: memref<8x1x8xf32, #tpu.memory_space<vmem>>, %arg4: memref<8x32x8xf32, #tpu.memory_space<vmem>>, %arg5: memref<8x1x8xf32, #tpu.memory_space<vmem>>, %arg6: memref<8x32x8xf32, #tpu.memory_space<vmem>>, %arg7: memref<8x1x8xf32, #tpu.memory_space<vmem>>, %arg8: memref<8x8x32xf32, #tpu.memory_space<vmem>>, %arg9: memref<2x1x32xf32, #tpu.memory_space<vmem>>, %arg10: memref<2x1x32xf32, #tpu.memory_space<vmem>>, %arg11: memref<2x1x32xf32, #tpu.memory_space<vmem>>, %arg12: memref<2x32x64xf32, #tpu.memory_space<vmem>>, %arg13: memref<2x1x64xf32, #tpu.memory_space<vmem>>, %arg14: memref<2x64x32xf32, #tpu.memory_space<vmem>>, %arg15: memref<2x1x32xf32, #tpu.memory_space<vmem>>, %arg16: memref<2x1x32xf32, #tpu.memory_space<vmem>>, %arg17: memref<2x1x32xf32, #tpu.memory_space<vmem>>, %arg18: memref<32x32xf32, #tpu.memory_space<vmem>>, %arg19: memref<1x32xf32, #tpu.memory_space<vmem>>, %arg20: memref<32x6xf32, #tpu.memory_space<vmem>>, %arg21: memref<1x6xf32, #tpu.memory_space<vmem>>, %arg22: memref<16x6xf32, #tpu.memory_space<vmem>>) attributes {dimension_semantics = [], scalar_prefetch = 0 : i64, scratch_operands = 0 : i64, tpu.core_type = #tpu.core_type<tc>} {
    %c0 = arith.constant 0 : index
    %c0_0 = arith.constant 0 : index
    %0 = vector.load %arg0[%c0, %c0_0] : memref<16x32xf32, #tpu.memory_space<vmem>>, vector<16x32xf32>
    %c0_1 = arith.constant 0 : index
    %c0_2 = arith.constant 0 : index
    %1 = vector.load %arg1[%c0_1, %c0_2] : memref<16x32xf32, #tpu.memory_space<vmem>>, vector<16x32xf32>
    %2 = arith.addf %0, %1 : vector<16x32xf32>
    %c0_3 = arith.constant 0 : index
    %c0_4 = arith.constant 0 : index
    %c0_5 = arith.constant 0 : index
    %3 = vector.load %arg2[%c0_3, %c0_4, %c0_5] : memref<8x32x8xf32, #tpu.memory_space<vmem>>, vector<1x32x8xf32>
    %4 = vector.shape_cast %3 : vector<1x32x8xf32> to vector<32x8xf32>
    %cst = arith.constant dense<0.000000e+00> : vector<16x8xf32>
    %5 = tpu.matmul %2, %4, %cst {dimension_numbers = #tpu.dot_dimension_numbers<[1], [0], [0], [1], [0, 0, 1, 1], [], []>} : vector<16x32xf32>, vector<32x8xf32>, vector<16x8xf32> -> vector<16x8xf32>
    %c0_6 = arith.constant 0 : index
    %c0_7 = arith.constant 0 : index
    %c0_8 = arith.constant 0 : index
    %6 = vector.load %arg3[%c0_6, %c0_7, %c0_8] : memref<8x1x8xf32, #tpu.memory_space<vmem>>, vector<1x1x8xf32>
    %7 = vector.shape_cast %6 : vector<1x1x8xf32> to vector<1x8xf32>
    %8 = vector.broadcast %7 : vector<1x8xf32> to vector<16x8xf32>
    %9 = arith.addf %5, %8 : vector<16x8xf32>
    %c0_9 = arith.constant 0 : index
    %c0_10 = arith.constant 0 : index
    %c0_11 = arith.constant 0 : index
    %10 = vector.load %arg4[%c0_9, %c0_10, %c0_11] : memref<8x32x8xf32, #tpu.memory_space<vmem>>, vector<1x32x8xf32>
    %11 = vector.shape_cast %10 : vector<1x32x8xf32> to vector<32x8xf32>
    %cst_12 = arith.constant dense<0.000000e+00> : vector<16x8xf32>
    %12 = tpu.matmul %2, %11, %cst_12 {dimension_numbers = #tpu.dot_dimension_numbers<[1], [0], [0], [1], [0, 0, 1, 1], [], []>} : vector<16x32xf32>, vector<32x8xf32>, vector<16x8xf32> -> vector<16x8xf32>
    %c0_13 = arith.constant 0 : index
    %c0_14 = arith.constant 0 : index
    %c0_15 = arith.constant 0 : index
    %13 = vector.load %arg5[%c0_13, %c0_14, %c0_15] : memref<8x1x8xf32, #tpu.memory_space<vmem>>, vector<1x1x8xf32>
    %14 = vector.shape_cast %13 : vector<1x1x8xf32> to vector<1x8xf32>
    %15 = vector.broadcast %14 : vector<1x8xf32> to vector<16x8xf32>
    %16 = arith.addf %12, %15 : vector<16x8xf32>
    %c0_16 = arith.constant 0 : index
    %c0_17 = arith.constant 0 : index
    %c0_18 = arith.constant 0 : index
    %17 = vector.load %arg6[%c0_16, %c0_17, %c0_18] : memref<8x32x8xf32, #tpu.memory_space<vmem>>, vector<1x32x8xf32>
    %18 = vector.shape_cast %17 : vector<1x32x8xf32> to vector<32x8xf32>
    %cst_19 = arith.constant dense<0.000000e+00> : vector<16x8xf32>
    %19 = tpu.matmul %2, %18, %cst_19 {dimension_numbers = #tpu.dot_dimension_numbers<[1], [0], [0], [1], [0, 0, 1, 1], [], []>} : vector<16x32xf32>, vector<32x8xf32>, vector<16x8xf32> -> vector<16x8xf32>
    %c0_20 = arith.constant 0 : index
    %c0_21 = arith.constant 0 : index
    %c0_22 = arith.constant 0 : index
    %20 = vector.load %arg7[%c0_20, %c0_21, %c0_22] : memref<8x1x8xf32, #tpu.memory_space<vmem>>, vector<1x1x8xf32>
    %21 = vector.shape_cast %20 : vector<1x1x8xf32> to vector<1x8xf32>
    %22 = vector.broadcast %21 : vector<1x8xf32> to vector<16x8xf32>
    %23 = arith.addf %19, %22 : vector<16x8xf32>
    %c1 = arith.constant 1 : index
    %c0_23 = arith.constant 0 : index
    %c0_24 = arith.constant 0 : index
    %24 = vector.load %arg2[%c1, %c0_23, %c0_24] : memref<8x32x8xf32, #tpu.memory_space<vmem>>, vector<1x32x8xf32>
    %25 = vector.shape_cast %24 : vector<1x32x8xf32> to vector<32x8xf32>
    %cst_25 = arith.constant dense<0.000000e+00> : vector<16x8xf32>
    %26 = tpu.matmul %2, %25, %cst_25 {dimension_numbers = #tpu.dot_dimension_numbers<[1], [0], [0], [1], [0, 0, 1, 1], [], []>} : vector<16x32xf32>, vector<32x8xf32>, vector<16x8xf32> -> vector<16x8xf32>
    %c1_26 = arith.constant 1 : index
    %c0_27 = arith.constant 0 : index
    %c0_28 = arith.constant 0 : index
    %27 = vector.load %arg3[%c1_26, %c0_27, %c0_28] : memref<8x1x8xf32, #tpu.memory_space<vmem>>, vector<1x1x8xf32>
    %28 = vector.shape_cast %27 : vector<1x1x8xf32> to vector<1x8xf32>
    %29 = vector.broadcast %28 : vector<1x8xf32> to vector<16x8xf32>
    %30 = arith.addf %26, %29 : vector<16x8xf32>
    %c1_29 = arith.constant 1 : index
    %c0_30 = arith.constant 0 : index
    %c0_31 = arith.constant 0 : index
    %31 = vector.load %arg4[%c1_29, %c0_30, %c0_31] : memref<8x32x8xf32, #tpu.memory_space<vmem>>, vector<1x32x8xf32>
    %32 = vector.shape_cast %31 : vector<1x32x8xf32> to vector<32x8xf32>
    %cst_32 = arith.constant dense<0.000000e+00> : vector<16x8xf32>
    %33 = tpu.matmul %2, %32, %cst_32 {dimension_numbers = #tpu.dot_dimension_numbers<[1], [0], [0], [1], [0, 0, 1, 1], [], []>} : vector<16x32xf32>, vector<32x8xf32>, vector<16x8xf32> -> vector<16x8xf32>
    %c1_33 = arith.constant 1 : index
    %c0_34 = arith.constant 0 : index
    %c0_35 = arith.constant 0 : index
    %34 = vector.load %arg5[%c1_33, %c0_34, %c0_35] : memref<8x1x8xf32, #tpu.memory_space<vmem>>, vector<1x1x8xf32>
    %35 = vector.shape_cast %34 : vector<1x1x8xf32> to vector<1x8xf32>
    %36 = vector.broadcast %35 : vector<1x8xf32> to vector<16x8xf32>
    %37 = arith.addf %33, %36 : vector<16x8xf32>
    %c1_36 = arith.constant 1 : index
    %c0_37 = arith.constant 0 : index
    %c0_38 = arith.constant 0 : index
    %38 = vector.load %arg6[%c1_36, %c0_37, %c0_38] : memref<8x32x8xf32, #tpu.memory_space<vmem>>, vector<1x32x8xf32>
    %39 = vector.shape_cast %38 : vector<1x32x8xf32> to vector<32x8xf32>
    %cst_39 = arith.constant dense<0.000000e+00> : vector<16x8xf32>
    %40 = tpu.matmul %2, %39, %cst_39 {dimension_numbers = #tpu.dot_dimension_numbers<[1], [0], [0], [1], [0, 0, 1, 1], [], []>} : vector<16x32xf32>, vector<32x8xf32>, vector<16x8xf32> -> vector<16x8xf32>
    %c1_40 = arith.constant 1 : index
    %c0_41 = arith.constant 0 : index
    %c0_42 = arith.constant 0 : index
    %41 = vector.load %arg7[%c1_40, %c0_41, %c0_42] : memref<8x1x8xf32, #tpu.memory_space<vmem>>, vector<1x1x8xf32>
    %42 = vector.shape_cast %41 : vector<1x1x8xf32> to vector<1x8xf32>
    %43 = vector.broadcast %42 : vector<1x8xf32> to vector<16x8xf32>
    %44 = arith.addf %40, %43 : vector<16x8xf32>
    %c2 = arith.constant 2 : index
    %c0_43 = arith.constant 0 : index
    %c0_44 = arith.constant 0 : index
    %45 = vector.load %arg2[%c2, %c0_43, %c0_44] : memref<8x32x8xf32, #tpu.memory_space<vmem>>, vector<1x32x8xf32>
    %46 = vector.shape_cast %45 : vector<1x32x8xf32> to vector<32x8xf32>
    %cst_45 = arith.constant dense<0.000000e+00> : vector<16x8xf32>
    %47 = tpu.matmul %2, %46, %cst_45 {dimension_numbers = #tpu.dot_dimension_numbers<[1], [0], [0], [1], [0, 0, 1, 1], [], []>} : vector<16x32xf32>, vector<32x8xf32>, vector<16x8xf32> -> vector<16x8xf32>
    %c2_46 = arith.constant 2 : index
    %c0_47 = arith.constant 0 : index
    %c0_48 = arith.constant 0 : index
    %48 = vector.load %arg3[%c2_46, %c0_47, %c0_48] : memref<8x1x8xf32, #tpu.memory_space<vmem>>, vector<1x1x8xf32>
    %49 = vector.shape_cast %48 : vector<1x1x8xf32> to vector<1x8xf32>
    %50 = vector.broadcast %49 : vector<1x8xf32> to vector<16x8xf32>
    %51 = arith.addf %47, %50 : vector<16x8xf32>
    %c2_49 = arith.constant 2 : index
    %c0_50 = arith.constant 0 : index
    %c0_51 = arith.constant 0 : index
    %52 = vector.load %arg4[%c2_49, %c0_50, %c0_51] : memref<8x32x8xf32, #tpu.memory_space<vmem>>, vector<1x32x8xf32>
    %53 = vector.shape_cast %52 : vector<1x32x8xf32> to vector<32x8xf32>
    %cst_52 = arith.constant dense<0.000000e+00> : vector<16x8xf32>
    %54 = tpu.matmul %2, %53, %cst_52 {dimension_numbers = #tpu.dot_dimension_numbers<[1], [0], [0], [1], [0, 0, 1, 1], [], []>} : vector<16x32xf32>, vector<32x8xf32>, vector<16x8xf32> -> vector<16x8xf32>
    %c2_53 = arith.constant 2 : index
    %c0_54 = arith.constant 0 : index
    %c0_55 = arith.constant 0 : index
    %55 = vector.load %arg5[%c2_53, %c0_54, %c0_55] : memref<8x1x8xf32, #tpu.memory_space<vmem>>, vector<1x1x8xf32>
    %56 = vector.shape_cast %55 : vector<1x1x8xf32> to vector<1x8xf32>
    %57 = vector.broadcast %56 : vector<1x8xf32> to vector<16x8xf32>
    %58 = arith.addf %54, %57 : vector<16x8xf32>
    %c2_56 = arith.constant 2 : index
    %c0_57 = arith.constant 0 : index
    %c0_58 = arith.constant 0 : index
    %59 = vector.load %arg6[%c2_56, %c0_57, %c0_58] : memref<8x32x8xf32, #tpu.memory_space<vmem>>, vector<1x32x8xf32>
    %60 = vector.shape_cast %59 : vector<1x32x8xf32> to vector<32x8xf32>
    %cst_59 = arith.constant dense<0.000000e+00> : vector<16x8xf32>
    %61 = tpu.matmul %2, %60, %cst_59 {dimension_numbers = #tpu.dot_dimension_numbers<[1], [0], [0], [1], [0, 0, 1, 1], [], []>} : vector<16x32xf32>, vector<32x8xf32>, vector<16x8xf32> -> vector<16x8xf32>
    %c2_60 = arith.constant 2 : index
    %c0_61 = arith.constant 0 : index
    %c0_62 = arith.constant 0 : index
    %62 = vector.load %arg7[%c2_60, %c0_61, %c0_62] : memref<8x1x8xf32, #tpu.memory_space<vmem>>, vector<1x1x8xf32>
    %63 = vector.shape_cast %62 : vector<1x1x8xf32> to vector<1x8xf32>
    %64 = vector.broadcast %63 : vector<1x8xf32> to vector<16x8xf32>
    %65 = arith.addf %61, %64 : vector<16x8xf32>
    %c3 = arith.constant 3 : index
    %c0_63 = arith.constant 0 : index
    %c0_64 = arith.constant 0 : index
    %66 = vector.load %arg2[%c3, %c0_63, %c0_64] : memref<8x32x8xf32, #tpu.memory_space<vmem>>, vector<1x32x8xf32>
    %67 = vector.shape_cast %66 : vector<1x32x8xf32> to vector<32x8xf32>
    %cst_65 = arith.constant dense<0.000000e+00> : vector<16x8xf32>
    %68 = tpu.matmul %2, %67, %cst_65 {dimension_numbers = #tpu.dot_dimension_numbers<[1], [0], [0], [1], [0, 0, 1, 1], [], []>} : vector<16x32xf32>, vector<32x8xf32>, vector<16x8xf32> -> vector<16x8xf32>
    %c3_66 = arith.constant 3 : index
    %c0_67 = arith.constant 0 : index
    %c0_68 = arith.constant 0 : index
    %69 = vector.load %arg3[%c3_66, %c0_67, %c0_68] : memref<8x1x8xf32, #tpu.memory_space<vmem>>, vector<1x1x8xf32>
    %70 = vector.shape_cast %69 : vector<1x1x8xf32> to vector<1x8xf32>
    %71 = vector.broadcast %70 : vector<1x8xf32> to vector<16x8xf32>
    %72 = arith.addf %68, %71 : vector<16x8xf32>
    %c3_69 = arith.constant 3 : index
    %c0_70 = arith.constant 0 : index
    %c0_71 = arith.constant 0 : index
    %73 = vector.load %arg4[%c3_69, %c0_70, %c0_71] : memref<8x32x8xf32, #tpu.memory_space<vmem>>, vector<1x32x8xf32>
    %74 = vector.shape_cast %73 : vector<1x32x8xf32> to vector<32x8xf32>
    %cst_72 = arith.constant dense<0.000000e+00> : vector<16x8xf32>
    %75 = tpu.matmul %2, %74, %cst_72 {dimension_numbers = #tpu.dot_dimension_numbers<[1], [0], [0], [1], [0, 0, 1, 1], [], []>} : vector<16x32xf32>, vector<32x8xf32>, vector<16x8xf32> -> vector<16x8xf32>
    %c3_73 = arith.constant 3 : index
    %c0_74 = arith.constant 0 : index
    %c0_75 = arith.constant 0 : index
    %76 = vector.load %arg5[%c3_73, %c0_74, %c0_75] : memref<8x1x8xf32, #tpu.memory_space<vmem>>, vector<1x1x8xf32>
    %77 = vector.shape_cast %76 : vector<1x1x8xf32> to vector<1x8xf32>
    %78 = vector.broadcast %77 : vector<1x8xf32> to vector<16x8xf32>
    %79 = arith.addf %75, %78 : vector<16x8xf32>
    %c3_76 = arith.constant 3 : index
    %c0_77 = arith.constant 0 : index
    %c0_78 = arith.constant 0 : index
    %80 = vector.load %arg6[%c3_76, %c0_77, %c0_78] : memref<8x32x8xf32, #tpu.memory_space<vmem>>, vector<1x32x8xf32>
    %81 = vector.shape_cast %80 : vector<1x32x8xf32> to vector<32x8xf32>
    %cst_79 = arith.constant dense<0.000000e+00> : vector<16x8xf32>
    %82 = tpu.matmul %2, %81, %cst_79 {dimension_numbers = #tpu.dot_dimension_numbers<[1], [0], [0], [1], [0, 0, 1, 1], [], []>} : vector<16x32xf32>, vector<32x8xf32>, vector<16x8xf32> -> vector<16x8xf32>
    %c3_80 = arith.constant 3 : index
    %c0_81 = arith.constant 0 : index
    %c0_82 = arith.constant 0 : index
    %83 = vector.load %arg7[%c3_80, %c0_81, %c0_82] : memref<8x1x8xf32, #tpu.memory_space<vmem>>, vector<1x1x8xf32>
    %84 = vector.shape_cast %83 : vector<1x1x8xf32> to vector<1x8xf32>
    %85 = vector.broadcast %84 : vector<1x8xf32> to vector<16x8xf32>
    %86 = arith.addf %82, %85 : vector<16x8xf32>
    %87 = vector.extract_strided_slice %9 {offsets = [0, 0], sizes = [8, 8], strides = [1, 1]} : vector<16x8xf32> to vector<8x8xf32>
    %88 = vector.extract_strided_slice %16 {offsets = [0, 0], sizes = [8, 8], strides = [1, 1]} : vector<16x8xf32> to vector<8x8xf32>
    "tpu.trace_start"() <{level = 10 : i32, message = "qd,kd->qk"}> : () -> ()
    %cst_83 = arith.constant dense<0.000000e+00> : vector<8x8xf32>
    %89 = tpu.matmul %87, %88, %cst_83 {dimension_numbers = #tpu.dot_dimension_numbers<[1], [1], [0], [0], [0, 0, 1, 0], [], []>} : vector<8x8xf32>, vector<8x8xf32>, vector<8x8xf32> -> vector<8x8xf32>
    "tpu.trace_stop"() : () -> ()
    %90 = vector.extract_strided_slice %30 {offsets = [0, 0], sizes = [8, 8], strides = [1, 1]} : vector<16x8xf32> to vector<8x8xf32>
    %91 = vector.extract_strided_slice %37 {offsets = [0, 0], sizes = [8, 8], strides = [1, 1]} : vector<16x8xf32> to vector<8x8xf32>
    "tpu.trace_start"() <{level = 10 : i32, message = "qd,kd->qk"}> : () -> ()
    %cst_84 = arith.constant dense<0.000000e+00> : vector<8x8xf32>
    %92 = tpu.matmul %90, %91, %cst_84 {dimension_numbers = #tpu.dot_dimension_numbers<[1], [1], [0], [0], [0, 0, 1, 0], [], []>} : vector<8x8xf32>, vector<8x8xf32>, vector<8x8xf32> -> vector<8x8xf32>
    "tpu.trace_stop"() : () -> ()
    %93 = vector.extract_strided_slice %51 {offsets = [0, 0], sizes = [8, 8], strides = [1, 1]} : vector<16x8xf32> to vector<8x8xf32>
    %94 = vector.extract_strided_slice %58 {offsets = [0, 0], sizes = [8, 8], strides = [1, 1]} : vector<16x8xf32> to vector<8x8xf32>
    "tpu.trace_start"() <{level = 10 : i32, message = "qd,kd->qk"}> : () -> ()
    %cst_85 = arith.constant dense<0.000000e+00> : vector<8x8xf32>
    %95 = tpu.matmul %93, %94, %cst_85 {dimension_numbers = #tpu.dot_dimension_numbers<[1], [1], [0], [0], [0, 0, 1, 0], [], []>} : vector<8x8xf32>, vector<8x8xf32>, vector<8x8xf32> -> vector<8x8xf32>
    "tpu.trace_stop"() : () -> ()
    %96 = vector.extract_strided_slice %72 {offsets = [0, 0], sizes = [8, 8], strides = [1, 1]} : vector<16x8xf32> to vector<8x8xf32>
    %97 = vector.extract_strided_slice %79 {offsets = [0, 0], sizes = [8, 8], strides = [1, 1]} : vector<16x8xf32> to vector<8x8xf32>
    "tpu.trace_start"() <{level = 10 : i32, message = "qd,kd->qk"}> : () -> ()
    %cst_86 = arith.constant dense<0.000000e+00> : vector<8x8xf32>
    %98 = tpu.matmul %96, %97, %cst_86 {dimension_numbers = #tpu.dot_dimension_numbers<[1], [1], [0], [0], [0, 0, 1, 0], [], []>} : vector<8x8xf32>, vector<8x8xf32>, vector<8x8xf32> -> vector<8x8xf32>
    "tpu.trace_stop"() : () -> ()
    %99 = vector.extract_strided_slice %9 {offsets = [8, 0], sizes = [8, 8], strides = [1, 1]} : vector<16x8xf32> to vector<8x8xf32>
    %100 = vector.extract_strided_slice %16 {offsets = [8, 0], sizes = [8, 8], strides = [1, 1]} : vector<16x8xf32> to vector<8x8xf32>
    "tpu.trace_start"() <{level = 10 : i32, message = "qd,kd->qk"}> : () -> ()
    %cst_87 = arith.constant dense<0.000000e+00> : vector<8x8xf32>
    %101 = tpu.matmul %99, %100, %cst_87 {dimension_numbers = #tpu.dot_dimension_numbers<[1], [1], [0], [0], [0, 0, 1, 0], [], []>} : vector<8x8xf32>, vector<8x8xf32>, vector<8x8xf32> -> vector<8x8xf32>
    "tpu.trace_stop"() : () -> ()
    %102 = vector.extract_strided_slice %30 {offsets = [8, 0], sizes = [8, 8], strides = [1, 1]} : vector<16x8xf32> to vector<8x8xf32>
    %103 = vector.extract_strided_slice %37 {offsets = [8, 0], sizes = [8, 8], strides = [1, 1]} : vector<16x8xf32> to vector<8x8xf32>
    "tpu.trace_start"() <{level = 10 : i32, message = "qd,kd->qk"}> : () -> ()
    %cst_88 = arith.constant dense<0.000000e+00> : vector<8x8xf32>
    %104 = tpu.matmul %102, %103, %cst_88 {dimension_numbers = #tpu.dot_dimension_numbers<[1], [1], [0], [0], [0, 0, 1, 0], [], []>} : vector<8x8xf32>, vector<8x8xf32>, vector<8x8xf32> -> vector<8x8xf32>
    "tpu.trace_stop"() : () -> ()
    %105 = vector.extract_strided_slice %51 {offsets = [8, 0], sizes = [8, 8], strides = [1, 1]} : vector<16x8xf32> to vector<8x8xf32>
    %106 = vector.extract_strided_slice %58 {offsets = [8, 0], sizes = [8, 8], strides = [1, 1]} : vector<16x8xf32> to vector<8x8xf32>
    "tpu.trace_start"() <{level = 10 : i32, message = "qd,kd->qk"}> : () -> ()
    %cst_89 = arith.constant dense<0.000000e+00> : vector<8x8xf32>
    %107 = tpu.matmul %105, %106, %cst_89 {dimension_numbers = #tpu.dot_dimension_numbers<[1], [1], [0], [0], [0, 0, 1, 0], [], []>} : vector<8x8xf32>, vector<8x8xf32>, vector<8x8xf32> -> vector<8x8xf32>
    "tpu.trace_stop"() : () -> ()
    %108 = vector.extract_strided_slice %72 {offsets = [8, 0], sizes = [8, 8], strides = [1, 1]} : vector<16x8xf32> to vector<8x8xf32>
    %109 = vector.extract_strided_slice %79 {offsets = [8, 0], sizes = [8, 8], strides = [1, 1]} : vector<16x8xf32> to vector<8x8xf32>
    "tpu.trace_start"() <{level = 10 : i32, message = "qd,kd->qk"}> : () -> ()
    %cst_90 = arith.constant dense<0.000000e+00> : vector<8x8xf32>
    %110 = tpu.matmul %108, %109, %cst_90 {dimension_numbers = #tpu.dot_dimension_numbers<[1], [1], [0], [0], [0, 0, 1, 0], [], []>} : vector<8x8xf32>, vector<8x8xf32>, vector<8x8xf32> -> vector<8x8xf32>
    "tpu.trace_stop"() : () -> ()
    %111 = tpu.concatenate %89, %92, %95, %98, %101, %104, %107, %110 in 0 : vector<8x8xf32>, vector<8x8xf32>, vector<8x8xf32>, vector<8x8xf32>, vector<8x8xf32>, vector<8x8xf32>, vector<8x8xf32>, vector<8x8xf32> -> vector<64x8xf32>
    %cst_91 = arith.constant dense<0xFF800000> : vector<64xf32>
    %112 = vector.multi_reduction <maximumf>, %111, %cst_91 [1] : vector<64x8xf32> to vector<64xf32>
    %113 = vector.shape_cast %112 : vector<64xf32> to vector<64x1xf32>
    %114 = vector.broadcast %113 : vector<64x1xf32> to vector<64x8xf32>
    %115 = arith.subf %111, %114 : vector<64x8xf32>
    %116 = math.exp %115 : vector<64x8xf32>
    %cst_92 = arith.constant dense<0.000000e+00> : vector<64xf32>
    %117 = vector.multi_reduction <add>, %116, %cst_92 [1] : vector<64x8xf32> to vector<64xf32>
    %118 = vector.shape_cast %117 : vector<64xf32> to vector<64x1xf32>
    %119 = tpu.reciprocal %118 {approx = true} : vector<64x1xf32> -> vector<64x1xf32>
    %120 = vector.broadcast %119 : vector<64x1xf32> to vector<64x8xf32>
    %121 = arith.mulf %116, %120 : vector<64x8xf32>
    %cst_93 = arith.constant 0.000000e+00 : f32
    %122 = vector.broadcast %cst_93 : f32 to vector<16x32xf32>
    %123 = vector.extract_strided_slice %121 {offsets = [0, 0], sizes = [8, 8], strides = [1, 1]} : vector<64x8xf32> to vector<8x8xf32>
    %124 = vector.extract_strided_slice %23 {offsets = [0, 0], sizes = [8, 8], strides = [1, 1]} : vector<16x8xf32> to vector<8x8xf32>
    %cst_94 = arith.constant dense<0.000000e+00> : vector<8x8xf32>
    %125 = tpu.matmul %123, %124, %cst_94 {dimension_numbers = #tpu.dot_dimension_numbers<[1], [0], [0], [1], [0, 0, 1, 1], [], []>} : vector<8x8xf32>, vector<8x8xf32>, vector<8x8xf32> -> vector<8x8xf32>
    %126 = vector.extract_strided_slice %121 {offsets = [32, 0], sizes = [8, 8], strides = [1, 1]} : vector<64x8xf32> to vector<8x8xf32>
    %127 = vector.extract_strided_slice %23 {offsets = [8, 0], sizes = [8, 8], strides = [1, 1]} : vector<16x8xf32> to vector<8x8xf32>
    %cst_95 = arith.constant dense<0.000000e+00> : vector<8x8xf32>
    %128 = tpu.matmul %126, %127, %cst_95 {dimension_numbers = #tpu.dot_dimension_numbers<[1], [0], [0], [1], [0, 0, 1, 1], [], []>} : vector<8x8xf32>, vector<8x8xf32>, vector<8x8xf32> -> vector<8x8xf32>
    %129 = tpu.concatenate %125, %128 in 0 : vector<8x8xf32>, vector<8x8xf32> -> vector<16x8xf32>
    %c0_96 = arith.constant 0 : index
    %c0_97 = arith.constant 0 : index
    %c0_98 = arith.constant 0 : index
    %130 = vector.load %arg8[%c0_96, %c0_97, %c0_98] : memref<8x8x32xf32, #tpu.memory_space<vmem>>, vector<1x8x32xf32>
    %131 = vector.shape_cast %130 : vector<1x8x32xf32> to vector<8x32xf32>
    %cst_99 = arith.constant dense<0.000000e+00> : vector<16x32xf32>
    %132 = tpu.matmul %129, %131, %cst_99 {dimension_numbers = #tpu.dot_dimension_numbers<[1], [0], [0], [1], [0, 0, 1, 1], [], []>} : vector<16x8xf32>, vector<8x32xf32>, vector<16x32xf32> -> vector<16x32xf32>
    %133 = arith.addf %122, %132 : vector<16x32xf32>
    %134 = vector.extract_strided_slice %121 {offsets = [8, 0], sizes = [8, 8], strides = [1, 1]} : vector<64x8xf32> to vector<8x8xf32>
    %135 = vector.extract_strided_slice %44 {offsets = [0, 0], sizes = [8, 8], strides = [1, 1]} : vector<16x8xf32> to vector<8x8xf32>
    %cst_100 = arith.constant dense<0.000000e+00> : vector<8x8xf32>
    %136 = tpu.matmul %134, %135, %cst_100 {dimension_numbers = #tpu.dot_dimension_numbers<[1], [0], [0], [1], [0, 0, 1, 1], [], []>} : vector<8x8xf32>, vector<8x8xf32>, vector<8x8xf32> -> vector<8x8xf32>
    %137 = vector.extract_strided_slice %121 {offsets = [40, 0], sizes = [8, 8], strides = [1, 1]} : vector<64x8xf32> to vector<8x8xf32>
    %138 = vector.extract_strided_slice %44 {offsets = [8, 0], sizes = [8, 8], strides = [1, 1]} : vector<16x8xf32> to vector<8x8xf32>
    %cst_101 = arith.constant dense<0.000000e+00> : vector<8x8xf32>
    %139 = tpu.matmul %137, %138, %cst_101 {dimension_numbers = #tpu.dot_dimension_numbers<[1], [0], [0], [1], [0, 0, 1, 1], [], []>} : vector<8x8xf32>, vector<8x8xf32>, vector<8x8xf32> -> vector<8x8xf32>
    %140 = tpu.concatenate %136, %139 in 0 : vector<8x8xf32>, vector<8x8xf32> -> vector<16x8xf32>
    %c1_102 = arith.constant 1 : index
    %c0_103 = arith.constant 0 : index
    %c0_104 = arith.constant 0 : index
    %141 = vector.load %arg8[%c1_102, %c0_103, %c0_104] : memref<8x8x32xf32, #tpu.memory_space<vmem>>, vector<1x8x32xf32>
    %142 = vector.shape_cast %141 : vector<1x8x32xf32> to vector<8x32xf32>
    %cst_105 = arith.constant dense<0.000000e+00> : vector<16x32xf32>
    %143 = tpu.matmul %140, %142, %cst_105 {dimension_numbers = #tpu.dot_dimension_numbers<[1], [0], [0], [1], [0, 0, 1, 1], [], []>} : vector<16x8xf32>, vector<8x32xf32>, vector<16x32xf32> -> vector<16x32xf32>
    %144 = arith.addf %133, %143 : vector<16x32xf32>
    %145 = vector.extract_strided_slice %121 {offsets = [16, 0], sizes = [8, 8], strides = [1, 1]} : vector<64x8xf32> to vector<8x8xf32>
    %146 = vector.extract_strided_slice %65 {offsets = [0, 0], sizes = [8, 8], strides = [1, 1]} : vector<16x8xf32> to vector<8x8xf32>
    %cst_106 = arith.constant dense<0.000000e+00> : vector<8x8xf32>
    %147 = tpu.matmul %145, %146, %cst_106 {dimension_numbers = #tpu.dot_dimension_numbers<[1], [0], [0], [1], [0, 0, 1, 1], [], []>} : vector<8x8xf32>, vector<8x8xf32>, vector<8x8xf32> -> vector<8x8xf32>
    %148 = vector.extract_strided_slice %121 {offsets = [48, 0], sizes = [8, 8], strides = [1, 1]} : vector<64x8xf32> to vector<8x8xf32>
    %149 = vector.extract_strided_slice %65 {offsets = [8, 0], sizes = [8, 8], strides = [1, 1]} : vector<16x8xf32> to vector<8x8xf32>
    %cst_107 = arith.constant dense<0.000000e+00> : vector<8x8xf32>
    %150 = tpu.matmul %148, %149, %cst_107 {dimension_numbers = #tpu.dot_dimension_numbers<[1], [0], [0], [1], [0, 0, 1, 1], [], []>} : vector<8x8xf32>, vector<8x8xf32>, vector<8x8xf32> -> vector<8x8xf32>
    %151 = tpu.concatenate %147, %150 in 0 : vector<8x8xf32>, vector<8x8xf32> -> vector<16x8xf32>
    %c2_108 = arith.constant 2 : index
    %c0_109 = arith.constant 0 : index
    %c0_110 = arith.constant 0 : index
    %152 = vector.load %arg8[%c2_108, %c0_109, %c0_110] : memref<8x8x32xf32, #tpu.memory_space<vmem>>, vector<1x8x32xf32>
    %153 = vector.shape_cast %152 : vector<1x8x32xf32> to vector<8x32xf32>
    %cst_111 = arith.constant dense<0.000000e+00> : vector<16x32xf32>
    %154 = tpu.matmul %151, %153, %cst_111 {dimension_numbers = #tpu.dot_dimension_numbers<[1], [0], [0], [1], [0, 0, 1, 1], [], []>} : vector<16x8xf32>, vector<8x32xf32>, vector<16x32xf32> -> vector<16x32xf32>
    %155 = arith.addf %144, %154 : vector<16x32xf32>
    %156 = vector.extract_strided_slice %121 {offsets = [24, 0], sizes = [8, 8], strides = [1, 1]} : vector<64x8xf32> to vector<8x8xf32>
    %157 = vector.extract_strided_slice %86 {offsets = [0, 0], sizes = [8, 8], strides = [1, 1]} : vector<16x8xf32> to vector<8x8xf32>
    %cst_112 = arith.constant dense<0.000000e+00> : vector<8x8xf32>
    %158 = tpu.matmul %156, %157, %cst_112 {dimension_numbers = #tpu.dot_dimension_numbers<[1], [0], [0], [1], [0, 0, 1, 1], [], []>} : vector<8x8xf32>, vector<8x8xf32>, vector<8x8xf32> -> vector<8x8xf32>
    %159 = vector.extract_strided_slice %121 {offsets = [56, 0], sizes = [8, 8], strides = [1, 1]} : vector<64x8xf32> to vector<8x8xf32>
    %160 = vector.extract_strided_slice %86 {offsets = [8, 0], sizes = [8, 8], strides = [1, 1]} : vector<16x8xf32> to vector<8x8xf32>
    %cst_113 = arith.constant dense<0.000000e+00> : vector<8x8xf32>
    %161 = tpu.matmul %159, %160, %cst_113 {dimension_numbers = #tpu.dot_dimension_numbers<[1], [0], [0], [1], [0, 0, 1, 1], [], []>} : vector<8x8xf32>, vector<8x8xf32>, vector<8x8xf32> -> vector<8x8xf32>
    %162 = tpu.concatenate %158, %161 in 0 : vector<8x8xf32>, vector<8x8xf32> -> vector<16x8xf32>
    %c3_114 = arith.constant 3 : index
    %c0_115 = arith.constant 0 : index
    %c0_116 = arith.constant 0 : index
    %163 = vector.load %arg8[%c3_114, %c0_115, %c0_116] : memref<8x8x32xf32, #tpu.memory_space<vmem>>, vector<1x8x32xf32>
    %164 = vector.shape_cast %163 : vector<1x8x32xf32> to vector<8x32xf32>
    %cst_117 = arith.constant dense<0.000000e+00> : vector<16x32xf32>
    %165 = tpu.matmul %162, %164, %cst_117 {dimension_numbers = #tpu.dot_dimension_numbers<[1], [0], [0], [1], [0, 0, 1, 1], [], []>} : vector<16x8xf32>, vector<8x32xf32>, vector<16x32xf32> -> vector<16x32xf32>
    %166 = arith.addf %155, %165 : vector<16x32xf32>
    %c0_118 = arith.constant 0 : index
    %c0_119 = arith.constant 0 : index
    %c0_120 = arith.constant 0 : index
    %167 = vector.load %arg9[%c0_118, %c0_119, %c0_120] : memref<2x1x32xf32, #tpu.memory_space<vmem>>, vector<1x1x32xf32>
    %168 = vector.shape_cast %167 : vector<1x1x32xf32> to vector<1x32xf32>
    %169 = vector.broadcast %168 : vector<1x32xf32> to vector<16x32xf32>
    %170 = arith.addf %166, %169 : vector<16x32xf32>
    %171 = arith.addf %2, %170 : vector<16x32xf32>
    %c0_121 = arith.constant 0 : index
    %c0_122 = arith.constant 0 : index
    %c0_123 = arith.constant 0 : index
    %172 = vector.load %arg10[%c0_121, %c0_122, %c0_123] : memref<2x1x32xf32, #tpu.memory_space<vmem>>, vector<1x1x32xf32>
    %173 = vector.shape_cast %172 : vector<1x1x32xf32> to vector<1x32xf32>
    %c0_124 = arith.constant 0 : index
    %c0_125 = arith.constant 0 : index
    %c0_126 = arith.constant 0 : index
    %174 = vector.load %arg11[%c0_124, %c0_125, %c0_126] : memref<2x1x32xf32, #tpu.memory_space<vmem>>, vector<1x1x32xf32>
    %175 = vector.shape_cast %174 : vector<1x1x32xf32> to vector<1x32xf32>
    %cst_127 = arith.constant dense<0.000000e+00> : vector<16xf32>
    %176 = vector.multi_reduction <add>, %171, %cst_127 [1] : vector<16x32xf32> to vector<16xf32>
    %177 = vector.shape_cast %176 : vector<16xf32> to vector<16x1xf32>
    %cst_128 = arith.constant 3.200000e+01 : f32
    %178 = vector.broadcast %cst_128 : f32 to vector<16x1xf32>
    %179 = arith.divf %177, %178 : vector<16x1xf32>
    %180 = vector.broadcast %179 : vector<16x1xf32> to vector<16x32xf32>
    %181 = arith.subf %171, %180 : vector<16x32xf32>
    %182 = arith.mulf %181, %181 : vector<16x32xf32>
    %cst_129 = arith.constant dense<0.000000e+00> : vector<16xf32>
    %183 = vector.multi_reduction <add>, %182, %cst_129 [1] : vector<16x32xf32> to vector<16xf32>
    %184 = vector.shape_cast %183 : vector<16xf32> to vector<16x1xf32>
    %cst_130 = arith.constant 3.200000e+01 : f32
    %185 = vector.broadcast %cst_130 : f32 to vector<16x1xf32>
    %186 = arith.divf %184, %185 : vector<16x1xf32>
    %187 = vector.broadcast %179 : vector<16x1xf32> to vector<16x32xf32>
    %188 = arith.subf %171, %187 : vector<16x32xf32>
    %cst_131 = arith.constant 9.99999974E-6 : f32
    %189 = vector.broadcast %cst_131 : f32 to vector<16x1xf32>
    %190 = arith.addf %186, %189 : vector<16x1xf32>
    %191 = math.rsqrt %190 : vector<16x1xf32>
    %192 = vector.broadcast %191 : vector<16x1xf32> to vector<16x32xf32>
    %193 = arith.mulf %188, %192 : vector<16x32xf32>
    %194 = vector.broadcast %173 : vector<1x32xf32> to vector<16x32xf32>
    %195 = arith.mulf %193, %194 : vector<16x32xf32>
    %196 = vector.broadcast %175 : vector<1x32xf32> to vector<16x32xf32>
    %197 = arith.addf %195, %196 : vector<16x32xf32>
    %c0_132 = arith.constant 0 : index
    %c0_133 = arith.constant 0 : index
    %c0_134 = arith.constant 0 : index
    %198 = vector.load %arg12[%c0_132, %c0_133, %c0_134] : memref<2x32x64xf32, #tpu.memory_space<vmem>>, vector<1x32x64xf32>
    %199 = vector.shape_cast %198 : vector<1x32x64xf32> to vector<32x64xf32>
    %cst_135 = arith.constant dense<0.000000e+00> : vector<16x64xf32>
    %200 = tpu.matmul %197, %199, %cst_135 {dimension_numbers = #tpu.dot_dimension_numbers<[1], [0], [0], [1], [0, 0, 1, 1], [], []>} : vector<16x32xf32>, vector<32x64xf32>, vector<16x64xf32> -> vector<16x64xf32>
    %c0_136 = arith.constant 0 : index
    %c0_137 = arith.constant 0 : index
    %c0_138 = arith.constant 0 : index
    %201 = vector.load %arg13[%c0_136, %c0_137, %c0_138] : memref<2x1x64xf32, #tpu.memory_space<vmem>>, vector<1x1x64xf32>
    %202 = vector.shape_cast %201 : vector<1x1x64xf32> to vector<1x64xf32>
    %203 = vector.broadcast %202 : vector<1x64xf32> to vector<16x64xf32>
    %204 = arith.addf %200, %203 : vector<16x64xf32>
    %cst_139 = arith.constant 0.000000e+00 : f32
    %205 = vector.broadcast %cst_139 : f32 to vector<16x64xf32>
    %206 = arith.maximumf %204, %205 : vector<16x64xf32>
    %c0_140 = arith.constant 0 : index
    %c0_141 = arith.constant 0 : index
    %c0_142 = arith.constant 0 : index
    %207 = vector.load %arg14[%c0_140, %c0_141, %c0_142] : memref<2x64x32xf32, #tpu.memory_space<vmem>>, vector<1x64x32xf32>
    %208 = vector.shape_cast %207 : vector<1x64x32xf32> to vector<64x32xf32>
    %cst_143 = arith.constant dense<0.000000e+00> : vector<16x32xf32>
    %209 = tpu.matmul %206, %208, %cst_143 {dimension_numbers = #tpu.dot_dimension_numbers<[1], [0], [0], [1], [0, 0, 1, 1], [], []>} : vector<16x64xf32>, vector<64x32xf32>, vector<16x32xf32> -> vector<16x32xf32>
    %c0_144 = arith.constant 0 : index
    %c0_145 = arith.constant 0 : index
    %c0_146 = arith.constant 0 : index
    %210 = vector.load %arg15[%c0_144, %c0_145, %c0_146] : memref<2x1x32xf32, #tpu.memory_space<vmem>>, vector<1x1x32xf32>
    %211 = vector.shape_cast %210 : vector<1x1x32xf32> to vector<1x32xf32>
    %212 = vector.broadcast %211 : vector<1x32xf32> to vector<16x32xf32>
    %213 = arith.addf %209, %212 : vector<16x32xf32>
    %214 = arith.addf %197, %213 : vector<16x32xf32>
    %c0_147 = arith.constant 0 : index
    %c0_148 = arith.constant 0 : index
    %c0_149 = arith.constant 0 : index
    %215 = vector.load %arg16[%c0_147, %c0_148, %c0_149] : memref<2x1x32xf32, #tpu.memory_space<vmem>>, vector<1x1x32xf32>
    %216 = vector.shape_cast %215 : vector<1x1x32xf32> to vector<1x32xf32>
    %c0_150 = arith.constant 0 : index
    %c0_151 = arith.constant 0 : index
    %c0_152 = arith.constant 0 : index
    %217 = vector.load %arg17[%c0_150, %c0_151, %c0_152] : memref<2x1x32xf32, #tpu.memory_space<vmem>>, vector<1x1x32xf32>
    %218 = vector.shape_cast %217 : vector<1x1x32xf32> to vector<1x32xf32>
    %cst_153 = arith.constant dense<0.000000e+00> : vector<16xf32>
    %219 = vector.multi_reduction <add>, %214, %cst_153 [1] : vector<16x32xf32> to vector<16xf32>
    %220 = vector.shape_cast %219 : vector<16xf32> to vector<16x1xf32>
    %cst_154 = arith.constant 3.200000e+01 : f32
    %221 = vector.broadcast %cst_154 : f32 to vector<16x1xf32>
    %222 = arith.divf %220, %221 : vector<16x1xf32>
    %223 = vector.broadcast %222 : vector<16x1xf32> to vector<16x32xf32>
    %224 = arith.subf %214, %223 : vector<16x32xf32>
    %225 = arith.mulf %224, %224 : vector<16x32xf32>
    %cst_155 = arith.constant dense<0.000000e+00> : vector<16xf32>
    %226 = vector.multi_reduction <add>, %225, %cst_155 [1] : vector<16x32xf32> to vector<16xf32>
    %227 = vector.shape_cast %226 : vector<16xf32> to vector<16x1xf32>
    %cst_156 = arith.constant 3.200000e+01 : f32
    %228 = vector.broadcast %cst_156 : f32 to vector<16x1xf32>
    %229 = arith.divf %227, %228 : vector<16x1xf32>
    %230 = vector.broadcast %222 : vector<16x1xf32> to vector<16x32xf32>
    %231 = arith.subf %214, %230 : vector<16x32xf32>
    %cst_157 = arith.constant 9.99999974E-6 : f32
    %232 = vector.broadcast %cst_157 : f32 to vector<16x1xf32>
    %233 = arith.addf %229, %232 : vector<16x1xf32>
    %234 = math.rsqrt %233 : vector<16x1xf32>
    %235 = vector.broadcast %234 : vector<16x1xf32> to vector<16x32xf32>
    %236 = arith.mulf %231, %235 : vector<16x32xf32>
    %237 = vector.broadcast %216 : vector<1x32xf32> to vector<16x32xf32>
    %238 = arith.mulf %236, %237 : vector<16x32xf32>
    %239 = vector.broadcast %218 : vector<1x32xf32> to vector<16x32xf32>
    %240 = arith.addf %238, %239 : vector<16x32xf32>
    %c4 = arith.constant 4 : index
    %c0_158 = arith.constant 0 : index
    %c0_159 = arith.constant 0 : index
    %241 = vector.load %arg2[%c4, %c0_158, %c0_159] : memref<8x32x8xf32, #tpu.memory_space<vmem>>, vector<1x32x8xf32>
    %242 = vector.shape_cast %241 : vector<1x32x8xf32> to vector<32x8xf32>
    %cst_160 = arith.constant dense<0.000000e+00> : vector<16x8xf32>
    %243 = tpu.matmul %240, %242, %cst_160 {dimension_numbers = #tpu.dot_dimension_numbers<[1], [0], [0], [1], [0, 0, 1, 1], [], []>} : vector<16x32xf32>, vector<32x8xf32>, vector<16x8xf32> -> vector<16x8xf32>
    %c4_161 = arith.constant 4 : index
    %c0_162 = arith.constant 0 : index
    %c0_163 = arith.constant 0 : index
    %244 = vector.load %arg3[%c4_161, %c0_162, %c0_163] : memref<8x1x8xf32, #tpu.memory_space<vmem>>, vector<1x1x8xf32>
    %245 = vector.shape_cast %244 : vector<1x1x8xf32> to vector<1x8xf32>
    %246 = vector.broadcast %245 : vector<1x8xf32> to vector<16x8xf32>
    %247 = arith.addf %243, %246 : vector<16x8xf32>
    %c4_164 = arith.constant 4 : index
    %c0_165 = arith.constant 0 : index
    %c0_166 = arith.constant 0 : index
    %248 = vector.load %arg4[%c4_164, %c0_165, %c0_166] : memref<8x32x8xf32, #tpu.memory_space<vmem>>, vector<1x32x8xf32>
    %249 = vector.shape_cast %248 : vector<1x32x8xf32> to vector<32x8xf32>
    %cst_167 = arith.constant dense<0.000000e+00> : vector<16x8xf32>
    %250 = tpu.matmul %240, %249, %cst_167 {dimension_numbers = #tpu.dot_dimension_numbers<[1], [0], [0], [1], [0, 0, 1, 1], [], []>} : vector<16x32xf32>, vector<32x8xf32>, vector<16x8xf32> -> vector<16x8xf32>
    %c4_168 = arith.constant 4 : index
    %c0_169 = arith.constant 0 : index
    %c0_170 = arith.constant 0 : index
    %251 = vector.load %arg5[%c4_168, %c0_169, %c0_170] : memref<8x1x8xf32, #tpu.memory_space<vmem>>, vector<1x1x8xf32>
    %252 = vector.shape_cast %251 : vector<1x1x8xf32> to vector<1x8xf32>
    %253 = vector.broadcast %252 : vector<1x8xf32> to vector<16x8xf32>
    %254 = arith.addf %250, %253 : vector<16x8xf32>
    %c4_171 = arith.constant 4 : index
    %c0_172 = arith.constant 0 : index
    %c0_173 = arith.constant 0 : index
    %255 = vector.load %arg6[%c4_171, %c0_172, %c0_173] : memref<8x32x8xf32, #tpu.memory_space<vmem>>, vector<1x32x8xf32>
    %256 = vector.shape_cast %255 : vector<1x32x8xf32> to vector<32x8xf32>
    %cst_174 = arith.constant dense<0.000000e+00> : vector<16x8xf32>
    %257 = tpu.matmul %240, %256, %cst_174 {dimension_numbers = #tpu.dot_dimension_numbers<[1], [0], [0], [1], [0, 0, 1, 1], [], []>} : vector<16x32xf32>, vector<32x8xf32>, vector<16x8xf32> -> vector<16x8xf32>
    %c4_175 = arith.constant 4 : index
    %c0_176 = arith.constant 0 : index
    %c0_177 = arith.constant 0 : index
    %258 = vector.load %arg7[%c4_175, %c0_176, %c0_177] : memref<8x1x8xf32, #tpu.memory_space<vmem>>, vector<1x1x8xf32>
    %259 = vector.shape_cast %258 : vector<1x1x8xf32> to vector<1x8xf32>
    %260 = vector.broadcast %259 : vector<1x8xf32> to vector<16x8xf32>
    %261 = arith.addf %257, %260 : vector<16x8xf32>
    %c5 = arith.constant 5 : index
    %c0_178 = arith.constant 0 : index
    %c0_179 = arith.constant 0 : index
    %262 = vector.load %arg2[%c5, %c0_178, %c0_179] : memref<8x32x8xf32, #tpu.memory_space<vmem>>, vector<1x32x8xf32>
    %263 = vector.shape_cast %262 : vector<1x32x8xf32> to vector<32x8xf32>
    %cst_180 = arith.constant dense<0.000000e+00> : vector<16x8xf32>
    %264 = tpu.matmul %240, %263, %cst_180 {dimension_numbers = #tpu.dot_dimension_numbers<[1], [0], [0], [1], [0, 0, 1, 1], [], []>} : vector<16x32xf32>, vector<32x8xf32>, vector<16x8xf32> -> vector<16x8xf32>
    %c5_181 = arith.constant 5 : index
    %c0_182 = arith.constant 0 : index
    %c0_183 = arith.constant 0 : index
    %265 = vector.load %arg3[%c5_181, %c0_182, %c0_183] : memref<8x1x8xf32, #tpu.memory_space<vmem>>, vector<1x1x8xf32>
    %266 = vector.shape_cast %265 : vector<1x1x8xf32> to vector<1x8xf32>
    %267 = vector.broadcast %266 : vector<1x8xf32> to vector<16x8xf32>
    %268 = arith.addf %264, %267 : vector<16x8xf32>
    %c5_184 = arith.constant 5 : index
    %c0_185 = arith.constant 0 : index
    %c0_186 = arith.constant 0 : index
    %269 = vector.load %arg4[%c5_184, %c0_185, %c0_186] : memref<8x32x8xf32, #tpu.memory_space<vmem>>, vector<1x32x8xf32>
    %270 = vector.shape_cast %269 : vector<1x32x8xf32> to vector<32x8xf32>
    %cst_187 = arith.constant dense<0.000000e+00> : vector<16x8xf32>
    %271 = tpu.matmul %240, %270, %cst_187 {dimension_numbers = #tpu.dot_dimension_numbers<[1], [0], [0], [1], [0, 0, 1, 1], [], []>} : vector<16x32xf32>, vector<32x8xf32>, vector<16x8xf32> -> vector<16x8xf32>
    %c5_188 = arith.constant 5 : index
    %c0_189 = arith.constant 0 : index
    %c0_190 = arith.constant 0 : index
    %272 = vector.load %arg5[%c5_188, %c0_189, %c0_190] : memref<8x1x8xf32, #tpu.memory_space<vmem>>, vector<1x1x8xf32>
    %273 = vector.shape_cast %272 : vector<1x1x8xf32> to vector<1x8xf32>
    %274 = vector.broadcast %273 : vector<1x8xf32> to vector<16x8xf32>
    %275 = arith.addf %271, %274 : vector<16x8xf32>
    %c5_191 = arith.constant 5 : index
    %c0_192 = arith.constant 0 : index
    %c0_193 = arith.constant 0 : index
    %276 = vector.load %arg6[%c5_191, %c0_192, %c0_193] : memref<8x32x8xf32, #tpu.memory_space<vmem>>, vector<1x32x8xf32>
    %277 = vector.shape_cast %276 : vector<1x32x8xf32> to vector<32x8xf32>
    %cst_194 = arith.constant dense<0.000000e+00> : vector<16x8xf32>
    %278 = tpu.matmul %240, %277, %cst_194 {dimension_numbers = #tpu.dot_dimension_numbers<[1], [0], [0], [1], [0, 0, 1, 1], [], []>} : vector<16x32xf32>, vector<32x8xf32>, vector<16x8xf32> -> vector<16x8xf32>
    %c5_195 = arith.constant 5 : index
    %c0_196 = arith.constant 0 : index
    %c0_197 = arith.constant 0 : index
    %279 = vector.load %arg7[%c5_195, %c0_196, %c0_197] : memref<8x1x8xf32, #tpu.memory_space<vmem>>, vector<1x1x8xf32>
    %280 = vector.shape_cast %279 : vector<1x1x8xf32> to vector<1x8xf32>
    %281 = vector.broadcast %280 : vector<1x8xf32> to vector<16x8xf32>
    %282 = arith.addf %278, %281 : vector<16x8xf32>
    %c6 = arith.constant 6 : index
    %c0_198 = arith.constant 0 : index
    %c0_199 = arith.constant 0 : index
    %283 = vector.load %arg2[%c6, %c0_198, %c0_199] : memref<8x32x8xf32, #tpu.memory_space<vmem>>, vector<1x32x8xf32>
    %284 = vector.shape_cast %283 : vector<1x32x8xf32> to vector<32x8xf32>
    %cst_200 = arith.constant dense<0.000000e+00> : vector<16x8xf32>
    %285 = tpu.matmul %240, %284, %cst_200 {dimension_numbers = #tpu.dot_dimension_numbers<[1], [0], [0], [1], [0, 0, 1, 1], [], []>} : vector<16x32xf32>, vector<32x8xf32>, vector<16x8xf32> -> vector<16x8xf32>
    %c6_201 = arith.constant 6 : index
    %c0_202 = arith.constant 0 : index
    %c0_203 = arith.constant 0 : index
    %286 = vector.load %arg3[%c6_201, %c0_202, %c0_203] : memref<8x1x8xf32, #tpu.memory_space<vmem>>, vector<1x1x8xf32>
    %287 = vector.shape_cast %286 : vector<1x1x8xf32> to vector<1x8xf32>
    %288 = vector.broadcast %287 : vector<1x8xf32> to vector<16x8xf32>
    %289 = arith.addf %285, %288 : vector<16x8xf32>
    %c6_204 = arith.constant 6 : index
    %c0_205 = arith.constant 0 : index
    %c0_206 = arith.constant 0 : index
    %290 = vector.load %arg4[%c6_204, %c0_205, %c0_206] : memref<8x32x8xf32, #tpu.memory_space<vmem>>, vector<1x32x8xf32>
    %291 = vector.shape_cast %290 : vector<1x32x8xf32> to vector<32x8xf32>
    %cst_207 = arith.constant dense<0.000000e+00> : vector<16x8xf32>
    %292 = tpu.matmul %240, %291, %cst_207 {dimension_numbers = #tpu.dot_dimension_numbers<[1], [0], [0], [1], [0, 0, 1, 1], [], []>} : vector<16x32xf32>, vector<32x8xf32>, vector<16x8xf32> -> vector<16x8xf32>
    %c6_208 = arith.constant 6 : index
    %c0_209 = arith.constant 0 : index
    %c0_210 = arith.constant 0 : index
    %293 = vector.load %arg5[%c6_208, %c0_209, %c0_210] : memref<8x1x8xf32, #tpu.memory_space<vmem>>, vector<1x1x8xf32>
    %294 = vector.shape_cast %293 : vector<1x1x8xf32> to vector<1x8xf32>
    %295 = vector.broadcast %294 : vector<1x8xf32> to vector<16x8xf32>
    %296 = arith.addf %292, %295 : vector<16x8xf32>
    %c6_211 = arith.constant 6 : index
    %c0_212 = arith.constant 0 : index
    %c0_213 = arith.constant 0 : index
    %297 = vector.load %arg6[%c6_211, %c0_212, %c0_213] : memref<8x32x8xf32, #tpu.memory_space<vmem>>, vector<1x32x8xf32>
    %298 = vector.shape_cast %297 : vector<1x32x8xf32> to vector<32x8xf32>
    %cst_214 = arith.constant dense<0.000000e+00> : vector<16x8xf32>
    %299 = tpu.matmul %240, %298, %cst_214 {dimension_numbers = #tpu.dot_dimension_numbers<[1], [0], [0], [1], [0, 0, 1, 1], [], []>} : vector<16x32xf32>, vector<32x8xf32>, vector<16x8xf32> -> vector<16x8xf32>
    %c6_215 = arith.constant 6 : index
    %c0_216 = arith.constant 0 : index
    %c0_217 = arith.constant 0 : index
    %300 = vector.load %arg7[%c6_215, %c0_216, %c0_217] : memref<8x1x8xf32, #tpu.memory_space<vmem>>, vector<1x1x8xf32>
    %301 = vector.shape_cast %300 : vector<1x1x8xf32> to vector<1x8xf32>
    %302 = vector.broadcast %301 : vector<1x8xf32> to vector<16x8xf32>
    %303 = arith.addf %299, %302 : vector<16x8xf32>
    %c7 = arith.constant 7 : index
    %c0_218 = arith.constant 0 : index
    %c0_219 = arith.constant 0 : index
    %304 = vector.load %arg2[%c7, %c0_218, %c0_219] : memref<8x32x8xf32, #tpu.memory_space<vmem>>, vector<1x32x8xf32>
    %305 = vector.shape_cast %304 : vector<1x32x8xf32> to vector<32x8xf32>
    %cst_220 = arith.constant dense<0.000000e+00> : vector<16x8xf32>
    %306 = tpu.matmul %240, %305, %cst_220 {dimension_numbers = #tpu.dot_dimension_numbers<[1], [0], [0], [1], [0, 0, 1, 1], [], []>} : vector<16x32xf32>, vector<32x8xf32>, vector<16x8xf32> -> vector<16x8xf32>
    %c7_221 = arith.constant 7 : index
    %c0_222 = arith.constant 0 : index
    %c0_223 = arith.constant 0 : index
    %307 = vector.load %arg3[%c7_221, %c0_222, %c0_223] : memref<8x1x8xf32, #tpu.memory_space<vmem>>, vector<1x1x8xf32>
    %308 = vector.shape_cast %307 : vector<1x1x8xf32> to vector<1x8xf32>
    %309 = vector.broadcast %308 : vector<1x8xf32> to vector<16x8xf32>
    %310 = arith.addf %306, %309 : vector<16x8xf32>
    %c7_224 = arith.constant 7 : index
    %c0_225 = arith.constant 0 : index
    %c0_226 = arith.constant 0 : index
    %311 = vector.load %arg4[%c7_224, %c0_225, %c0_226] : memref<8x32x8xf32, #tpu.memory_space<vmem>>, vector<1x32x8xf32>
    %312 = vector.shape_cast %311 : vector<1x32x8xf32> to vector<32x8xf32>
    %cst_227 = arith.constant dense<0.000000e+00> : vector<16x8xf32>
    %313 = tpu.matmul %240, %312, %cst_227 {dimension_numbers = #tpu.dot_dimension_numbers<[1], [0], [0], [1], [0, 0, 1, 1], [], []>} : vector<16x32xf32>, vector<32x8xf32>, vector<16x8xf32> -> vector<16x8xf32>
    %c7_228 = arith.constant 7 : index
    %c0_229 = arith.constant 0 : index
    %c0_230 = arith.constant 0 : index
    %314 = vector.load %arg5[%c7_228, %c0_229, %c0_230] : memref<8x1x8xf32, #tpu.memory_space<vmem>>, vector<1x1x8xf32>
    %315 = vector.shape_cast %314 : vector<1x1x8xf32> to vector<1x8xf32>
    %316 = vector.broadcast %315 : vector<1x8xf32> to vector<16x8xf32>
    %317 = arith.addf %313, %316 : vector<16x8xf32>
    %c7_231 = arith.constant 7 : index
    %c0_232 = arith.constant 0 : index
    %c0_233 = arith.constant 0 : index
    %318 = vector.load %arg6[%c7_231, %c0_232, %c0_233] : memref<8x32x8xf32, #tpu.memory_space<vmem>>, vector<1x32x8xf32>
    %319 = vector.shape_cast %318 : vector<1x32x8xf32> to vector<32x8xf32>
    %cst_234 = arith.constant dense<0.000000e+00> : vector<16x8xf32>
    %320 = tpu.matmul %240, %319, %cst_234 {dimension_numbers = #tpu.dot_dimension_numbers<[1], [0], [0], [1], [0, 0, 1, 1], [], []>} : vector<16x32xf32>, vector<32x8xf32>, vector<16x8xf32> -> vector<16x8xf32>
    %c7_235 = arith.constant 7 : index
    %c0_236 = arith.constant 0 : index
    %c0_237 = arith.constant 0 : index
    %321 = vector.load %arg7[%c7_235, %c0_236, %c0_237] : memref<8x1x8xf32, #tpu.memory_space<vmem>>, vector<1x1x8xf32>
    %322 = vector.shape_cast %321 : vector<1x1x8xf32> to vector<1x8xf32>
    %323 = vector.broadcast %322 : vector<1x8xf32> to vector<16x8xf32>
    %324 = arith.addf %320, %323 : vector<16x8xf32>
    %325 = vector.extract_strided_slice %247 {offsets = [0, 0], sizes = [8, 8], strides = [1, 1]} : vector<16x8xf32> to vector<8x8xf32>
    %326 = vector.extract_strided_slice %254 {offsets = [0, 0], sizes = [8, 8], strides = [1, 1]} : vector<16x8xf32> to vector<8x8xf32>
    "tpu.trace_start"() <{level = 10 : i32, message = "qd,kd->qk"}> : () -> ()
    %cst_238 = arith.constant dense<0.000000e+00> : vector<8x8xf32>
    %327 = tpu.matmul %325, %326, %cst_238 {dimension_numbers = #tpu.dot_dimension_numbers<[1], [1], [0], [0], [0, 0, 1, 0], [], []>} : vector<8x8xf32>, vector<8x8xf32>, vector<8x8xf32> -> vector<8x8xf32>
    "tpu.trace_stop"() : () -> ()
    %328 = vector.extract_strided_slice %268 {offsets = [0, 0], sizes = [8, 8], strides = [1, 1]} : vector<16x8xf32> to vector<8x8xf32>
    %329 = vector.extract_strided_slice %275 {offsets = [0, 0], sizes = [8, 8], strides = [1, 1]} : vector<16x8xf32> to vector<8x8xf32>
    "tpu.trace_start"() <{level = 10 : i32, message = "qd,kd->qk"}> : () -> ()
    %cst_239 = arith.constant dense<0.000000e+00> : vector<8x8xf32>
    %330 = tpu.matmul %328, %329, %cst_239 {dimension_numbers = #tpu.dot_dimension_numbers<[1], [1], [0], [0], [0, 0, 1, 0], [], []>} : vector<8x8xf32>, vector<8x8xf32>, vector<8x8xf32> -> vector<8x8xf32>
    "tpu.trace_stop"() : () -> ()
    %331 = vector.extract_strided_slice %289 {offsets = [0, 0], sizes = [8, 8], strides = [1, 1]} : vector<16x8xf32> to vector<8x8xf32>
    %332 = vector.extract_strided_slice %296 {offsets = [0, 0], sizes = [8, 8], strides = [1, 1]} : vector<16x8xf32> to vector<8x8xf32>
    "tpu.trace_start"() <{level = 10 : i32, message = "qd,kd->qk"}> : () -> ()
    %cst_240 = arith.constant dense<0.000000e+00> : vector<8x8xf32>
    %333 = tpu.matmul %331, %332, %cst_240 {dimension_numbers = #tpu.dot_dimension_numbers<[1], [1], [0], [0], [0, 0, 1, 0], [], []>} : vector<8x8xf32>, vector<8x8xf32>, vector<8x8xf32> -> vector<8x8xf32>
    "tpu.trace_stop"() : () -> ()
    %334 = vector.extract_strided_slice %310 {offsets = [0, 0], sizes = [8, 8], strides = [1, 1]} : vector<16x8xf32> to vector<8x8xf32>
    %335 = vector.extract_strided_slice %317 {offsets = [0, 0], sizes = [8, 8], strides = [1, 1]} : vector<16x8xf32> to vector<8x8xf32>
    "tpu.trace_start"() <{level = 10 : i32, message = "qd,kd->qk"}> : () -> ()
    %cst_241 = arith.constant dense<0.000000e+00> : vector<8x8xf32>
    %336 = tpu.matmul %334, %335, %cst_241 {dimension_numbers = #tpu.dot_dimension_numbers<[1], [1], [0], [0], [0, 0, 1, 0], [], []>} : vector<8x8xf32>, vector<8x8xf32>, vector<8x8xf32> -> vector<8x8xf32>
    "tpu.trace_stop"() : () -> ()
    %337 = vector.extract_strided_slice %247 {offsets = [8, 0], sizes = [8, 8], strides = [1, 1]} : vector<16x8xf32> to vector<8x8xf32>
    %338 = vector.extract_strided_slice %254 {offsets = [8, 0], sizes = [8, 8], strides = [1, 1]} : vector<16x8xf32> to vector<8x8xf32>
    "tpu.trace_start"() <{level = 10 : i32, message = "qd,kd->qk"}> : () -> ()
    %cst_242 = arith.constant dense<0.000000e+00> : vector<8x8xf32>
    %339 = tpu.matmul %337, %338, %cst_242 {dimension_numbers = #tpu.dot_dimension_numbers<[1], [1], [0], [0], [0, 0, 1, 0], [], []>} : vector<8x8xf32>, vector<8x8xf32>, vector<8x8xf32> -> vector<8x8xf32>
    "tpu.trace_stop"() : () -> ()
    %340 = vector.extract_strided_slice %268 {offsets = [8, 0], sizes = [8, 8], strides = [1, 1]} : vector<16x8xf32> to vector<8x8xf32>
    %341 = vector.extract_strided_slice %275 {offsets = [8, 0], sizes = [8, 8], strides = [1, 1]} : vector<16x8xf32> to vector<8x8xf32>
    "tpu.trace_start"() <{level = 10 : i32, message = "qd,kd->qk"}> : () -> ()
    %cst_243 = arith.constant dense<0.000000e+00> : vector<8x8xf32>
    %342 = tpu.matmul %340, %341, %cst_243 {dimension_numbers = #tpu.dot_dimension_numbers<[1], [1], [0], [0], [0, 0, 1, 0], [], []>} : vector<8x8xf32>, vector<8x8xf32>, vector<8x8xf32> -> vector<8x8xf32>
    "tpu.trace_stop"() : () -> ()
    %343 = vector.extract_strided_slice %289 {offsets = [8, 0], sizes = [8, 8], strides = [1, 1]} : vector<16x8xf32> to vector<8x8xf32>
    %344 = vector.extract_strided_slice %296 {offsets = [8, 0], sizes = [8, 8], strides = [1, 1]} : vector<16x8xf32> to vector<8x8xf32>
    "tpu.trace_start"() <{level = 10 : i32, message = "qd,kd->qk"}> : () -> ()
    %cst_244 = arith.constant dense<0.000000e+00> : vector<8x8xf32>
    %345 = tpu.matmul %343, %344, %cst_244 {dimension_numbers = #tpu.dot_dimension_numbers<[1], [1], [0], [0], [0, 0, 1, 0], [], []>} : vector<8x8xf32>, vector<8x8xf32>, vector<8x8xf32> -> vector<8x8xf32>
    "tpu.trace_stop"() : () -> ()
    %346 = vector.extract_strided_slice %310 {offsets = [8, 0], sizes = [8, 8], strides = [1, 1]} : vector<16x8xf32> to vector<8x8xf32>
    %347 = vector.extract_strided_slice %317 {offsets = [8, 0], sizes = [8, 8], strides = [1, 1]} : vector<16x8xf32> to vector<8x8xf32>
    "tpu.trace_start"() <{level = 10 : i32, message = "qd,kd->qk"}> : () -> ()
    %cst_245 = arith.constant dense<0.000000e+00> : vector<8x8xf32>
    %348 = tpu.matmul %346, %347, %cst_245 {dimension_numbers = #tpu.dot_dimension_numbers<[1], [1], [0], [0], [0, 0, 1, 0], [], []>} : vector<8x8xf32>, vector<8x8xf32>, vector<8x8xf32> -> vector<8x8xf32>
    "tpu.trace_stop"() : () -> ()
    %349 = tpu.concatenate %327, %330, %333, %336, %339, %342, %345, %348 in 0 : vector<8x8xf32>, vector<8x8xf32>, vector<8x8xf32>, vector<8x8xf32>, vector<8x8xf32>, vector<8x8xf32>, vector<8x8xf32>, vector<8x8xf32> -> vector<64x8xf32>
    %cst_246 = arith.constant dense<0xFF800000> : vector<64xf32>
    %350 = vector.multi_reduction <maximumf>, %349, %cst_246 [1] : vector<64x8xf32> to vector<64xf32>
    %351 = vector.shape_cast %350 : vector<64xf32> to vector<64x1xf32>
    %352 = vector.broadcast %351 : vector<64x1xf32> to vector<64x8xf32>
    %353 = arith.subf %349, %352 : vector<64x8xf32>
    %354 = math.exp %353 : vector<64x8xf32>
    %cst_247 = arith.constant dense<0.000000e+00> : vector<64xf32>
    %355 = vector.multi_reduction <add>, %354, %cst_247 [1] : vector<64x8xf32> to vector<64xf32>
    %356 = vector.shape_cast %355 : vector<64xf32> to vector<64x1xf32>
    %357 = tpu.reciprocal %356 {approx = true} : vector<64x1xf32> -> vector<64x1xf32>
    %358 = vector.broadcast %357 : vector<64x1xf32> to vector<64x8xf32>
    %359 = arith.mulf %354, %358 : vector<64x8xf32>
    %cst_248 = arith.constant 0.000000e+00 : f32
    %360 = vector.broadcast %cst_248 : f32 to vector<16x32xf32>
    %361 = vector.extract_strided_slice %359 {offsets = [0, 0], sizes = [8, 8], strides = [1, 1]} : vector<64x8xf32> to vector<8x8xf32>
    %362 = vector.extract_strided_slice %261 {offsets = [0, 0], sizes = [8, 8], strides = [1, 1]} : vector<16x8xf32> to vector<8x8xf32>
    %cst_249 = arith.constant dense<0.000000e+00> : vector<8x8xf32>
    %363 = tpu.matmul %361, %362, %cst_249 {dimension_numbers = #tpu.dot_dimension_numbers<[1], [0], [0], [1], [0, 0, 1, 1], [], []>} : vector<8x8xf32>, vector<8x8xf32>, vector<8x8xf32> -> vector<8x8xf32>
    %364 = vector.extract_strided_slice %359 {offsets = [32, 0], sizes = [8, 8], strides = [1, 1]} : vector<64x8xf32> to vector<8x8xf32>
    %365 = vector.extract_strided_slice %261 {offsets = [8, 0], sizes = [8, 8], strides = [1, 1]} : vector<16x8xf32> to vector<8x8xf32>
    %cst_250 = arith.constant dense<0.000000e+00> : vector<8x8xf32>
    %366 = tpu.matmul %364, %365, %cst_250 {dimension_numbers = #tpu.dot_dimension_numbers<[1], [0], [0], [1], [0, 0, 1, 1], [], []>} : vector<8x8xf32>, vector<8x8xf32>, vector<8x8xf32> -> vector<8x8xf32>
    %367 = tpu.concatenate %363, %366 in 0 : vector<8x8xf32>, vector<8x8xf32> -> vector<16x8xf32>
    %c4_251 = arith.constant 4 : index
    %c0_252 = arith.constant 0 : index
    %c0_253 = arith.constant 0 : index
    %368 = vector.load %arg8[%c4_251, %c0_252, %c0_253] : memref<8x8x32xf32, #tpu.memory_space<vmem>>, vector<1x8x32xf32>
    %369 = vector.shape_cast %368 : vector<1x8x32xf32> to vector<8x32xf32>
    %cst_254 = arith.constant dense<0.000000e+00> : vector<16x32xf32>
    %370 = tpu.matmul %367, %369, %cst_254 {dimension_numbers = #tpu.dot_dimension_numbers<[1], [0], [0], [1], [0, 0, 1, 1], [], []>} : vector<16x8xf32>, vector<8x32xf32>, vector<16x32xf32> -> vector<16x32xf32>
    %371 = arith.addf %360, %370 : vector<16x32xf32>
    %372 = vector.extract_strided_slice %359 {offsets = [8, 0], sizes = [8, 8], strides = [1, 1]} : vector<64x8xf32> to vector<8x8xf32>
    %373 = vector.extract_strided_slice %282 {offsets = [0, 0], sizes = [8, 8], strides = [1, 1]} : vector<16x8xf32> to vector<8x8xf32>
    %cst_255 = arith.constant dense<0.000000e+00> : vector<8x8xf32>
    %374 = tpu.matmul %372, %373, %cst_255 {dimension_numbers = #tpu.dot_dimension_numbers<[1], [0], [0], [1], [0, 0, 1, 1], [], []>} : vector<8x8xf32>, vector<8x8xf32>, vector<8x8xf32> -> vector<8x8xf32>
    %375 = vector.extract_strided_slice %359 {offsets = [40, 0], sizes = [8, 8], strides = [1, 1]} : vector<64x8xf32> to vector<8x8xf32>
    %376 = vector.extract_strided_slice %282 {offsets = [8, 0], sizes = [8, 8], strides = [1, 1]} : vector<16x8xf32> to vector<8x8xf32>
    %cst_256 = arith.constant dense<0.000000e+00> : vector<8x8xf32>
    %377 = tpu.matmul %375, %376, %cst_256 {dimension_numbers = #tpu.dot_dimension_numbers<[1], [0], [0], [1], [0, 0, 1, 1], [], []>} : vector<8x8xf32>, vector<8x8xf32>, vector<8x8xf32> -> vector<8x8xf32>
    %378 = tpu.concatenate %374, %377 in 0 : vector<8x8xf32>, vector<8x8xf32> -> vector<16x8xf32>
    %c5_257 = arith.constant 5 : index
    %c0_258 = arith.constant 0 : index
    %c0_259 = arith.constant 0 : index
    %379 = vector.load %arg8[%c5_257, %c0_258, %c0_259] : memref<8x8x32xf32, #tpu.memory_space<vmem>>, vector<1x8x32xf32>
    %380 = vector.shape_cast %379 : vector<1x8x32xf32> to vector<8x32xf32>
    %cst_260 = arith.constant dense<0.000000e+00> : vector<16x32xf32>
    %381 = tpu.matmul %378, %380, %cst_260 {dimension_numbers = #tpu.dot_dimension_numbers<[1], [0], [0], [1], [0, 0, 1, 1], [], []>} : vector<16x8xf32>, vector<8x32xf32>, vector<16x32xf32> -> vector<16x32xf32>
    %382 = arith.addf %371, %381 : vector<16x32xf32>
    %383 = vector.extract_strided_slice %359 {offsets = [16, 0], sizes = [8, 8], strides = [1, 1]} : vector<64x8xf32> to vector<8x8xf32>
    %384 = vector.extract_strided_slice %303 {offsets = [0, 0], sizes = [8, 8], strides = [1, 1]} : vector<16x8xf32> to vector<8x8xf32>
    %cst_261 = arith.constant dense<0.000000e+00> : vector<8x8xf32>
    %385 = tpu.matmul %383, %384, %cst_261 {dimension_numbers = #tpu.dot_dimension_numbers<[1], [0], [0], [1], [0, 0, 1, 1], [], []>} : vector<8x8xf32>, vector<8x8xf32>, vector<8x8xf32> -> vector<8x8xf32>
    %386 = vector.extract_strided_slice %359 {offsets = [48, 0], sizes = [8, 8], strides = [1, 1]} : vector<64x8xf32> to vector<8x8xf32>
    %387 = vector.extract_strided_slice %303 {offsets = [8, 0], sizes = [8, 8], strides = [1, 1]} : vector<16x8xf32> to vector<8x8xf32>
    %cst_262 = arith.constant dense<0.000000e+00> : vector<8x8xf32>
    %388 = tpu.matmul %386, %387, %cst_262 {dimension_numbers = #tpu.dot_dimension_numbers<[1], [0], [0], [1], [0, 0, 1, 1], [], []>} : vector<8x8xf32>, vector<8x8xf32>, vector<8x8xf32> -> vector<8x8xf32>
    %389 = tpu.concatenate %385, %388 in 0 : vector<8x8xf32>, vector<8x8xf32> -> vector<16x8xf32>
    %c6_263 = arith.constant 6 : index
    %c0_264 = arith.constant 0 : index
    %c0_265 = arith.constant 0 : index
    %390 = vector.load %arg8[%c6_263, %c0_264, %c0_265] : memref<8x8x32xf32, #tpu.memory_space<vmem>>, vector<1x8x32xf32>
    %391 = vector.shape_cast %390 : vector<1x8x32xf32> to vector<8x32xf32>
    %cst_266 = arith.constant dense<0.000000e+00> : vector<16x32xf32>
    %392 = tpu.matmul %389, %391, %cst_266 {dimension_numbers = #tpu.dot_dimension_numbers<[1], [0], [0], [1], [0, 0, 1, 1], [], []>} : vector<16x8xf32>, vector<8x32xf32>, vector<16x32xf32> -> vector<16x32xf32>
    %393 = arith.addf %382, %392 : vector<16x32xf32>
    %394 = vector.extract_strided_slice %359 {offsets = [24, 0], sizes = [8, 8], strides = [1, 1]} : vector<64x8xf32> to vector<8x8xf32>
    %395 = vector.extract_strided_slice %324 {offsets = [0, 0], sizes = [8, 8], strides = [1, 1]} : vector<16x8xf32> to vector<8x8xf32>
    %cst_267 = arith.constant dense<0.000000e+00> : vector<8x8xf32>
    %396 = tpu.matmul %394, %395, %cst_267 {dimension_numbers = #tpu.dot_dimension_numbers<[1], [0], [0], [1], [0, 0, 1, 1], [], []>} : vector<8x8xf32>, vector<8x8xf32>, vector<8x8xf32> -> vector<8x8xf32>
    %397 = vector.extract_strided_slice %359 {offsets = [56, 0], sizes = [8, 8], strides = [1, 1]} : vector<64x8xf32> to vector<8x8xf32>
    %398 = vector.extract_strided_slice %324 {offsets = [8, 0], sizes = [8, 8], strides = [1, 1]} : vector<16x8xf32> to vector<8x8xf32>
    %cst_268 = arith.constant dense<0.000000e+00> : vector<8x8xf32>
    %399 = tpu.matmul %397, %398, %cst_268 {dimension_numbers = #tpu.dot_dimension_numbers<[1], [0], [0], [1], [0, 0, 1, 1], [], []>} : vector<8x8xf32>, vector<8x8xf32>, vector<8x8xf32> -> vector<8x8xf32>
    %400 = tpu.concatenate %396, %399 in 0 : vector<8x8xf32>, vector<8x8xf32> -> vector<16x8xf32>
    %c7_269 = arith.constant 7 : index
    %c0_270 = arith.constant 0 : index
    %c0_271 = arith.constant 0 : index
    %401 = vector.load %arg8[%c7_269, %c0_270, %c0_271] : memref<8x8x32xf32, #tpu.memory_space<vmem>>, vector<1x8x32xf32>
    %402 = vector.shape_cast %401 : vector<1x8x32xf32> to vector<8x32xf32>
    %cst_272 = arith.constant dense<0.000000e+00> : vector<16x32xf32>
    %403 = tpu.matmul %400, %402, %cst_272 {dimension_numbers = #tpu.dot_dimension_numbers<[1], [0], [0], [1], [0, 0, 1, 1], [], []>} : vector<16x8xf32>, vector<8x32xf32>, vector<16x32xf32> -> vector<16x32xf32>
    %404 = arith.addf %393, %403 : vector<16x32xf32>
    %c1_273 = arith.constant 1 : index
    %c0_274 = arith.constant 0 : index
    %c0_275 = arith.constant 0 : index
    %405 = vector.load %arg9[%c1_273, %c0_274, %c0_275] : memref<2x1x32xf32, #tpu.memory_space<vmem>>, vector<1x1x32xf32>
    %406 = vector.shape_cast %405 : vector<1x1x32xf32> to vector<1x32xf32>
    %407 = vector.broadcast %406 : vector<1x32xf32> to vector<16x32xf32>
    %408 = arith.addf %404, %407 : vector<16x32xf32>
    %409 = arith.addf %240, %408 : vector<16x32xf32>
    %c1_276 = arith.constant 1 : index
    %c0_277 = arith.constant 0 : index
    %c0_278 = arith.constant 0 : index
    %410 = vector.load %arg10[%c1_276, %c0_277, %c0_278] : memref<2x1x32xf32, #tpu.memory_space<vmem>>, vector<1x1x32xf32>
    %411 = vector.shape_cast %410 : vector<1x1x32xf32> to vector<1x32xf32>
    %c1_279 = arith.constant 1 : index
    %c0_280 = arith.constant 0 : index
    %c0_281 = arith.constant 0 : index
    %412 = vector.load %arg11[%c1_279, %c0_280, %c0_281] : memref<2x1x32xf32, #tpu.memory_space<vmem>>, vector<1x1x32xf32>
    %413 = vector.shape_cast %412 : vector<1x1x32xf32> to vector<1x32xf32>
    %cst_282 = arith.constant dense<0.000000e+00> : vector<16xf32>
    %414 = vector.multi_reduction <add>, %409, %cst_282 [1] : vector<16x32xf32> to vector<16xf32>
    %415 = vector.shape_cast %414 : vector<16xf32> to vector<16x1xf32>
    %cst_283 = arith.constant 3.200000e+01 : f32
    %416 = vector.broadcast %cst_283 : f32 to vector<16x1xf32>
    %417 = arith.divf %415, %416 : vector<16x1xf32>
    %418 = vector.broadcast %417 : vector<16x1xf32> to vector<16x32xf32>
    %419 = arith.subf %409, %418 : vector<16x32xf32>
    %420 = arith.mulf %419, %419 : vector<16x32xf32>
    %cst_284 = arith.constant dense<0.000000e+00> : vector<16xf32>
    %421 = vector.multi_reduction <add>, %420, %cst_284 [1] : vector<16x32xf32> to vector<16xf32>
    %422 = vector.shape_cast %421 : vector<16xf32> to vector<16x1xf32>
    %cst_285 = arith.constant 3.200000e+01 : f32
    %423 = vector.broadcast %cst_285 : f32 to vector<16x1xf32>
    %424 = arith.divf %422, %423 : vector<16x1xf32>
    %425 = vector.broadcast %417 : vector<16x1xf32> to vector<16x32xf32>
    %426 = arith.subf %409, %425 : vector<16x32xf32>
    %cst_286 = arith.constant 9.99999974E-6 : f32
    %427 = vector.broadcast %cst_286 : f32 to vector<16x1xf32>
    %428 = arith.addf %424, %427 : vector<16x1xf32>
    %429 = math.rsqrt %428 : vector<16x1xf32>
    %430 = vector.broadcast %429 : vector<16x1xf32> to vector<16x32xf32>
    %431 = arith.mulf %426, %430 : vector<16x32xf32>
    %432 = vector.broadcast %411 : vector<1x32xf32> to vector<16x32xf32>
    %433 = arith.mulf %431, %432 : vector<16x32xf32>
    %434 = vector.broadcast %413 : vector<1x32xf32> to vector<16x32xf32>
    %435 = arith.addf %433, %434 : vector<16x32xf32>
    %c1_287 = arith.constant 1 : index
    %c0_288 = arith.constant 0 : index
    %c0_289 = arith.constant 0 : index
    %436 = vector.load %arg12[%c1_287, %c0_288, %c0_289] : memref<2x32x64xf32, #tpu.memory_space<vmem>>, vector<1x32x64xf32>
    %437 = vector.shape_cast %436 : vector<1x32x64xf32> to vector<32x64xf32>
    %cst_290 = arith.constant dense<0.000000e+00> : vector<16x64xf32>
    %438 = tpu.matmul %435, %437, %cst_290 {dimension_numbers = #tpu.dot_dimension_numbers<[1], [0], [0], [1], [0, 0, 1, 1], [], []>} : vector<16x32xf32>, vector<32x64xf32>, vector<16x64xf32> -> vector<16x64xf32>
    %c1_291 = arith.constant 1 : index
    %c0_292 = arith.constant 0 : index
    %c0_293 = arith.constant 0 : index
    %439 = vector.load %arg13[%c1_291, %c0_292, %c0_293] : memref<2x1x64xf32, #tpu.memory_space<vmem>>, vector<1x1x64xf32>
    %440 = vector.shape_cast %439 : vector<1x1x64xf32> to vector<1x64xf32>
    %441 = vector.broadcast %440 : vector<1x64xf32> to vector<16x64xf32>
    %442 = arith.addf %438, %441 : vector<16x64xf32>
    %cst_294 = arith.constant 0.000000e+00 : f32
    %443 = vector.broadcast %cst_294 : f32 to vector<16x64xf32>
    %444 = arith.maximumf %442, %443 : vector<16x64xf32>
    %c1_295 = arith.constant 1 : index
    %c0_296 = arith.constant 0 : index
    %c0_297 = arith.constant 0 : index
    %445 = vector.load %arg14[%c1_295, %c0_296, %c0_297] : memref<2x64x32xf32, #tpu.memory_space<vmem>>, vector<1x64x32xf32>
    %446 = vector.shape_cast %445 : vector<1x64x32xf32> to vector<64x32xf32>
    %cst_298 = arith.constant dense<0.000000e+00> : vector<16x32xf32>
    %447 = tpu.matmul %444, %446, %cst_298 {dimension_numbers = #tpu.dot_dimension_numbers<[1], [0], [0], [1], [0, 0, 1, 1], [], []>} : vector<16x64xf32>, vector<64x32xf32>, vector<16x32xf32> -> vector<16x32xf32>
    %c1_299 = arith.constant 1 : index
    %c0_300 = arith.constant 0 : index
    %c0_301 = arith.constant 0 : index
    %448 = vector.load %arg15[%c1_299, %c0_300, %c0_301] : memref<2x1x32xf32, #tpu.memory_space<vmem>>, vector<1x1x32xf32>
    %449 = vector.shape_cast %448 : vector<1x1x32xf32> to vector<1x32xf32>
    %450 = vector.broadcast %449 : vector<1x32xf32> to vector<16x32xf32>
    %451 = arith.addf %447, %450 : vector<16x32xf32>
    %452 = arith.addf %435, %451 : vector<16x32xf32>
    %c1_302 = arith.constant 1 : index
    %c0_303 = arith.constant 0 : index
    %c0_304 = arith.constant 0 : index
    %453 = vector.load %arg16[%c1_302, %c0_303, %c0_304] : memref<2x1x32xf32, #tpu.memory_space<vmem>>, vector<1x1x32xf32>
    %454 = vector.shape_cast %453 : vector<1x1x32xf32> to vector<1x32xf32>
    %c1_305 = arith.constant 1 : index
    %c0_306 = arith.constant 0 : index
    %c0_307 = arith.constant 0 : index
    %455 = vector.load %arg17[%c1_305, %c0_306, %c0_307] : memref<2x1x32xf32, #tpu.memory_space<vmem>>, vector<1x1x32xf32>
    %456 = vector.shape_cast %455 : vector<1x1x32xf32> to vector<1x32xf32>
    %cst_308 = arith.constant dense<0.000000e+00> : vector<16xf32>
    %457 = vector.multi_reduction <add>, %452, %cst_308 [1] : vector<16x32xf32> to vector<16xf32>
    %458 = vector.shape_cast %457 : vector<16xf32> to vector<16x1xf32>
    %cst_309 = arith.constant 3.200000e+01 : f32
    %459 = vector.broadcast %cst_309 : f32 to vector<16x1xf32>
    %460 = arith.divf %458, %459 : vector<16x1xf32>
    %461 = vector.broadcast %460 : vector<16x1xf32> to vector<16x32xf32>
    %462 = arith.subf %452, %461 : vector<16x32xf32>
    %463 = arith.mulf %462, %462 : vector<16x32xf32>
    %cst_310 = arith.constant dense<0.000000e+00> : vector<16xf32>
    %464 = vector.multi_reduction <add>, %463, %cst_310 [1] : vector<16x32xf32> to vector<16xf32>
    %465 = vector.shape_cast %464 : vector<16xf32> to vector<16x1xf32>
    %cst_311 = arith.constant 3.200000e+01 : f32
    %466 = vector.broadcast %cst_311 : f32 to vector<16x1xf32>
    %467 = arith.divf %465, %466 : vector<16x1xf32>
    %468 = vector.broadcast %460 : vector<16x1xf32> to vector<16x32xf32>
    %469 = arith.subf %452, %468 : vector<16x32xf32>
    %cst_312 = arith.constant 9.99999974E-6 : f32
    %470 = vector.broadcast %cst_312 : f32 to vector<16x1xf32>
    %471 = arith.addf %467, %470 : vector<16x1xf32>
    %472 = math.rsqrt %471 : vector<16x1xf32>
    %473 = vector.broadcast %472 : vector<16x1xf32> to vector<16x32xf32>
    %474 = arith.mulf %469, %473 : vector<16x32xf32>
    %475 = vector.broadcast %454 : vector<1x32xf32> to vector<16x32xf32>
    %476 = arith.mulf %474, %475 : vector<16x32xf32>
    %477 = vector.broadcast %456 : vector<1x32xf32> to vector<16x32xf32>
    %478 = arith.addf %476, %477 : vector<16x32xf32>
    %c0_313 = arith.constant 0 : index
    %c0_314 = arith.constant 0 : index
    %479 = vector.load %arg18[%c0_313, %c0_314] : memref<32x32xf32, #tpu.memory_space<vmem>>, vector<32x32xf32>
    %cst_315 = arith.constant dense<0.000000e+00> : vector<16x32xf32>
    %480 = tpu.matmul %478, %479, %cst_315 {dimension_numbers = #tpu.dot_dimension_numbers<[1], [0], [0], [1], [0, 0, 1, 1], [], []>} : vector<16x32xf32>, vector<32x32xf32>, vector<16x32xf32> -> vector<16x32xf32>
    %c0_316 = arith.constant 0 : index
    %c0_317 = arith.constant 0 : index
    %481 = vector.load %arg19[%c0_316, %c0_317] : memref<1x32xf32, #tpu.memory_space<vmem>>, vector<1x32xf32>
    %482 = vector.broadcast %481 : vector<1x32xf32> to vector<16x32xf32>
    %483 = arith.addf %480, %482 : vector<16x32xf32>
    %cst_318 = arith.constant 0.000000e+00 : f32
    %484 = vector.broadcast %cst_318 : f32 to vector<16x32xf32>
    %485 = arith.cmpf oge, %483, %484 : vector<16x32xf32>
    %cst_319 = arith.constant 1.000000e-01 : f32
    %486 = vector.broadcast %cst_319 : f32 to vector<16x32xf32>
    %487 = arith.mulf %486, %483 : vector<16x32xf32>
    %488 = arith.select %485, %483, %487 : vector<16x32xi1>, vector<16x32xf32>
    %c0_320 = arith.constant 0 : index
    %c0_321 = arith.constant 0 : index
    %489 = vector.load %arg20[%c0_320, %c0_321] : memref<32x6xf32, #tpu.memory_space<vmem>>, vector<32x6xf32>
    %cst_322 = arith.constant dense<0.000000e+00> : vector<16x6xf32>
    %490 = tpu.matmul %488, %489, %cst_322 {dimension_numbers = #tpu.dot_dimension_numbers<[1], [0], [0], [1], [0, 0, 1, 1], [], []>} : vector<16x32xf32>, vector<32x6xf32>, vector<16x6xf32> -> vector<16x6xf32>
    %c0_323 = arith.constant 0 : index
    %c0_324 = arith.constant 0 : index
    %491 = vector.load %arg21[%c0_323, %c0_324] : memref<1x6xf32, #tpu.memory_space<vmem>>, vector<1x6xf32>
    %492 = vector.broadcast %491 : vector<1x6xf32> to vector<16x6xf32>
    %493 = arith.addf %490, %492 : vector<16x6xf32>
    %c0_325 = arith.constant 0 : index
    %c0_326 = arith.constant 0 : index
    %494 = vector.load %arg22[%c0_325, %c0_326] : memref<16x6xf32, #tpu.memory_space<vmem>>, vector<16x6xf32>
    tpu.vector_store %arg22[%c0_325, %c0_326], %493 {strides = array<i32>} : memref<16x6xf32, #tpu.memory_space<vmem>>, vector<16x6xf32>,
    return
  }
}

</mosaic_0001>

<bundles_post_ra>
// kernel: tpu_custom_call.1
= control target key start
LH: loop header
LB: loop body
LE: loop exit
PB: predicated region body
PF: predicated region fallthrough
CT: control target
= control target key end

     0   :  { %vm88_vm0 = vcmask 261120   ;;  %vm7686_vm1 = vmmov 0   ;;  %vm1134_vm2 = vcmask 64512   ;;  %vm2915_vm3 = vcmask 523264   ;;  %s8750_s2 = inlined_call_operand.vmem [shape: f32[8,32,8], index: 2, kind: input, shape index: {}]   ;;  %s8751_s4 = inlined_call_operand.vmem [shape: f32[8,32,8], index: 4, kind: input, shape index: {}]   ;;  %s8752_s0 = inlined_call_operand.vmem [shape: f32[16,32], index: 0, kind: input, shape index: {}]   ;;  %s8753_s1 = inlined_call_operand.vmem [shape: f32[16,32], index: 1, kind: input, shape index: {}]   ;;  %s8754_s6 = inlined_call_operand.vmem [shape: f32[8,32,8], index: 6, kind: input, shape index: {}]   ;;  %s8755_s5 = inlined_call_operand.vmem [shape: f32[8,1,8], index: 5, kind: input, shape index: {}]   ;;  %s8756_s3 = inlined_call_operand.vmem [shape: f32[8,1,8], index: 3, kind: input, shape index: {}]   ;;  %s8757_s7 = inlined_call_operand.vmem [shape: f32[8,1,8], index: 7, kind: input, shape index: {}]   ;;  %s8758_s8 = inlined_call_operand.vmem [shape: f32[8,8,32], index: 8, kind: input, shape index: {}]   ;;  %s8759_s9 = inlined_call_operand.vmem [shape: f32[2,1,32], index: 9, kind: input, shape index: {}]   ;;  %s8760_s12 = inlined_call_operand.vmem [shape: f32[2,32,64], index: 12, kind: input, shape index: {}]   ;;  %s8761_s14 = inlined_call_operand.vmem [shape: f32[2,64,32], index: 14, kind: input, shape index: {}]   ;;  %s8762_s10 = inlined_call_operand.vmem [shape: f32[2,1,32], index: 10, kind: input, shape index: {}]   ;;  %s8763_s11 = inlined_call_operand.vmem [shape: f32[2,1,32], index: 11, kind: input, shape index: {}]   ;;  %s8764_s13 = inlined_call_operand.vmem [shape: f32[2,1,64], index: 13, kind: input, shape index: {}]   ;;  %s8765_s15 = inlined_call_operand.vmem [shape: f32[2,1,32], index: 15, kind: input, shape index: {}]   ;;  %s8766_s16 = inlined_call_operand.vmem [shape: f32[2,1,32], index: 16, kind: input, shape index: {}]   ;;  %s8767_s17 = inlined_call_operand.vmem [shape: f32[2,1,32], index: 17, kind: input, shape index: {}]   ;;  %s8768_s18 = inlined_call_operand.vmem [shape: f32[32,32], index: 18, kind: input, shape index: {}]   ;;  %s8769_s20 = inlined_call_operand.vmem [shape: f32[32,6], index: 20, kind: input, shape index: {}]   ;;  %s8770_s19 = inlined_call_operand.vmem [shape: f32[1,32], index: 19, kind: input, shape index: {}]   ;;  %s8771_s21 = inlined_call_operand.vmem [shape: f32[1,6], index: 21, kind: input, shape index: {}]   ;;  %s8772_s22 = inlined_call_operand.vmem [shape: f32[16,6], index: 22, kind: output, shape index: {}]  }
   0x1   :  { %8780 = sst [smem:[#allocation2_spill]] %s8750_s2  ;;  %vm6211_vm6 = vcmask 48128  }
   0x2   :  { %8781 = sst [smem:[#allocation3_spill]] %s8751_s4  ;;  %s8787_s29 = sld [smem:[#allocation2_spill]] }
   0x3   :  { %8782 = sst [smem:[#allocation4_spill]] %s8752_s0  ;;  %s8788_s4 = sld [smem:[#allocation3_spill]] }
   0x4   :  { %8783 = sst [smem:[#allocation5_spill]] %s8753_s1  ;;  %s8789_s23 = sld [smem:[#allocation4_spill]] }
   0x5   :  { %8784 = sst [smem:[#allocation6_spill]] %s8754_s6 }
   0x6   :  { %8785 = sst [smem:[#allocation7_spill]] %s8755_s5  ;;  %s8791_s30 = sld [smem:[#allocation6_spill]] }
   0x7   :  { %8786 = sst [smem:[#allocation8_spill]] %s8756_s3  ;;  %s8790_s3 = sld [smem:[#allocation5_spill]] }
   0x8   :  { %v77_v0 = vld [vmem:[%s8787_s29] sm:$0xff]  ;;  %v78_v1 = vld [vmem:[%s8787_s29 + $0x8] sm:$0xff]  ;;  %v79_v5 = vld [vmem:[%s8787_s29 + $0x10] sm:$0xff]  ;;  %s8792_s0 = sld [smem:[#allocation7_spill]]  ;;  %s8793_s28 = sld [smem:[#allocation8_spill]] }
   0x9   :  { %v170_v2 = vld [vmem:[%s8788_s4] sm:$0xff]  ;;  %v7335_v3 = vpack.c.bf16 %v78_v1, %v77_v0  ;;  %v171_v4 = vld [vmem:[%s8788_s4 + $0x8] sm:$0xff]  ;;  %v80_v6 = vld [vmem:[%s8787_s29 + $0x18] sm:$0xff] }
   0xa   :  { %v7343_v7 = vpack.c.bf16 %v171_v4, %v170_v2  ;;  %v7339_v8 = vpack.c.bf16 %v80_v6, %v79_v5  ;;  %v172_v9 = vld [vmem:[%s8788_s4 + $0x10] sm:$0xff]  ;;  %v173_v10 = vld [vmem:[%s8788_s4 + $0x18] sm:$0xff]  ;;  %v71_v11 = vld [vmem:[%s8789_s23] sm:$0xff] }
   0xb   :  { %7336 = vmatprep.subr.bf16.mxu0 %v7335_v3  ;;  %v7347_v12 = vpack.c.bf16 %v173_v10, %v172_v9  ;;  %v72_v14 = vld [vmem:[%s8789_s23 + $0x8] sm:$0xff]  ;;  %v6227_v19 = vld [vmem:[%s8787_s29 + $0x20] sm:$0xff]  ;;  %v6229_v26 = vld [vmem:[%s8787_s29 + $0x30] sm:$0xff] }
   0xc   :  { %7344 = vmatprep.subr.bf16.mxu1 %v7343_v7  ;;  %7338 = vmatpush3.bf16.msra.mxu0 %v7335_v3  ;;  %v256_v17 = vld [vmem:[%s8791_s30] sm:$0xff]  ;;  %v257_v18 = vld [vmem:[%s8791_s30 + $0x8] sm:$0xff]  ;;  %v258_v23 = vld [vmem:[%s8791_s30 + $0x10] sm:$0xff] }
   0xd   :  { %v73_v13 = vld [vmem:[%s8790_s3] sm:$0xff]  ;;  %v74_v15 = vld [vmem:[%s8790_s3 + $0x8] sm:$0xff]  ;;  %7346 = vmatpush3.bf16.msra.mxu1 %v7343_v7  ;;  %7340 = vmatprep.subr.bf16.mxu0 %v7339_v8  ;;  %v7351_v20 = vpack.c.bf16 %v257_v18, %v256_v17  ;;  %v259_v24 = vld [vmem:[%s8791_s30 + $0x18] sm:$0xff] }
   0xe   :  { %v7838_v16 = vadd.f32 %v73_v13, %v71_v11  ;;  %v6228_v21 = vld [vmem:[%s8787_s29 + $0x28] sm:$0xff]  ;;  %7348 = vmatprep.subr.bf16.mxu1 %v7347_v12  ;;  %v7862_v25 = vadd.f32 %v74_v15, %v72_v14  ;;  %v6230_v27 = vld [vmem:[%s8787_s29 + $0x38] sm:$0xff]  ;;  %v7355_v28 = vpack.c.bf16 %v259_v24, %v258_v23  ;;  %v6235_v30 = vld [vmem:[%s8788_s4 + $0x20] sm:$0xff] }
   0xf   :  { %v7359_v22 = vpack.c.bf16 %v6228_v21, %v6227_v19  ;;  %v7363_v29 = vpack.c.bf16 %v6230_v27, %v6229_v26  ;;  %v6236_v31 = vld [vmem:[%s8788_s4 + $0x28] sm:$0xff]  ;;  %v6243_v32 = vld [vmem:[%s8791_s30 + $0x20] sm:$0xff]  ;;  %v6237_v36 = vld [vmem:[%s8788_s4 + $0x30] sm:$0xff] }
  0x10   :  { %6797 = vmatprep.mubr.msk.f32.mxu0 %vm88_vm0, %v7838_v16  ;;  %6808 = vmatprep.mubr.msk.f32.mxu1 %vm88_vm0, %v7838_v16  ;;  %v6244_v33 = vld [vmem:[%s8791_s30 + $0x28] sm:$0xff]  ;;  %v7367_v34 = vpack.c.bf16 %v6236_v31, %v6235_v30  ;;  %v6238_v37 = vld [vmem:[%s8788_s4 + $0x38] sm:$0xff]  ;;  %v6245_v38 = vld [vmem:[%s8791_s30 + $0x30] sm:$0xff] }
  0x11   :  { %7342 = vmatpush3.bf16.msra.mxu0 %v7339_v8  ;;  %7350 = vmatpush3.bf16.msra.mxu1 %v7347_v12  ;;  %v7375_v35 = vpack.c.bf16 %v6244_v33, %v6243_v32  ;;  %v6246_v39 = vld [vmem:[%s8791_s30 + $0x38] sm:$0xff]  ;;  %v7371_v40 = vpack.c.bf16 %v6238_v37, %v6237_v36  ;;  %v6251_v42 = vld [vmem:[%s8787_s29 + $0x40] sm:$0xff]  ;;  %v6252_v43 = vld [vmem:[%s8787_s29 + $0x48] sm:$0xff]  ;;  %v7685_v8 = vmov 0.0  }
  0x12   :  { %7352 = vmatprep.subr.bf16.mxu0 %v7351_v20  ;;  %7360 = vmatprep.subr.bf16.mxu1 %v7359_v22  ;;  %v7379_v41 = vpack.c.bf16 %v6246_v39, %v6245_v38  ;;  %v6259_v44 = vld [vmem:[%s8788_s4 + $0x40] sm:$0xff]  ;;  %v6260_v45 = vld [vmem:[%s8788_s4 + $0x48] sm:$0xff]  ;;  %v7383_v46 = vpack.c.bf16 %v6252_v43, %v6251_v42  ;;  %v6253_v48 = vld [vmem:[%s8787_s29 + $0x50] sm:$0xff] }
  0x13   :  { %v7391_v47 = vpack.c.bf16 %v6260_v45, %v6259_v44  ;;  %v6254_v49 = vld [vmem:[%s8787_s29 + $0x58] sm:$0xff]  ;;  %v6261_v50 = vld [vmem:[%s8788_s4 + $0x50] sm:$0xff]  ;;  %v6267_v54 = vld [vmem:[%s8791_s30 + $0x40] sm:$0xff] }
  0x14   :  { %6798 = vmatmul.mubr.msk.f32.vlgmr.msra.gmra.mrb[0].mxu0 %vm88_vm0, %v7862_v25  ;;  %6809 = vmatmul.mubr.msk.f32.vlgmr.msra.gmra.mrb[0].mxu1 %vm88_vm0, %v7862_v25  ;;  %v6262_v51 = vld [vmem:[%s8788_s4 + $0x58] sm:$0xff]  ;;  %v7387_v52 = vpack.c.bf16 %v6254_v49, %v6253_v48  ;;  %v6268_v55 = vld [vmem:[%s8791_s30 + $0x48] sm:$0xff]  ;;  %v6275_v56 = vld [vmem:[%s8787_s29 + $0x60] sm:$0xff] }
  0x15   :  { %7354 = vmatpush3.bf16.msra.mxu0 %v7351_v20  ;;  %7362 = vmatpush3.bf16.msra.mxu1 %v7359_v22  ;;  %v7395_v53 = vpack.c.bf16 %v6262_v51, %v6261_v50  ;;  %v6276_v57 = vld [vmem:[%s8787_s29 + $0x68] sm:$0xff]  ;;  %v7399_v58 = vpack.c.bf16 %v6268_v55, %v6267_v54  ;;  %v6269_v59 = vld [vmem:[%s8791_s30 + $0x50] sm:$0xff]  ;;  %v6270_v60 = vld [vmem:[%s8791_s30 + $0x58] sm:$0xff] }
  0x16   :  { %7356 = vmatprep.subr.bf16.mxu0 %v7355_v28  ;;  %7364 = vmatprep.subr.bf16.mxu1 %v7363_v29  ;;  %v7407_v61 = vpack.c.bf16 %v6276_v57, %v6275_v56  ;;  %v6277_v62 = vld [vmem:[%s8787_s29 + $0x70] sm:$0xff]  ;;  %v6278_v63 = vld [vmem:[%s8787_s29 + $0x78] sm:$0xff]  ;;  %v7403_v0 = vpack.c.bf16 %v6270_v60, %v6269_v59  ;;  %v6283_v1 = vld [vmem:[%s8788_s4 + $0x60] sm:$0xff] }
  0x17   :  { %6819 = vmatprep.mubr.msk.f32.mxu0 %vm88_vm0, %v7838_v16  ;;  %6830 = vmatprep.mubr.msk.f32.mxu1 %vm88_vm0, %v7838_v16  ;;  %v6284_v2 = vld [vmem:[%s8788_s4 + $0x68] sm:$0xff]  ;;  %v7411_v3 = vpack.c.bf16 %v6278_v63, %v6277_v62  ;;  %v6285_v5 = vld [vmem:[%s8788_s4 + $0x70] sm:$0xff]  ;;  %v6286_v6 = vld [vmem:[%s8788_s4 + $0x78] sm:$0xff] }
  0x18   :  { %v7415_v4 = vpack.c.bf16 %v6284_v2, %v6283_v1  ;;  %v7419_v7 = vpack.c.bf16 %v6286_v6, %v6285_v5  ;;  %v6291_v9 = vld [vmem:[%s8791_s30 + $0x60] sm:$0xff]  ;;  %v6292_v10 = vld [vmem:[%s8791_s30 + $0x68] sm:$0xff]  ;;  %v6293_v12 = vld [vmem:[%s8791_s30 + $0x70] sm:$0xff] }
  0x19   :  { %7358 = vmatpush3.bf16.msra.mxu0 %v7355_v28  ;;  %7366 = vmatpush3.bf16.msra.mxu1 %v7363_v29  ;;  %v7423_v11 = vpack.c.bf16 %v6292_v10, %v6291_v9  ;;  %v6294_v13 = vld [vmem:[%s8791_s30 + $0x78] sm:$0xff]  ;;  %v6221_v17 = vld [vmem:[%s8792_s0] ss:$0 sm:$0xff]  ;;  %v6240_v29 = vld [vmem:[%s8792_s0 + $0x1] ss:$0 sm:$0xff] }
  0x1a   :  { %7368 = vmatprep.subr.bf16.mxu0 %v7367_v34  ;;  %7376 = vmatprep.subr.bf16.mxu1 %v7375_v35  ;;  %v7427_v14 = vpack.c.bf16 %v6294_v13, %v6293_v12  ;;  %v6218_v21 = vld [vmem:[%s8793_s28] ss:$0 sm:$0xff]  ;;  %v6232_v31 = vld [vmem:[%s8793_s28 + $0x1] ss:$0 sm:$0xff]  ;;  %v6264_v38 = vld [vmem:[%s8792_s0 + $0x2] ss:$0 sm:$0xff] }
  0x1b   :  { %v6256_v42 = vld [vmem:[%s8793_s28 + $0x2] ss:$0 sm:$0xff]  ;;  %v6288_v55 = vld [vmem:[%s8792_s0 + $0x3] ss:$0 sm:$0xff] }
  0x1c   :  { %6820 = vmatmul.mubr.msk.f32.vlgmr.msra.gmra.mrb[2].mxu0 %vm88_vm0, %v7862_v25  ;;  %6831 = vmatmul.mubr.msk.f32.vlgmr.msra.gmra.mrb[2].mxu1 %vm88_vm0, %v7862_v25  ;;  %v6280_v57 = vld [vmem:[%s8793_s28 + $0x3] ss:$0 sm:$0xff] }
  0x1d   :  { %7370 = vmatpush3.bf16.msra.mxu0 %v7367_v34  ;;  %7378 = vmatpush3.bf16.msra.mxu1 %v7375_v35  ;;  %v8099_v2 = vld [vmem:[%s8757_s7 + $0x3] ss:$0 sm:$0xff] }
  0x1e   :  { %7372 = vmatprep.subr.bf16.mxu0 %v7371_v40  ;;  %7380 = vmatprep.subr.bf16.mxu1 %v7379_v41 }
  0x1f   :  { %6841 = vmatprep.mubr.msk.f32.mxu0 %vm88_vm0, %v7838_v16  ;;  %6852 = vmatprep.mubr.msk.f32.mxu1 %vm88_vm0, %v7838_v16 }
  0x21   :  { %7374 = vmatpush3.bf16.msra.mxu0 %v7371_v40  ;;  %7382 = vmatpush3.bf16.msra.mxu1 %v7379_v41 }
  0x22   :  { %7384 = vmatprep.subr.bf16.mxu0 %v7383_v46  ;;  %7392 = vmatprep.subr.bf16.mxu1 %v7391_v47 }
  0x24   :  { %6842 = vmatmul.mubr.msk.f32.vlgmr.msra.gmra.mrb[4].mxu0 %vm88_vm0, %v7862_v25  ;;  %6853 = vmatmul.mubr.msk.f32.vlgmr.msra.gmra.mrb[4].mxu1 %vm88_vm0, %v7862_v25 }
  0x25   :  { %7386 = vmatpush3.bf16.msra.mxu0 %v7383_v46  ;;  %7394 = vmatpush3.bf16.msra.mxu1 %v7391_v47 }
  0x26   :  { %7388 = vmatprep.subr.bf16.mxu0 %v7387_v52  ;;  %7396 = vmatprep.subr.bf16.mxu1 %v7395_v53 }
  0x27   :  { %6863 = vmatprep.mubr.msk.f32.mxu0 %vm88_vm0, %v7838_v16  ;;  %6874 = vmatprep.mubr.msk.f32.mxu1 %vm88_vm0, %v7838_v16 }
  0x29   :  { %7390 = vmatpush3.bf16.msra.mxu0 %v7387_v52  ;;  %7398 = vmatpush3.bf16.msra.mxu1 %v7395_v53  ;;  %v6224_v52 = vld [vmem:[%s8757_s7] ss:$0 sm:$0xff] }
  0x2a   :  { %7400 = vmatprep.subr.bf16.mxu0 %v7399_v58  ;;  %7408 = vmatprep.subr.bf16.mxu1 %v7407_v61 }
  0x2c   :  { %6864 = vmatmul.mubr.msk.f32.vlgmr.msra.gmra.mrb[6].mxu0 %vm88_vm0, %v7862_v25  ;;  %6875 = vmatmul.mubr.msk.f32.vlgmr.msra.gmra.mrb[6].mxu1 %vm88_vm0, %v7862_v25 }
  0x2d   :  { %7402 = vmatpush3.bf16.msra.mxu0 %v7399_v58  ;;  %6885 = vmatprep.mubr.msk.f32.mxu0 %vm88_vm0, %v7838_v16 }
  0x2e   :  { %7404 = vmatprep.subr.bf16.mxu0 %v7403_v0  ;;  %7410 = vmatpush3.bf16.msra.mxu1 %v7407_v61 }
  0x2f   :  { %6896 = vmatprep.mubr.msk.f32.mxu1 %vm88_vm0, %v7838_v16  ;;  %7412 = vmatprep.subr.bf16.mxu1 %v7411_v3 }
  0x31   :  { %7406 = vmatpush3.bf16.msra.mxu0 %v7403_v0 }
  0x32   :  { %7416 = vmatprep.subr.bf16.mxu0 %v7415_v4  ;;  %7414 = vmatpush3.bf16.msra.mxu1 %v7411_v3 }
  0x33   :  { %7424 = vmatprep.subr.bf16.mxu1 %v7423_v11 }
  0x34   :  { %6886 = vmatmul.mubr.msk.f32.vlgmr.msra.gmra.mrb[8].mxu0 %vm88_vm0, %v7862_v25 }
  0x35   :  { %7418 = vmatpush3.bf16.msra.mxu0 %v7415_v4  ;;  %6907 = vmatprep.mubr.msk.f32.mxu0 %vm88_vm0, %v7838_v16 }
  0x36   :  { %7420 = vmatprep.subr.bf16.mxu0 %v7419_v7  ;;  %6897 = vmatmul.mubr.msk.f32.vlgmr.msra.gmra.mrb[8].mxu1 %vm88_vm0, %v7862_v25 }
  0x37   :  { %6918 = vmatprep.mubr.msk.f32.mxu1 %vm88_vm0, %v7838_v16  ;;  %7426 = vmatpush3.bf16.msra.mxu1 %v7423_v11 }
  0x38   :  { %7428 = vmatprep.subr.bf16.mxu1 %v7427_v14 }
  0x39   :  { %7422 = vmatpush3.bf16.msra.mxu0 %v7419_v7 }
  0x3a   :  { %6921 = vmatprep.subr.mxu0 %v7685_v8 }
  0x3b   :  { %7430 = vmatpush3.bf16.msra.mxu1 %v7427_v14 }
  0x3c   :  { %6908 = vmatmul.mubr.msk.f32.vlgmr.msra.gmra.mrb[10].mxu0 %vm88_vm0, %v7862_v25  ;;  %6926 = vmatprep.subr.mxu1 %v7685_v8 }
  0x3d   :  { %6923 = vmatprep.mubr.msk.f32.mxu0 %vm7686_vm1, %v7685_v8 }
  0x3e   :  { %6919 = vmatmul.mubr.msk.f32.vlgmr.msra.gmra.mrb[10].mxu1 %vm88_vm0, %v7862_v25 }
  0x3f   :  { %6928 = vmatprep.mubr.msk.f32.mxu1 %vm7686_vm1, %v7685_v8 }
  0xe7   :  { %v6799_v15 = vpop.f32.mrb[0].mxu0  ;;  %v6810_v18 = vpop.f32.mrb[0].mxu1 }
  0xe8   :  { %v161_v19 = vpop.f32.mrb[1].mxu0  ;;  %v247_v20 = vpop.f32.mrb[1].mxu1  ;;  %v253_v45 = vadd.f32 %v6810_v18, %v6221_v17  ;;  %v167_v49 = vadd.f32 %v6799_v15, %v6218_v21 }
  0xe9   :  { %v248_v22 = vadd.f32 %v6221_v17, %v247_v20  ;;  %v162_v23 = vadd.f32 %v6218_v21, %v161_v19 }
  0xeb   :  { %6922 = vmatpush3.xpose.msk.msra.mxu0 %vm1134_vm2, %v248_v22 }
  0xec   :  { %6931 = vmatprep.subr.mxu0 %v7685_v8 }
  0xee   :  { %6924 = vmatmul.mubr.msk.f32.vlgmr.msra.gmra.mrb[12].mxu0 %vm1134_vm2, %v162_v23 }
  0xef   :  { %v8025_v24 = vpop.f32.mrb[2].mxu0  ;;  %v6832_v27 = vpop.f32.mrb[2].mxu1  ;;  %6933 = vmatprep.mubr.msk.f32.mxu0 %vm7686_vm1, %v7685_v8 }
  0xf0   :  { %v333_v26 = vpop.f32.mrb[3].mxu0  ;;  %v421_v28 = vpop.f32.mrb[3].mxu1  ;;  %v427_v62 = vadd.f32 %v6832_v27, %v6232_v31  ;;  %v339_v1 = vadd.f32 %v8025_v24, %v6224_v52 }
  0xf1   :  { %v422_v36 = vadd.f32 %v6232_v31, %v421_v28  ;;  %v334_v54 = vadd.f32 %v6224_v52, %v333_v26 }
  0xf7   :  { %v6843_v30 = vpop.f32.mrb[4].mxu0  ;;  %v8035_v33 = vpop.f32.mrb[4].mxu1 }
  0xf8   :  { %v509_v32 = vpop.f32.mrb[5].mxu0  ;;  %v8037_v35 = vpop.f32.mrb[5].mxu1  ;;  %v515_v61 = vadd.f32 %v6843_v30, %v6240_v29 }
  0xf9   :  { %v510_v34 = vadd.f32 %v6240_v29, %v509_v32 }
  0xfb   :  { %6927 = vmatpush3.xpose.msk.msra.mxu1 %vm1134_vm2, %v510_v34 }
  0xfc   :  { %6936 = vmatprep.subr.mxu1 %v7685_v8 }
  0xfe   :  { %6929 = vmatmul.mubr.msk.f32.vlgmr.msra.gmra.mrb[12].mxu1 %vm1134_vm2, %v422_v36 }
  0xff   :  { %v6865_v37 = vpop.f32.mrb[6].mxu0  ;;  %6938 = vmatprep.mubr.msk.f32.mxu1 %vm7686_vm1, %v7685_v8  ;;  %v6876_v39 = vpop.f32.mrb[6].mxu1 }
 0x100   :  { %v685_v40 = vpop.f32.mrb[7].mxu0  ;;  %v773_v41 = vpop.f32.mrb[7].mxu1  ;;  %v779_v47 = vadd.f32 %v6876_v39, %v6264_v38  ;;  %v691_v53 = vadd.f32 %v6865_v37, %v6256_v42 }
 0x101   :  { %v774_v43 = vadd.f32 %v6264_v38, %v773_v41  ;;  %v686_v44 = vadd.f32 %v6256_v42, %v685_v40 }
 0x103   :  { %6932 = vmatpush3.xpose.msk.msra.mxu0 %vm1134_vm2, %v774_v43 }
 0x104   :  { %6941 = vmatprep.subr.mxu0 %v7685_v8 }
 0x106   :  { %6934 = vmatmul.mubr.msk.f32.vlgmr.msra.gmra.mrb[14].mxu0 %vm1134_vm2, %v686_v44 }
 0x107   :  { %v8053_v46 = vpop.f32.mrb[8].mxu0  ;;  %6942 = vmatpush3.xpose.msk.msra.mxu0 %vm1134_vm2, %v253_v45  ;;  %6943 = vmatprep.mubr.msk.f32.mxu0 %vm7686_vm1, %v7685_v8 }
 0x108   :  { %v8056_v48 = vpop.f32.mrb[9].mxu0  ;;  %6951 = vmatprep.subr.mxu0 %v7685_v8 }
 0x109   :  { %v6898_v50 = vpop.f32.mrb[8].mxu1 }
 0x10a   :  { %v949_v51 = vpop.f32.mrb[9].mxu1  ;;  %6944 = vmatmul.mubr.msk.f32.vlgmr.msra.gmra.mrb[16].mxu0 %vm1134_vm2, %v167_v49  ;;  %v955_v0 = vadd.f32 %v6898_v50, %v6280_v57 }
 0x10b   :  { %6952 = vmatpush3.xpose.msk.msra.mxu0 %vm1134_vm2, %v779_v47  ;;  %6953 = vmatprep.mubr.msk.f32.mxu0 %vm7686_vm1, %v7685_v8  ;;  %v950_v60 = vadd.f32 %v6280_v57, %v949_v51 }
 0x10c   :  { %6961 = vmatprep.subr.mxu0 %v7685_v8 }
 0x10e   :  { %6954 = vmatmul.mubr.msk.f32.vlgmr.msra.gmra.mrb[18].mxu0 %vm1134_vm2, %v691_v53 }
 0x10f   :  { %v6909_v56 = vpop.f32.mrb[10].mxu0  ;;  %6962 = vmatpush3.msra.mxu0 %v334_v54  ;;  %6963 = vmatprep.mubr.msk.f32.mxu0 %vm7686_vm1, %v7685_v8 }
 0x110   :  { %v1037_v58 = vpop.f32.mrb[11].mxu0  ;;  %6971 = vmatprep.subr.mxu0 %v7685_v8  ;;  %v1043_v63 = vadd.f32 %v6909_v56, %v6288_v55 }
 0x111   :  { %v1038_v59 = vadd.f32 %v6288_v55, %v1037_v58  ;;  %v6920_v3 = vpop.f32.mrb[10].mxu1 }
 0x112   :  { %v8102_v4 = vadd.f32 %v6920_v3, %v8099_v2  ;;  %v8104_v5 = vpop.f32.mrb[11].mxu1 }
 0x113   :  { %6937 = vmatpush3.xpose.msk.msra.mxu1 %vm1134_vm2, %v1038_v59 }
 0x114   :  { %6946 = vmatprep.subr.mxu1 %v7685_v8 }
 0x116   :  { %6939 = vmatmul.mubr.msk.f32.vlgmr.msra.gmra.mrb[14].mxu1 %vm1134_vm2, %v950_v60 }
 0x117   :  { %6947 = vmatpush3.xpose.msk.msra.mxu1 %vm1134_vm2, %v515_v61  ;;  %6948 = vmatprep.mubr.msk.f32.mxu1 %vm7686_vm1, %v7685_v8 }
 0x118   :  { %6956 = vmatprep.subr.mxu1 %v7685_v8 }
 0x11a   :  { %6949 = vmatmul.mubr.msk.f32.vlgmr.msra.gmra.mrb[16].mxu1 %vm1134_vm2, %v427_v62 }
 0x11b   :  { %6957 = vmatpush3.xpose.msk.msra.mxu1 %vm1134_vm2, %v1043_v63  ;;  %6958 = vmatprep.mubr.msk.f32.mxu1 %vm7686_vm1, %v7685_v8 }
 0x11c   :  { %6966 = vmatprep.subr.mxu1 %v7685_v8 }
 0x11e   :  { %6959 = vmatmul.mubr.msk.f32.vlgmr.msra.gmra.mrb[18].mxu1 %vm1134_vm2, %v955_v0 }
 0x11f   :  { %6967 = vmatpush3.msra.mxu1 %v339_v1  ;;  %6968 = vmatprep.mubr.msk.f32.mxu1 %vm7686_vm1, %v7685_v8 }
 0x120   :  { %6976 = vmatprep.subr.mxu1 %v7685_v8 }
 0x1c1   :  { %v1207_v6 = vpop.f32.mrb[12].mxu0 }
 0x1c2   :  { %v6925_v7 = vpop.f32.mrb[13].mxu0  ;;  %v1743_v9 = vsel %vm1134_vm2, %v1207_v6, -inf }
 0x1c3   :  { %1744 = vmax.xlane.f32.xlu0 %v1743_v9  ;;  %v6248_v7 = vld [vmem:[%s8757_s7 + $0x1] ss:$0 sm:$0xff] }
 0x1d1   :  { %v1283_v10 = vpop.f32.mrb[12].mxu1 }
 0x1d2   :  { %v6930_v11 = vpop.f32.mrb[13].mxu1  ;;  %v1746_v12 = vsel %vm1134_vm2, %v1283_v10, -inf }
 0x1d3   :  { %1747 = vmax.xlane.f32.xlu1 %v1746_v12  ;;  %v598_v11 = vadd.f32 %v6248_v7, %v8037_v35 }
 0x1d9   :  { %v1359_v13 = vpop.f32.mrb[14].mxu0 }
 0x1da   :  { %v6935_v14 = vpop.f32.mrb[15].mxu0  ;;  %v1749_v21 = vsel %vm1134_vm2, %v1359_v13, -inf }
 0x1dd   :  { %v1511_v15 = vpop.f32.mrb[16].mxu0 }
 0x1de   :  { %v6945_v17 = vpop.f32.mrb[17].mxu0  ;;  %v1755_v18 = vsel %vm1134_vm2, %v1511_v15, -inf }
 0x1df   :  { %1756 = vmax.xlane.f32.xlu0 %v1755_v18 }
 0x1e1   :  { %v1663_v19 = vpop.f32.mrb[18].mxu0 }
 0x1e2   :  { %v6955_v20 = vpop.f32.mrb[19].mxu0  ;;  %v1761_v30 = vsel %vm1134_vm2, %v1663_v19, -inf }
 0x1e3   :  { %1750 = vmax.xlane.f32.xlu0 %v1749_v21 }
 0x1e9   :  { %v8110_v22 = vpop.f32.mrb[14].mxu1 }
 0x1ea   :  { %v6940_v23 = vpop.f32.mrb[15].mxu1  ;;  %v1752_v61 = vsel %vm1134_vm2, %v8110_v22, -inf }
 0x1eb   :  { %v603_v23 = vadd.f32 %v8035_v33, %v6248_v7 }
 0x1ed   :  { %v1587_v24 = vpop.f32.mrb[16].mxu1 }
 0x1ee   :  { %v6950_v26 = vpop.f32.mrb[17].mxu1  ;;  %v1758_v27 = vsel %vm1134_vm2, %v1587_v24, -inf }
 0x1ef   :  { %1759 = vmax.xlane.f32.xlu1 %v1758_v27 }
 0x1f1   :  { %v8113_v28 = vpop.f32.mrb[18].mxu1 }
 0x1f2   :  { %v6960_v29 = vpop.f32.mrb[19].mxu1  ;;  %v1764_v3 = vsel %vm1134_vm2, %v8113_v28, -inf }
 0x1f3   :  { %1762 = vmax.xlane.f32.xlu1 %v1761_v30  ;;  %v6272_v30 = vld [vmem:[%s8757_s7 + $0x2] ss:$0 sm:$0xff] }
 0x250   :  { %v1745_v31 = vpop.xlane.xlu0 %1744 }
 0x251   :  { %v1767_v32 = vsub.f32 %v1207_v6, %v1745_v31 }
 0x253   :  { %v1775_v34 = vmul.f32 1.442695, %v1767_v32 }
 0x255   :  { %7605 = vpow2.f32 %v1775_v34 }
 0x25f   :  { %v7606_v36 = vpop.eup %7605 }
 0x260   :  { %v1748_v37 = vpop.xlane.xlu1 %1747  ;;  %v1791_v39 = vsel %vm1134_vm2, %v7606_v36, 0.0 }
 0x261   :  { %v1768_v38 = vsub.f32 %v1283_v10, %v1748_v37  ;;  %1792 = vadd.xlane.f32.xlu0 %v1791_v39  ;;  %v862_v37 = vadd.f32 %v6272_v30, %v8056_v48  ;;  %v867_v39 = vadd.f32 %v8053_v46, %v6272_v30 }
 0x263   :  { %v1777_v40 = vmul.f32 1.442695, %v1768_v38 }
 0x265   :  { %7607 = vpow2.f32 %v1777_v40  ;;  %v1126_v40 = vadd.f32 %v8099_v2, %v8104_v5  ;;  %v1977_v2 = vld [vmem:[%s8758_s8] sm:$0xff] }
 0x26c   :  { %v1757_v41 = vpop.xlane.xlu0 %1756 }
 0x26d   :  { %v1771_v42 = vsub.f32 %v1511_v15, %v1757_v41 }
 0x26f   :  { %v7608_v43 = vpop.eup %7607  ;;  %v1783_v44 = vmul.f32 1.442695, %v1771_v42  ;;  %v6319_v42 = vld [vmem:[%s8758_s8 + $0x8] sm:$0xff] }
 0x270   :  { %v1794_v45 = vsel %vm1134_vm2, %v7608_v43, 0.0  ;;  %v1751_v47 = vpop.xlane.xlu0 %1750 }
 0x271   :  { %1795 = vadd.xlane.f32.xlu0 %v1794_v45  ;;  %7609 = vpow2.f32 %v1783_v44  ;;  %v1769_v49 = vsub.f32 %v1359_v13, %v1751_v47 }
 0x273   :  { %v1779_v50 = vmul.f32 1.442695, %v1769_v49 }
 0x275   :  { %7611 = vpow2.f32 %v1779_v50 }
 0x27b   :  { %v7610_v51 = vpop.eup %7609 }
 0x27c   :  { %v1760_v52 = vpop.xlane.xlu1 %1759  ;;  %v1803_v54 = vsel %vm1134_vm2, %v7610_v51, 0.0 }
 0x27d   :  { %v1772_v53 = vsub.f32 %v1587_v24, %v1760_v52  ;;  %1804 = vadd.xlane.f32.xlu1 %v1803_v54  ;;  %v6326_v54 = vld [vmem:[%s8758_s8 + $0x10] sm:$0xff] }
 0x27f   :  { %v1785_v55 = vmul.f32 1.442695, %v1772_v53  ;;  %v8119_v56 = vpop.eup %7611 }
 0x280   :  { %v1763_v57 = vpop.xlane.xlu1 %1762  ;;  %v1797_v59 = vsel %vm1134_vm2, %v8119_v56, 0.0 }
 0x281   :  { %7613 = vpow2.f32 %v1785_v55  ;;  %v1773_v58 = vsub.f32 %v1663_v19, %v1763_v57  ;;  %1798 = vadd.xlane.f32.xlu0 %v1797_v59 }
 0x283   :  { %v1787_v60 = vmul.f32 1.442695, %v1773_v58 }
 0x285   :  { %7615 = vpow2.f32 %v1787_v60  ;;  %1753 = vmax.xlane.f32.xlu0 %v1752_v61 }
 0x28b   :  { %v7614_v62 = vpop.eup %7613 }
 0x28c   :  { %v1806_v63 = vsel %vm1134_vm2, %v7614_v62, 0.0 }
 0x28d   :  { %1807 = vadd.xlane.f32.xlu1 %v1806_v63  ;;  %v6331_v63 = vld [vmem:[%s8758_s8 + $0x18] sm:$0xff] }
 0x28f   :  { %v7616_v0 = vpop.eup %7615 }
 0x290   :  { %v1809_v1 = vsel %vm1134_vm2, %v7616_v0, 0.0 }
 0x291   :  { %1810 = vadd.xlane.f32.xlu1 %v1809_v1 }
 0x295   :  { %1765 = vmax.xlane.f32.xlu1 %v1764_v3 }
 0x2ee   :  { %v1793_v6 = vpop.xlane.xlu0 %1792 }
 0x2ef   :  { %7617 = vrcp.f32 %v1793_v6 }
 0x2f9   :  { %v7618_v9 = vpop.eup %7617 }
 0x2fa   :  { %v1823_v10 = vmul.f32 %v7618_v9, %v7606_v36 }
 0x2fc   :  { %6964 = vmatmul.mubr.msk.f32.vlgmr.msra.gmra.mrb[20].mxu0 %vm1134_vm2, %v1823_v10 }
 0x2fd   :  { %6972 = vmatpush3.msra.mxu0 %v598_v11  ;;  %6973 = vmatprep.mubr.msk.f32.mxu0 %vm7686_vm1, %v7685_v8 }
 0x2fe   :  { %v1796_v12 = vpop.xlane.xlu0 %1795  ;;  %6981 = vmatprep.subr.mxu0 %v6319_v42 }
 0x2ff   :  { %7619 = vrcp.f32 %v1796_v12 }
 0x309   :  { %v7620_v13 = vpop.eup %7619 }
 0x30a   :  { %v1824_v14 = vmul.f32 %v7620_v13, %v7608_v43  ;;  %v1805_v15 = vpop.xlane.xlu1 %1804 }
 0x30b   :  { %7621 = vrcp.f32 %v1805_v15 }
 0x30c   :  { %6974 = vmatmul.mubr.msk.f32.vlgmr.msra.gmra.mrb[22].mxu0 %vm1134_vm2, %v1824_v14 }
 0x30d   :  { %6982 = vmatpush3.msra.mxu0 %v6319_v42 }
 0x30e   :  { %v1799_v17 = vpop.xlane.xlu0 %1798  ;;  %6986 = vmatprep.subr.mxu0 %v1977_v2 }
 0x312   :  { %v1754_v18 = vpop.xlane.xlu0 %1753 }
 0x313   :  { %v1770_v19 = vsub.f32 %v8110_v22, %v1754_v18 }
 0x315   :  { %v7622_v20 = vpop.eup %7621  ;;  %v1781_v35 = vmul.f32 1.442695, %v1770_v19 }
 0x316   :  { %v1827_v21 = vmul.f32 %v7622_v20, %v7610_v51 }
 0x317   :  { %7623 = vpow2.f32 %v1781_v35 }
 0x318   :  { %6969 = vmatmul.mubr.msk.f32.vlgmr.msra.gmra.mrb[20].mxu1 %vm1134_vm2, %v1827_v21 }
 0x319   :  { %6977 = vmatpush3.msra.mxu1 %v603_v23  ;;  %6978 = vmatprep.mubr.msk.f32.mxu1 %vm7686_vm1, %v7685_v8 }
 0x31a   :  { %v1808_v24 = vpop.xlane.xlu1 %1807  ;;  %6991 = vmatprep.subr.mxu1 %v7685_v8 }
 0x31b   :  { %7625 = vrcp.f32 %v1808_v24 }
 0x31c   :  { %7627 = vrcp.f32 %v1799_v17 }
 0x31e   :  { %v1811_v26 = vpop.xlane.xlu1 %1810 }
 0x31f   :  { %7629 = vrcp.f32 %v1811_v26 }
 0x321   :  { %v7624_v22 = vpop.eup %7623 }
 0x322   :  { %v1766_v27 = vpop.xlane.xlu1 %1765  ;;  %v1800_v33 = vsel %vm1134_vm2, %v7624_v22, 0.0 }
 0x323   :  { %v1774_v29 = vsub.f32 %v8113_v28, %v1766_v27  ;;  %1801 = vadd.xlane.f32.xlu0 %v1800_v33  ;;  %v2809_v33 = vld [vmem:[%s8760_s12 + $0x18] sm:$0xff] }
 0x325   :  { %v7626_v31 = vpop.eup %7625  ;;  %v1789_v32 = vmul.f32 1.442695, %v1774_v29  ;;  %v2808_v29 = vld [vmem:[%s8760_s12 + $0x10] sm:$0xff] }
 0x326   :  { %v1828_v34 = vmul.f32 %v7626_v31, %v7614_v62  ;;  %v7628_v36 = vpop.eup %7627  ;;  %v7435_v30 = vpack.c.bf16 %v2809_v33, %v2808_v29  ;;  %v2900_v31 = vld [vmem:[%s8761_s14] sm:$0xff]  ;;  %v6347_v29 = vld [vmem:[%s8787_s29 + $0x90] sm:$0xff]  ;;  %v6348_v33 = vld [vmem:[%s8787_s29 + $0x98] sm:$0xff] }
 0x327   :  { %7631 = vpow2.f32 %v1789_v32  ;;  %v1825_v28 = vmul.f32 %v7628_v36, %v8119_v56  ;;  %v2901_v32 = vld [vmem:[%s8761_s14 + $0x8] sm:$0xff] }
 0x328   :  { %6979 = vmatmul.mubr.msk.f32.vlgmr.msra.gmra.mrb[22].mxu1 %vm1134_vm2, %v1828_v34  ;;  %v2902_v34 = vld [vmem:[%s8761_s14 + $0x10] sm:$0xff]  ;;  %v7439_v36 = vpack.c.bf16 %v2901_v32, %v2900_v31  ;;  %v7459_v31 = vpack.c.bf16 %v6348_v33, %v6347_v29  ;;  %v6364_v32 = vld [vmem:[%s8791_s30 + $0x98] sm:$0xff] }
 0x329   :  { %6992 = vmatpush3.msra.mxu1 %v862_v37  ;;  %6993 = vmatprep.mubr.msk.f32.mxu1 %vm7686_vm1, %v7685_v8  ;;  %v7630_v38 = vpop.eup %7629  ;;  %v2903_v37 = vld [vmem:[%s8761_s14 + $0x18] sm:$0xff]  ;;  %v6403_v33 = vld [vmem:[%s8788_s4 + $0xd0] sm:$0xff] }
 0x32a   :  { %6996 = vmatprep.subr.mxu1 %v7685_v8  ;;  %v1829_v48 = vmul.f32 %v7630_v38, %v7616_v0  ;;  %v2904_v38 = vld [vmem:[%s8761_s14 + $0x20] sm:$0xff] }
 0x32c   :  { %6994 = vmatmul.mubr.msk.f32.vlgmr.msra.gmra.mrb[24].mxu1 %vm1134_vm2, %v1825_v28  ;;  %v7443_v28 = vpack.c.bf16 %v2903_v37, %v2902_v34  ;;  %v6354_v37 = vld [vmem:[%s8788_s4 + $0x88] sm:$0xff] }
 0x32d   :  { %6997 = vmatpush3.msra.mxu1 %v867_v39  ;;  %6998 = vmatprep.mubr.msk.f32.mxu1 %vm7686_vm1, %v7685_v8  ;;  %v2905_v39 = vld [vmem:[%s8761_s14 + $0x28] sm:$0xff] }
 0x32e   :  { %7006 = vmatprep.subr.mxu1 %v7685_v8 }
 0x330   :  { %6999 = vmatmul.mubr.msk.f32.vlgmr.msra.gmra.mrb[26].mxu1 %vm1134_vm2, %v1829_v48  ;;  %v7447_v48 = vpack.c.bf16 %v2905_v39, %v2904_v38  ;;  %v6378_v39 = vld [vmem:[%s8788_s4 + $0xa8] sm:$0xff] }
 0x331   :  { %v7632_v41 = vpop.eup %7631  ;;  %7007 = vmatpush3.msra.mxu1 %v1126_v40  ;;  %7008 = vmatprep.mubr.msk.f32.mxu1 %vm7686_vm1, %v7685_v8 }
 0x332   :  { %v1812_v46 = vsel %vm1134_vm2, %v7632_v41, 0.0 }
 0x333   :  { %1813 = vadd.xlane.f32.xlu1 %v1812_v46 }
 0x3b0   :  { %v1802_v5 = vpop.xlane.xlu0 %1801 }
 0x3b1   :  { %7633 = vrcp.f32 %v1802_v5 }
 0x3bb   :  { %v7634_v43 = vpop.eup %7633 }
 0x3bc   :  { %v1826_v44 = vmul.f32 %v7634_v43, %v7624_v22  ;;  %v2807_v22 = vld [vmem:[%s8760_s12 + $0x8] sm:$0xff] }
 0x3be   :  { %7009 = vmatmul.mubr.msk.f32.vlgmr.msra.gmra.mrb[28].mxu1 %vm1134_vm2, %v1826_v44  ;;  %v6335_v44 = vld [vmem:[%s8762_s10] ss:$0 sm:$0xff] }
 0x3c0   :  { %v1814_v56 = vpop.xlane.xlu1 %1813 }
 0x3c1   :  { %7635 = vrcp.f32 %v1814_v56  ;;  %v2907_v56 = vld [vmem:[%s8761_s14 + $0x38] sm:$0xff] }
 0x3cb   :  { %v7636_v61 = vpop.eup %7635 }
 0x3cc   :  { %v1830_v62 = vmul.f32 %v7636_v61, %v7632_v41 }
 0x3cf   :  { %v1900_v45 = vpop.f32.mrb[20].mxu0 }
 0x3d0   :  { %v6965_v47 = vpop.f32.mrb[21].mxu0 }
 0x3df   :  { %v2047_v49 = vpop.f32.mrb[22].mxu0 }
 0x3e0   :  { %v6975_v50 = vpop.f32.mrb[23].mxu0  ;;  %6983 = vmatprep.mubr.msk.f32.mxu0 %vm1134_vm2, %v2047_v49 }
 0x3e1   :  { %v6336_v50 = vld [vmem:[%s8763_s11] ss:$0 sm:$0xff] }
 0x3eb   :  { %v1973_v51 = vpop.f32.mrb[20].mxu1 }
 0x3ec   :  { %v6970_v52 = vpop.f32.mrb[21].mxu1 }
 0x3fb   :  { %v2120_v53 = vpop.f32.mrb[22].mxu1 }
 0x3fc   :  { %v6980_v55 = vpop.f32.mrb[23].mxu1  ;;  %6984 = vmatmul.mubr.msk.f32.vlgmr.msra.gmra.mrb[24].mxu0 %vm1134_vm2, %v2120_v53 }
 0x3fd   :  { %6987 = vmatpush3.msra.mxu0 %v1977_v2  ;;  %6988 = vmatprep.mubr.msk.f32.mxu0 %vm1134_vm2, %v1900_v45  ;;  %v2906_v55 = vld [vmem:[%s8761_s14 + $0x30] sm:$0xff] }
 0x3fe   :  { %7001 = vmatprep.subr.mxu0 %v6326_v54 }
 0x3ff   :  { %v2357_v57 = vpop.f32.mrb[24].mxu1 }
 0x400   :  { %v6995_v58 = vpop.f32.mrb[25].mxu1 }
 0x401   :  { %v6337_v58 = vld [vmem:[%s8764_s13] ss:$0 sm:$0xff] }
 0x403   :  { %v2430_v59 = vpop.f32.mrb[26].mxu1 }
 0x404   :  { %6989 = vmatmul.mubr.msk.f32.vlgmr.msra.gmra.mrb[24].mxu0 %vm1134_vm2, %v1973_v51  ;;  %v7000_v60 = vpop.f32.mrb[27].mxu1 }
 0x405   :  { %7002 = vmatpush3.msra.mxu0 %v6326_v54  ;;  %7003 = vmatprep.mubr.msk.f32.mxu0 %vm1134_vm2, %v2357_v57  ;;  %v7451_v57 = vpack.c.bf16 %v2907_v56, %v2906_v55  ;;  %v6379_v55 = vld [vmem:[%s8788_s4 + $0xb0] sm:$0xff]  ;;  %v6380_v56 = vld [vmem:[%s8788_s4 + $0xb8] sm:$0xff] }
 0x406   :  { %7011 = vmatprep.subr.mxu0 %v7685_v8 }
 0x40c   :  { %7004 = vmatmul.mubr.msk.f32.vlgmr.msra.gmra.mrb[24].mxu0 %vm1134_vm2, %v2430_v59 }
 0x40d   :  { %7012 = vmatpush3.msra.mxu0 %v8102_v4  ;;  %7013 = vmatprep.mubr.msk.f32.mxu0 %vm7686_vm1, %v7685_v8  ;;  %v6334_v4 = vld [vmem:[%s8759_s9] ss:$0 sm:$0xff] }
 0x40e   :  { %7016 = vmatprep.subr.mxu0 %v6331_v63 }
 0x410   :  { %7014 = vmatmul.mubr.msk.f32.vlgmr.msra.gmra.mrb[26].mxu0 %vm1134_vm2, %v1830_v62 }
 0x411   :  { %7017 = vmatpush3.msra.mxu0 %v6331_v63 }
 0x412   :  { %7440 = vmatprep.subr.bf16.mxu0 %v7439_v36 }
 0x491   :  { %v2588_v0 = vpop.f32.mrb[28].mxu1 }
 0x492   :  { %v7010_v1 = vpop.f32.mrb[29].mxu1  ;;  %7018 = vmatprep.mubr.msk.f32.mxu0 %vm1134_vm2, %v2588_v0 }
 0x493   :  { %v6340_v1 = vld [vmem:[%s8765_s15] ss:$0 sm:$0xff] }
 0x4e3   :  { %v2661_v3 = vpop.f32.mrb[26].mxu0 }
 0x4e4   :  { %v7015_v6 = vpop.f32.mrb[27].mxu0  ;;  %7019 = vmatmul.mubr.msk.f32.vlgmr.msra.gmra.mrb[24].mxu0 %vm1134_vm2, %v2661_v3 }
 0x4e5   :  { %7442 = vmatpush3.bf16.msra.mxu0 %v7439_v36  ;;  %v6353_v36 = vld [vmem:[%s8788_s4 + $0x80] sm:$0xff] }
 0x4e6   :  { %7444 = vmatprep.subr.bf16.mxu0 %v7443_v28  ;;  %v7463_v38 = vpack.c.bf16 %v6354_v37, %v6353_v36  ;;  %v6417_v36 = vld [vmem:[%s8787_s29 + $0xe0] sm:$0xff]  ;;  %v6418_v37 = vld [vmem:[%s8787_s29 + $0xe8] sm:$0xff] }
 0x4e9   :  { %7446 = vmatpush3.bf16.msra.mxu0 %v7443_v28  ;;  %v6377_v28 = vld [vmem:[%s8788_s4 + $0xa0] sm:$0xff] }
 0x4ea   :  { %7448 = vmatprep.subr.bf16.mxu0 %v7447_v48 }
 0x4ed   :  { %7450 = vmatpush3.bf16.msra.mxu0 %v7447_v48  ;;  %v7487_v48 = vpack.c.bf16 %v6378_v39, %v6377_v28  ;;  %v6419_v39 = vld [vmem:[%s8787_s29 + $0xf0] sm:$0xff] }
 0x4ee   :  { %7452 = vmatprep.subr.bf16.mxu0 %v7451_v57 }
 0x4f1   :  { %7454 = vmatpush3.bf16.msra.mxu0 %v7451_v57 }
 0x5b7   :  { %v7020_v7 = vpop.f32.mrb[24].mxu0 }
 0x5b8   :  { %v2758_v9 = vadd.f32 %v7020_v7, %v6334_v4  ;;  %v2739_v10 = vpop.f32.mrb[25].mxu0 }
 0x5b9   :  { %v2757_v11 = vadd.f32 %v6334_v4, %v2739_v10 }
 0x5ba   :  { %v2760_v12 = vadd.f32 %v2758_v9, %v7862_v25 }
 0x5bb   :  { %v2759_v13 = vadd.f32 %v2757_v11, %v7838_v16  ;;  %v2806_v16 = vld [vmem:[%s8760_s12] sm:$0xff] }
 0x5bc   :  { %v2766_v14 = vsel %vm88_vm0, %v2760_v12, 0.0  ;;  %v7431_v27 = vpack.c.bf16 %v2807_v22, %v2806_v16  ;;  %v6362_v22 = vld [vmem:[%s8791_s30 + $0x88] sm:$0xff] }
 0x5bd   :  { %2767 = vadd.xlane.f32.xlu1 %v2766_v14  ;;  %v2763_v15 = vsel %vm88_vm0, %v2759_v13, 0.0 }
 0x5be   :  { %2764 = vadd.xlane.f32.xlu0 %v2763_v15  ;;  %7432 = vmatprep.subr.bf16.mxu1 %v7431_v27 }
 0x5bf   :  { %7434 = vmatpush3.bf16.msra.mxu1 %v7431_v27 }
 0x5c0   :  { %7436 = vmatprep.subr.bf16.mxu1 %v7435_v30 }
 0x5c3   :  { %7438 = vmatpush3.bf16.msra.mxu1 %v7435_v30  ;;  %v6363_v30 = vld [vmem:[%s8791_s30 + $0x90] sm:$0xff] }
 0x5c4   :  { %v7475_v34 = vpack.c.bf16 %v6364_v32, %v6363_v30  ;;  %v6404_v30 = vld [vmem:[%s8788_s4 + $0xd8] sm:$0xff] }
 0x5c5   :  { %v6428_v32 = vld [vmem:[%s8788_s4 + $0xf8] sm:$0xff] }
 0x64a   :  { %v2768_v17 = vpop.xlane.xlu1 %2767 }
 0x64b   :  { %v2771_v18 = vmul.f32 0.03125, %v2768_v17  ;;  %v2765_v19 = vpop.xlane.xlu0 %2764 }
 0x64c   :  { %v2770_v20 = vmul.f32 0.03125, %v2765_v19 }
 0x64d   :  { %v2773_v35 = vsub.f32 %v2760_v12, %v2771_v18 }
 0x64e   :  { %v2772_v21 = vsub.f32 %v2759_v13, %v2770_v20 }
 0x64f   :  { %v2775_v23 = vmul.f32 %v2773_v35, %v2773_v35 }
 0x650   :  { %v2774_v24 = vmul.f32 %v2772_v21, %v2772_v21 }
 0x651   :  { %v2779_v26 = vsel %vm88_vm0, %v2775_v23, 0.0 }
 0x652   :  { %2780 = vadd.xlane.f32.xlu1 %v2779_v26  ;;  %v2776_v25 = vsel %vm88_vm0, %v2774_v24, 0.0  ;;  %v6345_v24 = vld [vmem:[%s8787_s29 + $0x80] sm:$0xff]  ;;  %v6346_v26 = vld [vmem:[%s8787_s29 + $0x88] sm:$0xff] }
 0x653   :  { %2777 = vadd.xlane.f32.xlu0 %v2776_v25  ;;  %v6361_v25 = vld [vmem:[%s8791_s30 + $0x80] sm:$0xff]  ;;  %v7455_v16 = vpack.c.bf16 %v6346_v26, %v6345_v24  ;;  %v6402_v26 = vld [vmem:[%s8788_s4 + $0xc8] sm:$0xff] }
 0x654   :  { %v7471_v27 = vpack.c.bf16 %v6362_v22, %v6361_v25  ;;  %v6401_v24 = vld [vmem:[%s8788_s4 + $0xc0] sm:$0xff]  ;;  %v6426_v22 = vld [vmem:[%s8788_s4 + $0xe8] sm:$0xff] }
 0x655   :  { %7456 = vmatprep.subr.bf16.mxu1 %v7455_v16 }
 0x656   :  { %7472 = vmatprep.subr.bf16.mxu0 %v7471_v27 }
 0x6df   :  { %v2781_v40 = vpop.xlane.xlu1 %2780 }
 0x6e0   :  { %v2783_v41 = vmul.f32 0.03125, %v2781_v40  ;;  %v2778_v46 = vpop.xlane.xlu0 %2777 }
 0x6e1   :  { %v2782_v42 = vmul.f32 0.03125, %v2778_v46 }
 0x6e2   :  { %v2785_v2 = vadd.f32 1e-05, %v2783_v41 }
 0x6e3   :  { %v2784_v5 = vadd.f32 1e-05, %v2782_v42 }
 0x6e4   :  { %7637 = vrsqrt.f32 %v2785_v2 }
 0x6e5   :  { %7639 = vrsqrt.f32 %v2784_v5 }
 0x6ee   :  { %v7638_v43 = vpop.eup %7637 }
 0x6ef   :  { %v7640_v45 = vpop.eup %7639  ;;  %v2789_v47 = vmul.f32 %v7638_v43, %v2773_v35 }
 0x6f0   :  { %v2788_v49 = vmul.f32 %v7640_v45, %v2772_v21 }
 0x6f1   :  { %v2797_v51 = vmul.f32 %v6335_v44, %v2789_v47 }
 0x6f2   :  { %v2796_v52 = vmul.f32 %v6335_v44, %v2788_v49  ;;  %v6343_v44 = vld [vmem:[%s8766_s16] ss:$0 sm:$0xff] }
 0x6f3   :  { %v2805_v54 = vadd.f32 %v6336_v50, %v2797_v51 }
 0x6f4   :  { %v2804_v53 = vadd.f32 %v6336_v50, %v2796_v52  ;;  %v6344_v50 = vld [vmem:[%s8767_s17] ss:$0 sm:$0xff] }
 0x6f6   :  { %7029 = vmatprep.mubr.msk.f32.mxu1 %vm88_vm0, %v2804_v53 }
 0x6f7   :  { %7030 = vmatmul.mubr.msk.f32.vlgmr.msra.gmra.mrb[30].mxu1 %vm88_vm0, %v2805_v54 }
 0x6f8   :  { %7458 = vmatpush3.bf16.msra.mxu1 %v7455_v16  ;;  %v6425_v16 = vld [vmem:[%s8788_s4 + $0xe0] sm:$0xff] }
 0x6f9   :  { %7460 = vmatprep.subr.bf16.mxu1 %v7459_v31  ;;  %v7535_v29 = vpack.c.bf16 %v6426_v22, %v6425_v16 }
 0x6fc   :  { %7462 = vmatpush3.bf16.msra.mxu1 %v7459_v31  ;;  %v6427_v31 = vld [vmem:[%s8788_s4 + $0xf0] sm:$0xff] }
 0x6fd   :  { %7464 = vmatprep.subr.bf16.mxu1 %v7463_v38  ;;  %v7539_v28 = vpack.c.bf16 %v6428_v32, %v6427_v31  ;;  %v8532_v32 = vld [vmem:[%s8757_s7 + $0x7] ss:$0 sm:$0xff] }
 0x7ca   :  { %v7031_v59 = vpop.f32.mrb[30].mxu1 }
 0x7cb   :  { %v2895_v60 = vadd.f32 %v7031_v59, %v6337_v58  ;;  %v2889_v61 = vpop.f32.mrb[31].mxu1  ;;  %v6369_v59 = vld [vmem:[%s8787_s29 + $0xa0] sm:$0xff] }
 0x7cc   :  { %v2890_v62 = vadd.f32 %v6337_v58, %v2889_v61  ;;  %v7491_v61 = vpack.c.bf16 %v6380_v56, %v6379_v55  ;;  %v6350_v56 = vld [vmem:[%s8793_s28 + $0x4] ss:$0 sm:$0xff] }
 0x7cd   :  { %v2899_v0 = vmax.f32 %v2895_v60, 0.0 }
 0x7ce   :  { %v2898_v63 = vmax.f32 %v2890_v62, 0.0  ;;  %v6370_v62 = vld [vmem:[%s8787_s29 + $0xa8] sm:$0xff] }
 0x7d0   :  { %7048 = vmatprep.mubr.msk.f32.mxu0 %vm2915_vm3, %v2898_v63  ;;  %v6393_v63 = vld [vmem:[%s8787_s29 + $0xc0] sm:$0xff] }
 0x7d1   :  { %7049 = vmatmul.mubr.msk.f32.vlgmr.msra.gmra.mrb[28].mxu0 %vm2915_vm3, %v2899_v0  ;;  %v6394_v0 = vld [vmem:[%s8787_s29 + $0xc8] sm:$0xff] }
 0x7d2   :  { %7474 = vmatpush3.bf16.msra.mxu0 %v7471_v27  ;;  %v7511_v27 = vpack.c.bf16 %v6402_v26, %v6401_v24 }
 0x7d3   :  { %7476 = vmatprep.subr.bf16.mxu0 %v7475_v34 }
 0x7d6   :  { %7478 = vmatpush3.bf16.msra.mxu0 %v7475_v34  ;;  %v7515_v34 = vpack.c.bf16 %v6404_v30, %v6403_v33 }
 0x7d7   :  { %7488 = vmatprep.subr.bf16.mxu0 %v7487_v48 }
 0x8a4   :  { %v7050_v3 = vpop.f32.mrb[28].mxu0 }
 0x8a5   :  { %v2994_v6 = vadd.f32 %v7050_v3, %v6340_v1  ;;  %v2988_v4 = vpop.f32.mrb[29].mxu0  ;;  %v7503_v3 = vpack.c.bf16 %v6394_v0, %v6393_v63 }
 0x8a6   :  { %v2989_v7 = vadd.f32 %v6340_v1, %v2988_v4  ;;  %v7479_v1 = vpack.c.bf16 %v6370_v62, %v6369_v59  ;;  %v6372_v4 = vld [vmem:[%s8787_s29 + $0xb8] sm:$0xff]  ;;  %v6374_v62 = vld [vmem:[%s8793_s28 + $0x5] ss:$0 sm:$0xff] }
 0x8a7   :  { %v2998_v9 = vadd.f32 %v2994_v6, %v2805_v54  ;;  %v6356_v54 = vld [vmem:[%s8788_s4 + $0x98] sm:$0xff]  ;;  %v6371_v6 = vld [vmem:[%s8787_s29 + $0xb0] sm:$0xff] }
 0x8a8   :  { %v2997_v10 = vadd.f32 %v2989_v7, %v2804_v53  ;;  %v6355_v53 = vld [vmem:[%s8788_s4 + $0x90] sm:$0xff] }
 0x8a9   :  { %v3004_v11 = vsel %vm88_vm0, %v2998_v9, 0.0  ;;  %v7467_v60 = vpack.c.bf16 %v6356_v54, %v6355_v53  ;;  %v6395_v7 = vld [vmem:[%s8787_s29 + $0xd0] sm:$0xff] }
 0x8aa   :  { %3005 = vadd.xlane.f32.xlu1 %v3004_v11  ;;  %v3001_v12 = vsel %vm88_vm0, %v2997_v10, 0.0 }
 0x8ab   :  { %3002 = vadd.xlane.f32.xlu0 %v3001_v12  ;;  %v6385_v12 = vld [vmem:[%s8791_s30 + $0xa0] sm:$0xff] }
 0x937   :  { %v3006_v13 = vpop.xlane.xlu1 %3005 }
 0x938   :  { %v3008_v14 = vmul.f32 0.03125, %v3006_v13  ;;  %v3003_v15 = vpop.xlane.xlu0 %3002  ;;  %v6386_v13 = vld [vmem:[%s8791_s30 + $0xa8] sm:$0xff] }
 0x939   :  { %v3007_v17 = vmul.f32 0.03125, %v3003_v15  ;;  %v6410_v15 = vld [vmem:[%s8791_s30 + $0xc8] sm:$0xff] }
 0x93a   :  { %v3010_v18 = vsub.f32 %v2998_v9, %v3008_v14  ;;  %v6396_v9 = vld [vmem:[%s8787_s29 + $0xd8] sm:$0xff]  ;;  %v6409_v14 = vld [vmem:[%s8791_s30 + $0xc0] sm:$0xff] }
 0x93b   :  { %v3009_v19 = vsub.f32 %v2997_v10, %v3007_v17  ;;  %v7483_v10 = vpack.c.bf16 %v6372_v4, %v6371_v6  ;;  %v7507_v11 = vpack.c.bf16 %v6396_v9, %v6395_v7  ;;  %v7495_v17 = vpack.c.bf16 %v6386_v13, %v6385_v12  ;;  %v6430_v13 = vld [vmem:[%s8792_s0 + $0x7] ss:$0 sm:$0xff] }
 0x93c   :  { %v3012_v20 = vmul.f32 %v3010_v18, %v3010_v18 }
 0x93d   :  { %v3011_v35 = vmul.f32 %v3009_v19, %v3009_v19 }
 0x93e   :  { %v3016_v21 = vsel %vm88_vm0, %v3012_v20, 0.0  ;;  %v6388_v20 = vld [vmem:[%s8791_s30 + $0xb8] sm:$0xff] }
 0x93f   :  { %3017 = vadd.xlane.f32.xlu1 %v3016_v21  ;;  %v3013_v23 = vsel %vm88_vm0, %v3011_v35, 0.0  ;;  %v6411_v35 = vld [vmem:[%s8791_s30 + $0xd0] sm:$0xff]  ;;  %v6412_v21 = vld [vmem:[%s8791_s30 + $0xd8] sm:$0xff] }
 0x940   :  { %3014 = vadd.xlane.f32.xlu0 %v3013_v23  ;;  %v7523_v25 = vpack.c.bf16 %v6412_v21, %v6411_v35 }
 0x9cc   :  { %v3018_v40 = vpop.xlane.xlu1 %3017 }
 0x9cd   :  { %v3020_v41 = vmul.f32 0.03125, %v3018_v40  ;;  %v3015_v46 = vpop.xlane.xlu0 %3014 }
 0x9ce   :  { %v3019_v42 = vmul.f32 0.03125, %v3015_v46  ;;  %v6434_v46 = vld [vmem:[%s8791_s30 + $0xe8] sm:$0xff] }
 0x9cf   :  { %v3022_v2 = vadd.f32 1e-05, %v3020_v41  ;;  %v6433_v41 = vld [vmem:[%s8791_s30 + $0xe0] sm:$0xff] }
 0x9d0   :  { %v3021_v5 = vadd.f32 1e-05, %v3019_v42  ;;  %v7543_v42 = vpack.c.bf16 %v6434_v46, %v6433_v41 }
 0x9d1   :  { %7641 = vrsqrt.f32 %v3022_v2  ;;  %v6435_v2 = vld [vmem:[%s8791_s30 + $0xf0] sm:$0xff] }
 0x9d2   :  { %7643 = vrsqrt.f32 %v3021_v5  ;;  %v6436_v5 = vld [vmem:[%s8791_s30 + $0xf8] sm:$0xff] }
 0x9db   :  { %v7642_v43 = vpop.eup %7641 }
 0x9dc   :  { %v7644_v45 = vpop.eup %7643  ;;  %v3026_v47 = vmul.f32 %v7642_v43, %v3010_v18  ;;  %v7519_v18 = vpack.c.bf16 %v6410_v15, %v6409_v14  ;;  %v7547_v43 = vpack.c.bf16 %v6436_v5, %v6435_v2 }
 0x9dd   :  { %v3025_v49 = vmul.f32 %v7644_v45, %v3009_v19  ;;  %v6387_v19 = vld [vmem:[%s8791_s30 + $0xb0] sm:$0xff] }
 0x9de   :  { %v3034_v51 = vmul.f32 %v6343_v44, %v3026_v47  ;;  %v7499_v23 = vpack.c.bf16 %v6388_v20, %v6387_v19 }
 0x9df   :  { %v3033_v52 = vmul.f32 %v6343_v44, %v3025_v49 }
 0x9e0   :  { %v8312_v58 = vadd.f32 %v6344_v50, %v3034_v51  ;;  %v6382_v51 = vld [vmem:[%s8792_s0 + $0x5] ss:$0 sm:$0xff] }
 0x9e1   :  { %v8310_v57 = vadd.f32 %v6344_v50, %v3033_v52  ;;  %v6358_v50 = vld [vmem:[%s8792_s0 + $0x4] ss:$0 sm:$0xff] }
 0x9e3   :  { %7059 = vmatprep.mubr.msk.f32.mxu1 %vm88_vm0, %v8310_v57  ;;  %7081 = vmatprep.mubr.msk.f32.mxu0 %vm88_vm0, %v8310_v57 }
 0x9e4   :  { %7060 = vmatmul.mubr.msk.f32.vlgmr.msra.gmra.mrb[32].mxu1 %vm88_vm0, %v8312_v58  ;;  %7082 = vmatmul.mubr.msk.f32.vlgmr.msra.gmra.mrb[30].mxu0 %vm88_vm0, %v8312_v58 }
 0x9e5   :  { %7466 = vmatpush3.bf16.msra.mxu1 %v7463_v38  ;;  %7490 = vmatpush3.bf16.msra.mxu0 %v7487_v48  ;;  %v7527_v38 = vpack.c.bf16 %v6418_v37, %v6417_v36  ;;  %v6420_v48 = vld [vmem:[%s8787_s29 + $0xf8] sm:$0xff] }
 0x9e6   :  { %7070 = vmatprep.mubr.msk.f32.mxu1 %vm88_vm0, %v8310_v57  ;;  %7103 = vmatprep.mubr.msk.f32.mxu0 %vm88_vm0, %v8310_v57  ;;  %v7531_v40 = vpack.c.bf16 %v6420_v48, %v6419_v39 }
 0x9e7   :  { %7468 = vmatprep.subr.bf16.mxu1 %v7467_v60  ;;  %7492 = vmatprep.subr.bf16.mxu0 %v7491_v61 }
 0x9e9   :  { %7470 = vmatpush3.bf16.msra.mxu1 %v7467_v60  ;;  %7494 = vmatpush3.bf16.msra.mxu0 %v7491_v61 }
 0x9ea   :  { %7480 = vmatprep.subr.bf16.mxu1 %v7479_v1  ;;  %7504 = vmatprep.subr.bf16.mxu0 %v7503_v3 }
 0x9ec   :  { %7071 = vmatmul.mubr.msk.f32.vlgmr.msra.gmra.mrb[34].mxu1 %vm88_vm0, %v8312_v58  ;;  %7104 = vmatmul.mubr.msk.f32.vlgmr.msra.gmra.mrb[32].mxu0 %vm88_vm0, %v8312_v58 }
 0x9ed   :  { %7482 = vmatpush3.bf16.msra.mxu1 %v7479_v1  ;;  %7092 = vmatprep.mubr.msk.f32.mxu1 %vm88_vm0, %v8310_v57 }
 0x9ee   :  { %7506 = vmatpush3.bf16.msra.mxu0 %v7503_v3  ;;  %7125 = vmatprep.mubr.msk.f32.mxu0 %vm88_vm0, %v8310_v57 }
 0x9ef   :  { %7484 = vmatprep.subr.bf16.mxu1 %v7483_v10  ;;  %7508 = vmatprep.subr.bf16.mxu0 %v7507_v11 }
 0x9f1   :  { %7486 = vmatpush3.bf16.msra.mxu1 %v7483_v10 }
 0x9f2   :  { %7510 = vmatpush3.bf16.msra.mxu0 %v7507_v11  ;;  %7496 = vmatprep.subr.bf16.mxu1 %v7495_v17  ;;  %v6406_v11 = vld [vmem:[%s8792_s0 + $0x6] ss:$0 sm:$0xff] }
 0x9f3   :  { %7520 = vmatprep.subr.bf16.mxu0 %v7519_v18 }
 0x9f4   :  { %7093 = vmatmul.mubr.msk.f32.vlgmr.msra.gmra.mrb[36].mxu1 %vm88_vm0, %v8312_v58 }
 0x9f5   :  { %7126 = vmatmul.mubr.msk.f32.vlgmr.msra.gmra.mrb[34].mxu0 %vm88_vm0, %v8312_v58  ;;  %7498 = vmatpush3.bf16.msra.mxu1 %v7495_v17  ;;  %v6398_v17 = vld [vmem:[%s8793_s28 + $0x6] ss:$0 sm:$0xff] }
 0x9f6   :  { %7114 = vmatprep.mubr.msk.f32.mxu1 %vm88_vm0, %v8310_v57  ;;  %7522 = vmatpush3.bf16.msra.mxu0 %v7519_v18 }
 0x9f7   :  { %7147 = vmatprep.mubr.msk.f32.mxu0 %vm88_vm0, %v8310_v57  ;;  %7500 = vmatprep.subr.bf16.mxu1 %v7499_v23 }
 0x9f8   :  { %7524 = vmatprep.subr.bf16.mxu0 %v7523_v25 }
 0x9f9   :  { %7502 = vmatpush3.bf16.msra.mxu1 %v7499_v23  ;;  %v6422_v23 = vld [vmem:[%s8793_s28 + $0x7] ss:$0 sm:$0xff] }
 0x9fa   :  { %7526 = vmatpush3.bf16.msra.mxu0 %v7523_v25  ;;  %7512 = vmatprep.subr.bf16.mxu1 %v7511_v27 }
 0x9fb   :  { %7536 = vmatprep.subr.bf16.mxu0 %v7535_v29 }
 0x9fc   :  { %7115 = vmatmul.mubr.msk.f32.vlgmr.msra.gmra.mrb[38].mxu1 %vm88_vm0, %v8312_v58 }
 0x9fd   :  { %7148 = vmatmul.mubr.msk.f32.vlgmr.msra.gmra.mrb[36].mxu0 %vm88_vm0, %v8312_v58  ;;  %7514 = vmatpush3.bf16.msra.mxu1 %v7511_v27  ;;  %v6366_v27 = vld [vmem:[%s8757_s7 + $0x4] ss:$0 sm:$0xff] }
 0x9fe   :  { %7136 = vmatprep.mubr.msk.f32.mxu1 %vm88_vm0, %v8310_v57  ;;  %7538 = vmatpush3.bf16.msra.mxu0 %v7535_v29 }
 0x9ff   :  { %7169 = vmatprep.mubr.msk.f32.mxu0 %vm88_vm0, %v8310_v57  ;;  %7516 = vmatprep.subr.bf16.mxu1 %v7515_v34 }
 0xa00   :  { %7540 = vmatprep.subr.bf16.mxu0 %v7539_v28 }
 0xa01   :  { %7518 = vmatpush3.bf16.msra.mxu1 %v7515_v34 }
 0xa02   :  { %7542 = vmatpush3.bf16.msra.mxu0 %v7539_v28  ;;  %7528 = vmatprep.subr.bf16.mxu1 %v7527_v38 }
 0xa03   :  { %7183 = vmatprep.subr.mxu0 %v7685_v8 }
 0xa04   :  { %7137 = vmatmul.mubr.msk.f32.vlgmr.msra.gmra.mrb[40].mxu1 %vm88_vm0, %v8312_v58 }
 0xa05   :  { %7170 = vmatmul.mubr.msk.f32.vlgmr.msra.gmra.mrb[38].mxu0 %vm88_vm0, %v8312_v58  ;;  %7530 = vmatpush3.bf16.msra.mxu1 %v7527_v38 }
 0xa06   :  { %7158 = vmatprep.mubr.msk.f32.mxu1 %vm88_vm0, %v8310_v57  ;;  %7532 = vmatprep.subr.bf16.mxu1 %v7531_v40 }
 0xa07   :  { %7185 = vmatprep.mubr.msk.f32.mxu0 %vm7686_vm1, %v7685_v8 }
 0xa09   :  { %7534 = vmatpush3.bf16.msra.mxu1 %v7531_v40 }
 0xa0a   :  { %7544 = vmatprep.subr.bf16.mxu1 %v7543_v42 }
 0xa0c   :  { %7159 = vmatmul.mubr.msk.f32.vlgmr.msra.gmra.mrb[42].mxu1 %vm88_vm0, %v8312_v58 }
 0xa0d   :  { %7546 = vmatpush3.bf16.msra.mxu1 %v7543_v42  ;;  %7180 = vmatprep.mubr.msk.f32.mxu1 %vm88_vm0, %v8310_v57 }
 0xa0e   :  { %7548 = vmatprep.subr.bf16.mxu1 %v7547_v43 }
 0xa11   :  { %7550 = vmatpush3.bf16.msra.mxu1 %v7547_v43 }
 0xa12   :  { %7188 = vmatprep.subr.mxu1 %v7685_v8 }
 0xa14   :  { %7181 = vmatmul.mubr.msk.f32.vlgmr.msra.gmra.mrb[44].mxu1 %vm88_vm0, %v8312_v58 }
 0xa15   :  { %7190 = vmatprep.mubr.msk.f32.mxu1 %vm7686_vm1, %v7685_v8 }
 0xab7   :  { %v7061_v44 = vpop.f32.mrb[32].mxu1  ;;  %v8464_v45 = vpop.f32.mrb[30].mxu0 }
 0xab8   :  { %v3128_v47 = vpop.f32.mrb[33].mxu1  ;;  %v3304_v49 = vpop.f32.mrb[31].mxu0  ;;  %v3134_v26 = vadd.f32 %v7061_v44, %v6350_v56  ;;  %v3310_v39 = vadd.f32 %v8464_v45, %v6366_v27 }
 0xab9   :  { %v3129_v61 = vadd.f32 %v6350_v56, %v3128_v47  ;;  %v3305_v30 = vadd.f32 %v6366_v27, %v3304_v49 }
 0xabf   :  { %v7072_v52 = vpop.f32.mrb[34].mxu1  ;;  %v7105_v53 = vpop.f32.mrb[32].mxu0 }
 0xac0   :  { %v3216_v54 = vpop.f32.mrb[35].mxu1  ;;  %v3480_v55 = vpop.f32.mrb[33].mxu0  ;;  %v3222_v21 = vadd.f32 %v7072_v52, %v6358_v50  ;;  %v3486_v29 = vadd.f32 %v7105_v53, %v6382_v51 }
 0xac1   :  { %v3217_v59 = vadd.f32 %v6358_v50, %v3216_v54  ;;  %v3481_v60 = vadd.f32 %v6382_v51, %v3480_v55 }
 0xac3   :  { %7184 = vmatpush3.xpose.msk.msra.mxu0 %vm1134_vm2, %v3217_v59  ;;  %7189 = vmatpush3.xpose.msk.msra.mxu1 %vm1134_vm2, %v3481_v60 }
 0xac4   :  { %7193 = vmatprep.subr.mxu0 %v7685_v8  ;;  %7198 = vmatprep.subr.mxu1 %v7685_v8 }
 0xac6   :  { %7186 = vmatmul.mubr.msk.f32.vlgmr.msra.gmra.mrb[40].mxu0 %vm1134_vm2, %v3129_v61 }
 0xac7   :  { %v7094_v63 = vpop.f32.mrb[36].mxu1  ;;  %7195 = vmatprep.mubr.msk.f32.mxu0 %vm7686_vm1, %v7685_v8 }
 0xac8   :  { %v7127_v0 = vpop.f32.mrb[34].mxu0  ;;  %v3392_v1 = vpop.f32.mrb[37].mxu1  ;;  %v3398_v31 = vadd.f32 %v7094_v63, %v6374_v62 }
 0xac9   :  { %v3393_v3 = vadd.f32 %v6374_v62, %v3392_v1  ;;  %v3656_v6 = vpop.f32.mrb[35].mxu0  ;;  %v3662_v33 = vadd.f32 %v7127_v0, %v6398_v17 }
 0xaca   :  { %v3657_v35 = vadd.f32 %v6398_v17, %v3656_v6 }
 0xacb   :  { %7191 = vmatmul.mubr.msk.f32.vlgmr.msra.gmra.mrb[46].mxu1 %vm1134_vm2, %v3393_v3 }
 0xacc   :  { %7200 = vmatprep.mubr.msk.f32.mxu1 %vm7686_vm1, %v7685_v8 }
 0xacf   :  { %v8488_v4 = vpop.f32.mrb[38].mxu1 }
 0xad0   :  { %v8490_v7 = vpop.f32.mrb[36].mxu0  ;;  %v8492_v9 = vpop.f32.mrb[39].mxu1 }
 0xad1   :  { %v8494_v10 = vpop.f32.mrb[37].mxu0 }
 0xad7   :  { %v7138_v12 = vpop.f32.mrb[40].mxu1 }
 0xad8   :  { %v7171_v14 = vpop.f32.mrb[38].mxu0  ;;  %v3744_v15 = vpop.f32.mrb[41].mxu1  ;;  %v3750_v16 = vadd.f32 %v7138_v12, %v6406_v11 }
 0xad9   :  { %v3745_v18 = vadd.f32 %v6406_v11, %v3744_v15  ;;  %v4008_v19 = vpop.f32.mrb[39].mxu0  ;;  %v4014_v34 = vadd.f32 %v7171_v14, %v6430_v13 }
 0xada   :  { %v4009_v20 = vadd.f32 %v6430_v13, %v4008_v19 }
 0xadb   :  { %7194 = vmatpush3.xpose.msk.msra.mxu0 %vm1134_vm2, %v3745_v18 }
 0xadc   :  { %7199 = vmatpush3.xpose.msk.msra.mxu1 %vm1134_vm2, %v4009_v20  ;;  %7203 = vmatprep.subr.mxu0 %v7685_v8 }
 0xadd   :  { %7208 = vmatprep.subr.mxu1 %v7685_v8 }
 0xade   :  { %7196 = vmatmul.mubr.msk.f32.vlgmr.msra.gmra.mrb[42].mxu0 %vm1134_vm2, %v3657_v35 }
 0xadf   :  { %v7160_v24 = vpop.f32.mrb[42].mxu1  ;;  %7204 = vmatpush3.xpose.msk.msra.mxu0 %vm1134_vm2, %v3222_v21  ;;  %7205 = vmatprep.mubr.msk.f32.mxu0 %vm7686_vm1, %v7685_v8 }
 0xae0   :  { %v3920_v25 = vpop.f32.mrb[43].mxu1  ;;  %7213 = vmatprep.subr.mxu0 %v7685_v8  ;;  %v3926_v38 = vadd.f32 %v7160_v24, %v6422_v23 }
 0xae1   :  { %v3921_v22 = vadd.f32 %v6422_v23, %v3920_v25 }
 0xae2   :  { %7206 = vmatmul.mubr.msk.f32.vlgmr.msra.gmra.mrb[44].mxu0 %vm1134_vm2, %v3134_v26 }
 0xae3   :  { %7201 = vmatmul.mubr.msk.f32.vlgmr.msra.gmra.mrb[48].mxu1 %vm1134_vm2, %v3921_v22  ;;  %7214 = vmatpush3.xpose.msk.msra.mxu0 %vm1134_vm2, %v3750_v16 }
 0xae4   :  { %7209 = vmatpush3.xpose.msk.msra.mxu1 %vm1134_vm2, %v3486_v29  ;;  %7215 = vmatprep.mubr.msk.f32.mxu0 %vm7686_vm1, %v7685_v8 }
 0xae5   :  { %7210 = vmatprep.mubr.msk.f32.mxu1 %vm7686_vm1, %v7685_v8  ;;  %7218 = vmatprep.subr.mxu1 %v7685_v8 }
 0xae6   :  { %7216 = vmatmul.mubr.msk.f32.vlgmr.msra.gmra.mrb[46].mxu0 %vm1134_vm2, %v3662_v33  ;;  %7223 = vmatprep.subr.mxu0 %v7685_v8 }
 0xae7   :  { %v7182_v36 = vpop.f32.mrb[44].mxu1  ;;  %7211 = vmatmul.mubr.msk.f32.vlgmr.msra.gmra.mrb[50].mxu1 %vm1134_vm2, %v3398_v31  ;;  %7224 = vmatpush3.msra.mxu0 %v3305_v30 }
 0xae8   :  { %v8538_v37 = vadd.f32 %v7182_v36, %v8532_v32  ;;  %7219 = vmatpush3.xpose.msk.msra.mxu1 %vm1134_vm2, %v4014_v34  ;;  %v8541_v28 = vpop.f32.mrb[45].mxu1  ;;  %7220 = vmatprep.mubr.msk.f32.mxu1 %vm7686_vm1, %v7685_v8 }
 0xae9   :  { %7228 = vmatprep.subr.mxu1 %v7685_v8  ;;  %7225 = vmatprep.mubr.msk.f32.mxu0 %vm7686_vm1, %v7685_v8 }
 0xaea   :  { %7233 = vmatprep.subr.mxu0 %v7685_v8 }
 0xaeb   :  { %7221 = vmatmul.mubr.msk.f32.vlgmr.msra.gmra.mrb[52].mxu1 %vm1134_vm2, %v3926_v38 }
 0xaec   :  { %7229 = vmatpush3.msra.mxu1 %v3310_v39  ;;  %7230 = vmatprep.mubr.msk.f32.mxu1 %vm7686_vm1, %v7685_v8 }
 0xaed   :  { %7238 = vmatprep.subr.mxu1 %v7685_v8 }
 0xb99   :  { %v4177_v48 = vpop.f32.mrb[40].mxu0 }
 0xb9a   :  { %v7187_v40 = vpop.f32.mrb[41].mxu0  ;;  %v4713_v41 = vsel %vm1134_vm2, %v4177_v48, -inf }
 0xb9b   :  { %4714 = vmax.xlane.f32.xlu0 %v4713_v41  ;;  %v6390_v41 = vld [vmem:[%s8757_s7 + $0x5] ss:$0 sm:$0xff] }
 0xb9e   :  { %v4253_v46 = vpop.f32.mrb[46].mxu1 }
 0xb9f   :  { %v7192_v42 = vpop.f32.mrb[47].mxu1  ;;  %v4716_v2 = vsel %vm1134_vm2, %v4253_v46, -inf }
 0xba0   :  { %4717 = vmax.xlane.f32.xlu0 %v4716_v2  ;;  %v3569_v2 = vadd.f32 %v6390_v41, %v8492_v9 }
 0xbb1   :  { %v4329_v5 = vpop.f32.mrb[42].mxu0 }
 0xbb2   :  { %v7197_v43 = vpop.f32.mrb[43].mxu0  ;;  %v4719_v44 = vsel %vm1134_vm2, %v4329_v5, -inf }
 0xbb3   :  { %4720 = vmax.xlane.f32.xlu0 %v4719_v44 }
 0xbb5   :  { %v4481_v45 = vpop.f32.mrb[44].mxu0 }
 0xbb6   :  { %v8557_v47 = vpop.f32.mrb[48].mxu1  ;;  %v7207_v49 = vpop.f32.mrb[45].mxu0  ;;  %v4725_v50 = vsel %vm1134_vm2, %v4481_v45, -inf }
 0xbb7   :  { %v7202_v51 = vpop.f32.mrb[49].mxu1  ;;  %4726 = vmax.xlane.f32.xlu1 %v4725_v50  ;;  %v4722_v33 = vsel %vm1134_vm2, %v8557_v47, -inf }
 0xbb9   :  { %v4633_v52 = vpop.f32.mrb[46].mxu0 }
 0xbba   :  { %v4557_v53 = vpop.f32.mrb[50].mxu1  ;;  %v7217_v54 = vpop.f32.mrb[47].mxu0  ;;  %v4731_v61 = vsel %vm1134_vm2, %v4633_v52, -inf }
 0xbbb   :  { %v7212_v55 = vpop.f32.mrb[51].mxu1  ;;  %v4728_v56 = vsel %vm1134_vm2, %v4557_v53, -inf }
 0xbbc   :  { %4729 = vmax.xlane.f32.xlu1 %v4728_v56  ;;  %v3574_v55 = vadd.f32 %v8488_v4, %v6390_v41 }
 0xbbe   :  { %v8561_v59 = vpop.f32.mrb[52].mxu1 }
 0xbbf   :  { %v7222_v60 = vpop.f32.mrb[53].mxu1  ;;  %v4734_v39 = vsel %vm1134_vm2, %v8561_v59, -inf }
 0xbc0   :  { %4732 = vmax.xlane.f32.xlu1 %v4731_v61 }
 0xc28   :  { %v4715_v62 = vpop.xlane.xlu0 %4714 }
 0xc29   :  { %v4737_v63 = vsub.f32 %v4177_v48, %v4715_v62 }
 0xc2b   :  { %v4745_v0 = vmul.f32 1.442695, %v4737_v63 }
 0xc2d   :  { %7645 = vpow2.f32 %v4745_v0  ;;  %v4718_v1 = vpop.xlane.xlu0 %4717 }
 0xc2e   :  { %v4738_v3 = vsub.f32 %v4253_v46, %v4718_v1 }
 0xc30   :  { %v4747_v6 = vmul.f32 1.442695, %v4738_v3 }
 0xc32   :  { %7647 = vpow2.f32 %v4747_v6 }
 0xc37   :  { %v7646_v11 = vpop.eup %7645 }
 0xc38   :  { %v4761_v12 = vsel %vm1134_vm2, %v7646_v11, 0.0 }
 0xc39   :  { %4762 = vadd.xlane.f32.xlu0 %v4761_v12  ;;  %v4097_v12 = vadd.f32 %v8532_v32, %v8541_v28  ;;  %v6459_v32 = vld [vmem:[%s8758_s8 + $0x20] sm:$0xff] }
 0xc3c   :  { %v7648_v13 = vpop.eup %7647 }
 0xc3d   :  { %v4764_v14 = vsel %vm1134_vm2, %v7648_v13, 0.0 }
 0xc3e   :  { %4765 = vadd.xlane.f32.xlu0 %v4764_v14  ;;  %v6462_v14 = vld [vmem:[%s8758_s8 + $0x28] sm:$0xff] }
 0xc40   :  { %v4721_v15 = vpop.xlane.xlu0 %4720 }
 0xc41   :  { %v4739_v17 = vsub.f32 %v4329_v5, %v4721_v15 }
 0xc43   :  { %v4749_v18 = vmul.f32 1.442695, %v4739_v17 }
 0xc44   :  { %v4727_v19 = vpop.xlane.xlu1 %4726 }
 0xc45   :  { %7649 = vpow2.f32 %v4749_v18  ;;  %v4741_v20 = vsub.f32 %v4481_v45, %v4727_v19 }
 0xc47   :  { %v4753_v35 = vmul.f32 1.442695, %v4741_v20 }
 0xc49   :  { %7651 = vpow2.f32 %v4753_v35  ;;  %v4730_v21 = vpop.xlane.xlu1 %4729 }
 0xc4a   :  { %v4742_v23 = vsub.f32 %v4557_v53, %v4730_v21 }
 0xc4c   :  { %v4755_v24 = vmul.f32 1.442695, %v4742_v23 }
 0xc4d   :  { %v4733_v26 = vpop.xlane.xlu1 %4732 }
 0xc4e   :  { %7653 = vpow2.f32 %v4755_v24  ;;  %v4743_v25 = vsub.f32 %v4633_v52, %v4733_v26  ;;  %v6469_v26 = vld [vmem:[%s8758_s8 + $0x30] sm:$0xff] }
 0xc4f   :  { %v8566_v16 = vpop.eup %7649 }
 0xc50   :  { %v4757_v22 = vmul.f32 1.442695, %v4743_v25  ;;  %v4767_v27 = vsel %vm1134_vm2, %v8566_v16, 0.0 }
 0xc51   :  { %4768 = vadd.xlane.f32.xlu0 %v4767_v27 }
 0xc52   :  { %7655 = vpow2.f32 %v4757_v22 }
 0xc53   :  { %v7652_v29 = vpop.eup %7651 }
 0xc54   :  { %v4773_v30 = vsel %vm1134_vm2, %v7652_v29, 0.0 }
 0xc55   :  { %4723 = vmax.xlane.f32.xlu0 %v4722_v33  ;;  %4774 = vadd.xlane.f32.xlu1 %v4773_v30 }
 0xc58   :  { %v7654_v31 = vpop.eup %7653 }
 0xc59   :  { %v4776_v34 = vsel %vm1134_vm2, %v7654_v31, 0.0 }
 0xc5a   :  { %4777 = vadd.xlane.f32.xlu1 %v4776_v34  ;;  %v6474_v34 = vld [vmem:[%s8758_s8 + $0x38] sm:$0xff] }
 0xc5c   :  { %v7656_v36 = vpop.eup %7655 }
 0xc5d   :  { %v4779_v38 = vsel %vm1134_vm2, %v7656_v36, 0.0 }
 0xc5e   :  { %4780 = vadd.xlane.f32.xlu1 %v4779_v38 }
 0xc62   :  { %4735 = vmax.xlane.f32.xlu1 %v4734_v39 }
 0xcc6   :  { %v4763_v48 = vpop.xlane.xlu0 %4762 }
 0xcc7   :  { %7657 = vrcp.f32 %v4763_v48 }
 0xccb   :  { %v4766_v40 = vpop.xlane.xlu0 %4765 }
 0xccc   :  { %7659 = vrcp.f32 %v4766_v40 }
 0xcd1   :  { %v7658_v46 = vpop.eup %7657 }
 0xcd2   :  { %v4793_v42 = vmul.f32 %v7658_v46, %v7646_v11 }
 0xcd4   :  { %7226 = vmatmul.mubr.msk.f32.vlgmr.msra.gmra.mrb[48].mxu0 %vm1134_vm2, %v4793_v42 }
 0xcd5   :  { %7234 = vmatpush3.msra.mxu0 %v3569_v2  ;;  %7235 = vmatprep.mubr.msk.f32.mxu0 %vm7686_vm1, %v7685_v8 }
 0xcd6   :  { %v7660_v5 = vpop.eup %7659  ;;  %7243 = vmatprep.subr.mxu0 %v6462_v14 }
 0xcd7   :  { %v4794_v43 = vmul.f32 %v7660_v5, %v7648_v13 }
 0xcd9   :  { %7236 = vmatmul.mubr.msk.f32.vlgmr.msra.gmra.mrb[50].mxu0 %vm1134_vm2, %v4794_v43 }
 0xcda   :  { %7244 = vmatpush3.msra.mxu0 %v6462_v14 }
 0xcdb   :  { %7248 = vmatprep.subr.mxu0 %v6459_v32 }
 0xcde   :  { %v4769_v44 = vpop.xlane.xlu0 %4768 }
 0xce2   :  { %v4724_v45 = vpop.xlane.xlu0 %4723  ;;  %v4775_v49 = vpop.xlane.xlu1 %4774 }
 0xce3   :  { %v4740_v50 = vsub.f32 %v8557_v47, %v4724_v45  ;;  %7661 = vrcp.f32 %v4775_v49  ;;  %v6414_v47 = vld [vmem:[%s8757_s7 + $0x6] ss:$0 sm:$0xff] }
 0xce4   :  { %v3833_v1 = vadd.f32 %v6414_v47, %v8494_v10  ;;  %v3838_v11 = vadd.f32 %v8490_v7, %v6414_v47 }
 0xce5   :  { %v4751_v51 = vmul.f32 1.442695, %v4740_v50 }
 0xce7   :  { %7663 = vpow2.f32 %v4751_v51  ;;  %v4778_v52 = vpop.xlane.xlu1 %4777 }
 0xce8   :  { %7665 = vrcp.f32 %v4778_v52 }
 0xce9   :  { %7667 = vrcp.f32 %v4769_v44 }
 0xceb   :  { %v4781_v9 = vpop.xlane.xlu1 %4780 }
 0xcec   :  { %7669 = vrcp.f32 %v4781_v9 }
 0xced   :  { %v7662_v53 = vpop.eup %7661 }
 0xcee   :  { %v4797_v54 = vmul.f32 %v7662_v53, %v7652_v29 }
 0xcef   :  { %v4736_v56 = vpop.xlane.xlu1 %4735 }
 0xcf0   :  { %v4744_v60 = vsub.f32 %v8561_v59, %v4736_v56  ;;  %7231 = vmatmul.mubr.msk.f32.vlgmr.msra.gmra.mrb[54].mxu1 %vm1134_vm2, %v4797_v54 }
 0xcf1   :  { %v7664_v61 = vpop.eup %7663  ;;  %7239 = vmatpush3.msra.mxu1 %v3574_v55  ;;  %7240 = vmatprep.mubr.msk.f32.mxu1 %vm7686_vm1, %v7685_v8  ;;  %v6484_v55 = vld [vmem:[%s8760_s12 + $0x28] sm:$0xff] }
 0xcf2   :  { %v7666_v62 = vpop.eup %7665  ;;  %v4759_v63 = vmul.f32 1.442695, %v4744_v60  ;;  %v4770_v0 = vsel %vm1134_vm2, %v7664_v61, 0.0  ;;  %7253 = vmatprep.subr.mxu1 %v7685_v8  ;;  %v6485_v60 = vld [vmem:[%s8760_s12 + $0x30] sm:$0xff] }
 0xcf3   :  { %v4798_v4 = vmul.f32 %v7666_v62, %v7654_v31  ;;  %4771 = vadd.xlane.f32.xlu0 %v4770_v0  ;;  %v7668_v59 = vpop.eup %7667  ;;  %v6491_v62 = vld [vmem:[%s8761_s14 + $0x40] sm:$0xff]  ;;  %v6493_v0 = vld [vmem:[%s8761_s14 + $0x50] sm:$0xff] }
 0xcf4   :  { %7671 = vpow2.f32 %v4759_v63  ;;  %v4795_v3 = vmul.f32 %v7668_v59, %v8566_v16  ;;  %v6492_v63 = vld [vmem:[%s8761_s14 + $0x48] sm:$0xff]  ;;  %v6494_v59 = vld [vmem:[%s8761_s14 + $0x58] sm:$0xff] }
 0xcf5   :  { %7241 = vmatmul.mubr.msk.f32.vlgmr.msra.gmra.mrb[56].mxu1 %vm1134_vm2, %v4798_v4  ;;  %v7559_v4 = vpack.c.bf16 %v6492_v63, %v6491_v62 }
 0xcf6   :  { %7254 = vmatpush3.msra.mxu1 %v3833_v1  ;;  %7255 = vmatprep.mubr.msk.f32.mxu1 %vm7686_vm1, %v7685_v8  ;;  %v7670_v6 = vpop.eup %7669  ;;  %v7563_v1 = vpack.c.bf16 %v6494_v59, %v6493_v0 }
 0xcf7   :  { %7258 = vmatprep.subr.mxu1 %v7685_v8  ;;  %v4799_v10 = vmul.f32 %v7670_v6, %v7656_v36  ;;  %v6496_v6 = vld [vmem:[%s8761_s14 + $0x68] sm:$0xff] }
 0xcf9   :  { %7256 = vmatmul.mubr.msk.f32.vlgmr.msra.gmra.mrb[58].mxu1 %vm1134_vm2, %v4795_v3  ;;  %v6495_v3 = vld [vmem:[%s8761_s14 + $0x60] sm:$0xff] }
 0xcfa   :  { %7259 = vmatpush3.msra.mxu1 %v3838_v11  ;;  %7260 = vmatprep.mubr.msk.f32.mxu1 %vm7686_vm1, %v7685_v8  ;;  %v7567_v11 = vpack.c.bf16 %v6496_v6, %v6495_v3  ;;  %v6506_v6 = vld [vmem:[%s8767_s17 + $0x1] ss:$0 sm:$0xff] }
 0xcfb   :  { %7268 = vmatprep.subr.mxu1 %v7685_v8 }
 0xcfd   :  { %7261 = vmatmul.mubr.msk.f32.vlgmr.msra.gmra.mrb[60].mxu1 %vm1134_vm2, %v4799_v10 }
 0xcfe   :  { %v7672_v13 = vpop.eup %7671  ;;  %7269 = vmatpush3.msra.mxu1 %v4097_v12  ;;  %7270 = vmatprep.mubr.msk.f32.mxu1 %vm7686_vm1, %v7685_v8 }
 0xcff   :  { %v4782_v7 = vsel %vm1134_vm2, %v7672_v13, 0.0 }
 0xd00   :  { %4783 = vadd.xlane.f32.xlu1 %v4782_v7 }
 0xd80   :  { %v4772_v28 = vpop.xlane.xlu0 %4771 }
 0xd81   :  { %7673 = vrcp.f32 %v4772_v28 }
 0xd8b   :  { %v7674_v15 = vpop.eup %7673 }
 0xd8c   :  { %v4796_v17 = vmul.f32 %v7674_v15, %v7664_v61  ;;  %v6486_v61 = vld [vmem:[%s8760_s12 + $0x38] sm:$0xff]  ;;  %v6481_v15 = vld [vmem:[%s8762_s10 + $0x1] ss:$0 sm:$0xff] }
 0xd8d   :  { %v4784_v16 = vpop.xlane.xlu1 %4783  ;;  %v7555_v47 = vpack.c.bf16 %v6486_v61, %v6485_v60 }
 0xd8e   :  { %7271 = vmatmul.mubr.msk.f32.vlgmr.msra.gmra.mrb[62].mxu1 %vm1134_vm2, %v4796_v17  ;;  %7675 = vrcp.f32 %v4784_v16 }
 0xd98   :  { %v7676_v30 = vpop.eup %7675 }
 0xd99   :  { %v4800_v31 = vmul.f32 %v7676_v30, %v7672_v13 }
 0xda7   :  { %v4870_v18 = vpop.f32.mrb[48].mxu0 }
 0xda8   :  { %v7227_v19 = vpop.f32.mrb[49].mxu0 }
 0xdac   :  { %v5018_v20 = vpop.f32.mrb[50].mxu0 }
 0xdad   :  { %v7237_v35 = vpop.f32.mrb[51].mxu0  ;;  %7245 = vmatprep.mubr.msk.f32.mxu0 %vm1134_vm2, %v5018_v20  ;;  %v6482_v20 = vld [vmem:[%s8763_s11 + $0x1] ss:$0 sm:$0xff] }
 0xdc3   :  { %v4943_v21 = vpop.f32.mrb[54].mxu1 }
 0xdc4   :  { %v7232_v23 = vpop.f32.mrb[55].mxu1 }
 0xdc8   :  { %v5091_v24 = vpop.f32.mrb[56].mxu1 }
 0xdc9   :  { %v7242_v25 = vpop.f32.mrb[57].mxu1  ;;  %7246 = vmatmul.mubr.msk.f32.vlgmr.msra.gmra.mrb[52].mxu0 %vm1134_vm2, %v5091_v24 }
 0xdca   :  { %7249 = vmatpush3.msra.mxu0 %v6459_v32  ;;  %7250 = vmatprep.mubr.msk.f32.mxu0 %vm1134_vm2, %v4870_v18  ;;  %v6498_v25 = vld [vmem:[%s8761_s14 + $0x78] sm:$0xff] }
 0xdcb   :  { %7263 = vmatprep.subr.mxu0 %v6469_v26 }
 0xdcc   :  { %v5328_v22 = vpop.f32.mrb[58].mxu1 }
 0xdcd   :  { %v7257_v27 = vpop.f32.mrb[59].mxu1 }
 0xdd0   :  { %v5401_v29 = vpop.f32.mrb[60].mxu1 }
 0xdd1   :  { %7251 = vmatmul.mubr.msk.f32.vlgmr.msra.gmra.mrb[52].mxu0 %vm1134_vm2, %v4943_v21  ;;  %v7262_v33 = vpop.f32.mrb[61].mxu1 }
 0xdd2   :  { %7264 = vmatpush3.msra.mxu0 %v6469_v26  ;;  %7265 = vmatprep.mubr.msk.f32.mxu0 %vm1134_vm2, %v5328_v22  ;;  %v6497_v26 = vld [vmem:[%s8761_s14 + $0x70] sm:$0xff]  ;;  %v6488_v22 = vld [vmem:[%s8764_s13 + $0x1] ss:$0 sm:$0xff] }
 0xdd3   :  { %7273 = vmatprep.subr.mxu0 %v7685_v8  ;;  %v7571_v16 = vpack.c.bf16 %v6498_v25, %v6497_v26 }
 0xdd9   :  { %7266 = vmatmul.mubr.msk.f32.vlgmr.msra.gmra.mrb[52].mxu0 %vm1134_vm2, %v5401_v29 }
 0xdda   :  { %7274 = vmatpush3.msra.mxu0 %v8538_v37  ;;  %7275 = vmatprep.mubr.msk.f32.mxu0 %vm7686_vm1, %v7685_v8  ;;  %v6478_v8 = vld [vmem:[%s8759_s9 + $0x1] ss:$0 sm:$0xff] }
 0xddb   :  { %7278 = vmatprep.subr.mxu0 %v6474_v34 }
 0xddd   :  { %7276 = vmatmul.mubr.msk.f32.vlgmr.msra.gmra.mrb[54].mxu0 %vm1134_vm2, %v4800_v31 }
 0xdde   :  { %7279 = vmatpush3.msra.mxu0 %v6474_v34 }
 0xddf   :  { %7560 = vmatprep.subr.bf16.mxu0 %v7559_v4 }
 0xe61   :  { %v5559_v36 = vpop.f32.mrb[62].mxu1 }
 0xe62   :  { %v7272_v38 = vpop.f32.mrb[63].mxu1  ;;  %7280 = vmatprep.mubr.msk.f32.mxu0 %vm1134_vm2, %v5559_v36  ;;  %v6500_v36 = vld [vmem:[%s8765_s15 + $0x1] ss:$0 sm:$0xff] }
 0xeb0   :  { %v5632_v39 = vpop.f32.mrb[54].mxu0 }
 0xeb1   :  { %v7277_v48 = vpop.f32.mrb[55].mxu0  ;;  %7281 = vmatmul.mubr.msk.f32.vlgmr.msra.gmra.mrb[52].mxu0 %vm1134_vm2, %v5632_v39 }
 0xeb2   :  { %7562 = vmatpush3.bf16.msra.mxu0 %v7559_v4  ;;  %v6505_v4 = vld [vmem:[%s8766_s16 + $0x1] ss:$0 sm:$0xff] }
 0xeb3   :  { %7564 = vmatprep.subr.bf16.mxu0 %v7563_v1 }
 0xeb6   :  { %7566 = vmatpush3.bf16.msra.mxu0 %v7563_v1 }
 0xeb7   :  { %7568 = vmatprep.subr.bf16.mxu0 %v7567_v11 }
 0xeba   :  { %7570 = vmatpush3.bf16.msra.mxu0 %v7567_v11 }
 0xebb   :  { %7572 = vmatprep.subr.bf16.mxu0 %v7571_v16 }
 0xebe   :  { %7574 = vmatpush3.bf16.msra.mxu0 %v7571_v16  ;;  %v6510_v16 = vld [vmem:[%s8771_s21] ss:$0 sm:$0xff] }
 0xf84   :  { %v7282_v37 = vpop.f32.mrb[52].mxu0 }
 0xf85   :  { %v5730_v40 = vadd.f32 %v7282_v37, %v6478_v8  ;;  %v5710_v41 = vpop.f32.mrb[53].mxu0 }
 0xf86   :  { %v5729_v46 = vadd.f32 %v6478_v8, %v5710_v41 }
 0xf87   :  { %v5732_v42 = vadd.f32 %v5730_v40, %v8312_v58 }
 0xf88   :  { %v5731_v2 = vadd.f32 %v5729_v46, %v8310_v57  ;;  %v6483_v57 = vld [vmem:[%s8760_s12 + $0x20] sm:$0xff] }
 0xf89   :  { %v5740_v5 = vsel %vm88_vm0, %v5732_v42, 0.0  ;;  %v7551_v56 = vpack.c.bf16 %v6484_v55, %v6483_v57  ;;  %v6024_v57 = vld [vmem:[%s8768_s18 + $0x18] sm:$0xff] }
 0xf8a   :  { %5741 = vadd.xlane.f32.xlu1 %v5740_v5  ;;  %v5737_v43 = vsel %vm88_vm0, %v5731_v2, 0.0 }
 0xf8b   :  { %5738 = vadd.xlane.f32.xlu0 %v5737_v43  ;;  %7552 = vmatprep.subr.bf16.mxu1 %v7551_v56 }
 0xf8c   :  { %7554 = vmatpush3.bf16.msra.mxu1 %v7551_v56 }
 0xf8d   :  { %7556 = vmatprep.subr.bf16.mxu1 %v7555_v47 }
 0xf90   :  { %7558 = vmatpush3.bf16.msra.mxu1 %v7555_v47 }
0x1017   :  { %v5742_v44 = vpop.xlane.xlu1 %5741 }
0x1018   :  { %v5744_v45 = vmul.f32 0.03125, %v5742_v44  ;;  %v5739_v49 = vpop.xlane.xlu0 %5738 }
0x1019   :  { %v5743_v50 = vmul.f32 0.03125, %v5739_v49 }
0x101a   :  { %v5746_v51 = vsub.f32 %v5732_v42, %v5744_v45 }
0x101b   :  { %v5745_v52 = vsub.f32 %v5731_v2, %v5743_v50 }
0x101c   :  { %v5748_v9 = vmul.f32 %v5746_v51, %v5746_v51 }
0x101d   :  { %v5747_v53 = vmul.f32 %v5745_v52, %v5745_v52 }
0x101e   :  { %v5752_v54 = vsel %vm88_vm0, %v5748_v9, 0.0  ;;  %v6021_v9 = vld [vmem:[%s8768_s18] sm:$0xff] }
0x101f   :  { %5753 = vadd.xlane.f32.xlu1 %v5752_v54  ;;  %v5749_v58 = vsel %vm88_vm0, %v5747_v53, 0.0  ;;  %v6022_v53 = vld [vmem:[%s8768_s18 + $0x8] sm:$0xff] }
0x1020   :  { %5750 = vadd.xlane.f32.xlu0 %v5749_v58  ;;  %v7575_v54 = vpack.c.bf16 %v6022_v53, %v6021_v9  ;;  %v6023_v58 = vld [vmem:[%s8768_s18 + $0x10] sm:$0xff] }
0x1021   :  { %v7579_v55 = vpack.c.bf16 %v6024_v57, %v6023_v58 }
0x1022   :  { %7576 = vmatprep.subr.bf16.mxu1 %v7575_v54 }
0x10ac   :  { %v5754_v10 = vpop.xlane.xlu1 %5753 }
0x10ad   :  { %v5756_v12 = vmul.f32 0.03125, %v5754_v10  ;;  %v5751_v13 = vpop.xlane.xlu0 %5750 }
0x10ae   :  { %v5755_v7 = vmul.f32 0.03125, %v5751_v13 }
0x10af   :  { %v5758_v14 = vadd.f32 1e-05, %v5756_v12 }
0x10b0   :  { %v5757_v32 = vadd.f32 1e-05, %v5755_v7  ;;  %v6119_v7 = vld [vmem:[%s8769_s20] sm:$0xff] }
0x10b1   :  { %7677 = vrsqrt.f32 %v5758_v14  ;;  %v6120_v14 = vld [vmem:[%s8769_s20 + $0x8] sm:$0xff] }
0x10b2   :  { %7679 = vrsqrt.f32 %v5757_v32  ;;  %v7583_v32 = vpack.c.bf16 %v6120_v14, %v6119_v7 }
0x10bb   :  { %v7678_v28 = vpop.eup %7677 }
0x10bc   :  { %v7680_v17 = vpop.eup %7679  ;;  %v5762_v18 = vmul.f32 %v7678_v28, %v5746_v51  ;;  %v6121_v28 = vld [vmem:[%s8769_s20 + $0x10] sm:$0xff] }
0x10bd   :  { %v5761_v19 = vmul.f32 %v7680_v17, %v5745_v52 }
0x10be   :  { %v5770_v35 = vmul.f32 %v6481_v15, %v5762_v18  ;;  %v6507_v18 = vld [vmem:[%s8770_s19] ss:$0 sm:$0xff] }
0x10bf   :  { %v5769_v21 = vmul.f32 %v6481_v15, %v5761_v19  ;;  %v6122_v15 = vld [vmem:[%s8769_s20 + $0x18] sm:$0xff] }
0x10c0   :  { %v5778_v24 = vadd.f32 %v6482_v20, %v5770_v35  ;;  %v7587_v17 = vpack.c.bf16 %v6122_v15, %v6121_v28 }
0x10c1   :  { %v5777_v23 = vadd.f32 %v6482_v20, %v5769_v21 }
0x10c3   :  { %7291 = vmatprep.mubr.msk.f32.mxu1 %vm88_vm0, %v5777_v23 }
0x10c4   :  { %7292 = vmatmul.mubr.msk.f32.vlgmr.msra.gmra.mrb[64].mxu1 %vm88_vm0, %v5778_v24 }
0x10c5   :  { %7578 = vmatpush3.bf16.msra.mxu1 %v7575_v54 }
0x10c6   :  { %7580 = vmatprep.subr.bf16.mxu1 %v7579_v55 }
0x10c9   :  { %7582 = vmatpush3.bf16.msra.mxu1 %v7579_v55 }
0x10ca   :  { %7584 = vmatprep.subr.bf16.mxu1 %v7583_v32 }
0x1197   :  { %v7293_v27 = vpop.f32.mrb[64].mxu1 }
0x1198   :  { %v5870_v29 = vadd.f32 %v7293_v27, %v6488_v22  ;;  %v5864_v33 = vpop.f32.mrb[65].mxu1 }
0x1199   :  { %v5865_v30 = vadd.f32 %v6488_v22, %v5864_v33 }
0x119a   :  { %v5874_v34 = vmax.f32 %v5870_v29, 0.0 }
0x119b   :  { %v5873_v31 = vmax.f32 %v5865_v30, 0.0 }
0x119d   :  { %7310 = vmatprep.mubr.msk.f32.mxu0 %vm2915_vm3, %v5873_v31 }
0x119e   :  { %7311 = vmatmul.mubr.msk.f32.vlgmr.msra.gmra.mrb[56].mxu0 %vm2915_vm3, %v5874_v34 }
0x1271   :  { %v7312_v38 = vpop.f32.mrb[56].mxu0 }
0x1272   :  { %v5970_v39 = vadd.f32 %v7312_v38, %v6500_v36  ;;  %v5964_v48 = vpop.f32.mrb[57].mxu0 }
0x1273   :  { %v5965_v8 = vadd.f32 %v6500_v36, %v5964_v48 }
0x1274   :  { %v5974_v37 = vadd.f32 %v5970_v39, %v5778_v24 }
0x1275   :  { %v5973_v40 = vadd.f32 %v5965_v8, %v5777_v23 }
0x1276   :  { %v5982_v41 = vsel %vm88_vm0, %v5974_v37, 0.0 }
0x1277   :  { %5983 = vadd.xlane.f32.xlu1 %v5982_v41  ;;  %v5979_v46 = vsel %vm88_vm0, %v5973_v40, 0.0 }
0x1278   :  { %5980 = vadd.xlane.f32.xlu0 %v5979_v46 }
0x1304   :  { %v5984_v42 = vpop.xlane.xlu1 %5983 }
0x1305   :  { %v5986_v2 = vmul.f32 0.03125, %v5984_v42  ;;  %v5981_v5 = vpop.xlane.xlu0 %5980 }
0x1306   :  { %v5985_v43 = vmul.f32 0.03125, %v5981_v5 }
0x1307   :  { %v5988_v44 = vsub.f32 %v5974_v37, %v5986_v2 }
0x1308   :  { %v5987_v45 = vsub.f32 %v5973_v40, %v5985_v43 }
0x1309   :  { %v5990_v49 = vmul.f32 %v5988_v44, %v5988_v44 }
0x130a   :  { %v5989_v50 = vmul.f32 %v5987_v45, %v5987_v45 }
0x130b   :  { %v5994_v51 = vsel %vm88_vm0, %v5990_v49, 0.0 }
0x130c   :  { %5995 = vadd.xlane.f32.xlu1 %v5994_v51  ;;  %v5991_v52 = vsel %vm88_vm0, %v5989_v50, 0.0 }
0x130d   :  { %5992 = vadd.xlane.f32.xlu0 %v5991_v52 }
0x1399   :  { %v5996_v56 = vpop.xlane.xlu1 %5995 }
0x139a   :  { %v5998_v60 = vmul.f32 0.03125, %v5996_v56  ;;  %v5993_v61 = vpop.xlane.xlu0 %5992 }
0x139b   :  { %v5997_v47 = vmul.f32 0.03125, %v5993_v61 }
0x139c   :  { %v6000_v62 = vadd.f32 1e-05, %v5998_v60 }
0x139d   :  { %v5999_v63 = vadd.f32 1e-05, %v5997_v47 }
0x139e   :  { %7681 = vrsqrt.f32 %v6000_v62 }
0x139f   :  { %7683 = vrsqrt.f32 %v5999_v63 }
0x13a8   :  { %v7682_v0 = vpop.eup %7681 }
0x13a9   :  { %v7684_v59 = vpop.eup %7683  ;;  %v6004_v1 = vmul.f32 %v7682_v0, %v5988_v44 }
0x13aa   :  { %v6003_v3 = vmul.f32 %v7684_v59, %v5987_v45 }
0x13ab   :  { %v6012_v11 = vmul.f32 %v6505_v4, %v6004_v1 }
0x13ac   :  { %v6011_v10 = vmul.f32 %v6505_v4, %v6003_v3 }
0x13ad   :  { %v6020_v13 = vadd.f32 %v6506_v6, %v6012_v11 }
0x13ae   :  { %v6019_v12 = vadd.f32 %v6506_v6, %v6011_v10 }
0x13b0   :  { %7321 = vmatprep.mubr.msk.f32.mxu1 %vm88_vm0, %v6019_v12 }
0x13b1   :  { %7322 = vmatmul.mubr.msk.f32.vlgmr.msra.gmra.mrb[66].mxu1 %vm88_vm0, %v6020_v13 }
0x13b2   :  { %7586 = vmatpush3.bf16.msra.mxu1 %v7583_v32 }
0x13b3   :  { %7588 = vmatprep.subr.bf16.mxu1 %v7587_v17 }
0x13b6   :  { %7590 = vmatpush3.bf16.msra.mxu1 %v7587_v17 }
0x1484   :  { %v7323_v19 = vpop.f32.mrb[66].mxu1 }
0x1485   :  { %v6110_v20 = vadd.f32 %v7323_v19, %v6507_v18  ;;  %v6104_v35 = vpop.f32.mrb[67].mxu1 }
0x1486   :  { %v6105_v21 = vadd.f32 %v6507_v18, %v6104_v35 }
0x1487   :  { %v6116_v23 = vmul.f32 0.1, %v6110_v20  ;;  %vm6114_vm4 = vcmp.ge.f32.partialorder %v6110_v20, 0.0 }
0x1488   :  { %vm6113_vm5 = vcmp.ge.f32.partialorder %v6105_v21, 0.0  ;;  %v6115_v24 = vmul.f32 0.1, %v6105_v21 }
0x1489   :  { %v6118_v25 = vsel %vm6114_vm4, %v6110_v20, %v6116_v23 }
0x148a   :  { %v6117_v26 = vsel %vm6113_vm5, %v6105_v21, %v6115_v24 }
0x148b   :  { %7332 = vmatprep.mubr.msk.f32.mxu1 %vm88_vm0, %v6117_v26 }
0x148c   :  { %7333 = vmatmul.mubr.msk.f32.vlgmr.msra.gmra.mrb[68].mxu1 %vm88_vm0, %v6118_v25 }
0x155f   :  { %v7334_v22 = vpop.f32.mrb[68].mxu1 }
0x1560   :  { %v6208_v27 = vadd.f32 %v7334_v22, %v6510_v16  ;;  %v6202_v29 = vpop.f32.mrb[69].mxu1 }
0x1561   :  { %v6203_v33 = vadd.f32 %v6510_v16, %v6202_v29 }
0x1562   :  { %6213 = vst.msk [vmem:[%s8772_s22 + $0x8] sm:$0xff] %vm6211_vm6, %v6208_v27 }
0x1563   :  { %6212 = vst.msk [vmem:[%s8772_s22] sm:$0xff] %vm6211_vm6, %v6203_v33 }

</bundles_post_ra>
